<compile_context>
chip_gen: v7x
topology: tpu7x:2x2x1
jax: 0.10.0
libtpu: 0.0.40
codegen_flags: <defaults>
</compile_context>

<pallas_src>
import jax
import jax.numpy as jnp
import numpy as np
from jax.experimental import pallas as pl
from jax.experimental.pallas import tpu as pltpu

H = 32          # hidden_size
L = 8           # encoder sequence length
V = 64          # output_size == voc.num_words
T = 10          # max_length (greedy decode steps)
SOS_TOKEN = 1   # config.SOS_token
OUT_LANES = 128 # lane-dense output slabs


def _greedy_decode_kernel(emb_ref, enc_ref, h0_ref,
                          wi_ref, wh_ref, bi_ref, bh_ref,
                          wah_ref, wae_ref, ba_ref, v_ref,
                          wch_ref, wcc_ref, bc_ref,
                          wo_ref, bo_ref,
                          tok_ref, score_ref):
    dot = lambda a, b: jnp.dot(a, b, preferred_element_type=jnp.float32)

    emb_tab = emb_ref[...]                                  # (V, H) embedding table
    enc = enc_ref[...]                                      # (L, H) encoder outputs (batch 1)
    v = v_ref[...]                                          # (1, H)

    # Encoder-side attention projection is constant across decode steps: hoist it.
    proj_e = dot(enc, wae_ref[...]) + ba_ref[...]           # (L, H)

    # Initial decoder input = SOS token embedding; initial hidden from encoder.
    # TODO(synk): embedding dropout is identity at inference; training-mode dropout not implemented.
    emb = emb_ref[pl.ds(SOS_TOKEN, 1), :]                   # (1, H)
    h = h0_ref[...]                                         # (1, H)

    ids = jax.lax.broadcasted_iota(jnp.int32, (1, V), 1)    # lane ids for argmax / one-hot

    for t in range(T):                                      # short static loop -> fully unrolled
        # ---- GRU cell (2 fused matmuls instead of 6) ----
        gi = dot(emb, wi_ref[...]) + bi_ref[...]            # (1, 3H) gates r|z|n
        gh = dot(h, wh_ref[...]) + bh_ref[...]              # (1, 3H)
        r = jax.nn.sigmoid(gi[:, 0:H] + gh[:, 0:H])
        z = jax.nn.sigmoid(gi[:, H:2 * H] + gh[:, H:2 * H])
        n = jnp.tanh(gi[:, 2 * H:3 * H] + r * gh[:, 2 * H:3 * H])
        h = (1.0 - z) * n + z * h                           # (1, H) new hidden == rnn_output

        # ---- concat attention (vectorized over L) ----
        energy = jnp.tanh(dot(h, wah_ref[...]) + proj_e)    # (L, H)
        score = jnp.sum(v * energy, axis=1, keepdims=True)  # (L, 1)
        m = jnp.max(score, axis=0, keepdims=True)
        e = jnp.exp(score - m)
        attn = e / jnp.sum(e, axis=0, keepdims=True)        # (L, 1) softmax over positions
        context = jnp.sum(attn * enc, axis=0, keepdims=True)  # (1, H)

        # ---- concat linear + tanh, output linear ----
        concat_out = jnp.tanh(dot(h, wch_ref[...]) + dot(context, wcc_ref[...]) + bc_ref[...])
        logits = dot(concat_out, wo_ref[...]) + bo_ref[...]   # (1, V)

        # Greedy pick: softmax is monotone, so argmax(logits) == argmax(probs);
        # the max probability is exp(0)/sum(exp(logits - max)) = 1/denom.
        mx = jnp.max(logits, axis=1, keepdims=True)
        denom = jnp.sum(jnp.exp(logits - mx), axis=1, keepdims=True)
        best_p = 1.0 / denom                                  # (1, 1) max softmax prob
        tok = jnp.min(jnp.where(logits == mx, ids, V),
                      axis=1, keepdims=True)                  # (1, 1) first argmax index

        # Feed the chosen token back: one-hot @ embedding (in-kernel gather, MXU).
        onehot = (ids == tok).astype(jnp.float32)             # (1, V)
        emb = dot(onehot, emb_tab)                            # (1, H)

        # Lane-dense per-step outputs.
        tok_ref[pl.ds(t, 1), :] = jnp.broadcast_to(tok, (1, OUT_LANES))
        score_ref[pl.ds(t, 1), :] = jnp.broadcast_to(best_p, (1, OUT_LANES))


def greedy_search_decode(params, encoder_output, encoder_hidden):
    """Mirrors GreedySearchDecoder.forward (decode loop): returns (all_tokens (T,), all_scores (T,)).

    TODO(synk): the encoder forward (EncoderRNN) is not defined in the spec; encoder_outputs
    and encoder_hidden are taken as precomputed inputs, and decoder_hidden = encoder_hidden[:1].
    """
    h0 = encoder_hidden[0]                                  # n_layers = 1 -> (1, H)
    enc = encoder_output[:, 0, :]                           # (L, H), batch size 1

    # One-time weight preparation (single kernel call, so this is not per-token work).
    wi = params["w_ih"].T                                   # (H, 3H)
    wh = params["w_hh"].T                                   # (H, 3H)
    bi = params["b_ih"].reshape(1, 3 * H)
    bh = params["b_hh"].reshape(1, 3 * H)
    wah = params["w_attn"][:, :H].T                         # (H, H) applied to rnn_output
    wae = params["w_attn"][:, H:].T                         # (H, H) applied to encoder outputs
    ba = params["b_attn"].reshape(1, H)
    v = params["v"].reshape(1, H)
    wch = params["w_concat"][:, :H].T
    wcc = params["w_concat"][:, H:].T
    bc = params["b_concat"].reshape(1, H)
    wo = params["w_out"].T                                  # (H, V)
    bo = params["b_out"].reshape(1, V)

    args = (params["embedding"], enc, h0, wi, wh, bi, bh,
            wah, wae, ba, v, wch, wcc, bc, wo, bo)
    vmem = pl.BlockSpec(memory_space=pltpu.MemorySpace.VMEM)
    tok_pad, score_pad = pl.pallas_call(
        _greedy_decode_kernel,
        out_shape=(jax.ShapeDtypeStruct((T, OUT_LANES), jnp.int32),
                   jax.ShapeDtypeStruct((T, OUT_LANES), jnp.float32)),
        in_specs=[vmem] * len(args),
        out_specs=(vmem, vmem),
    )(*args)
    return tok_pad[:, 0], score_pad[:, 0]


def reference_greedy(params, encoder_output, encoder_hidden):
    """Pure-JAX replica of the PyTorch greedy search (inference mode)."""
    h = encoder_hidden[0]                                   # (1, H)
    enc = encoder_output[:, 0, :]                           # (L, H)
    tok = jnp.array([SOS_TOKEN], dtype=jnp.int32)
    tokens, scores = [], []
    for _ in range(T):
        emb = params["embedding"][tok]                      # (1, H)
        gi = emb @ params["w_ih"].T + params["b_ih"]
        gh = h @ params["w_hh"].T + params["b_hh"]
        r = jax.nn.sigmoid(gi[:, :H] + gh[:, :H])
        z = jax.nn.sigmoid(gi[:, H:2 * H] + gh[:, H:2 * H])
        n = jnp.tanh(gi[:, 2 * H:] + r * gh[:, 2 * H:])
        h = (1 - z) * n + z * h                             # (1, H)

        hid_exp = jnp.broadcast_to(h, (L, H))
        cat = jnp.concatenate([hid_exp, enc], axis=1)       # (L, 2H)
        energy = jnp.tanh(cat @ params["w_attn"].T + params["b_attn"])
        score = jnp.sum(params["v"] * energy, axis=1)       # (L,)
        attn = jax.nn.softmax(score)                        # (L,)
        context = jnp.sum(attn[:, None] * enc, axis=0, keepdims=True)  # (1, H)

        concat_in = jnp.concatenate([h, context], axis=1)
        concat_out = jnp.tanh(concat_in @ params["w_concat"].T + params["b_concat"])
        probs = jax.nn.softmax(concat_out @ params["w_out"].T + params["b_out"], axis=1)

        t_id = jnp.argmax(probs, axis=1)                    # (1,)
        s_val = jnp.max(probs, axis=1)                      # (1,)
        tokens.append(t_id)
        scores.append(s_val)
        tok = t_id.astype(jnp.int32)
    return jnp.concatenate(tokens), jnp.concatenate(scores)


def init_params(key):
    ks = jax.random.split(key, 12)
    s = 0.1
    return {
        "embedding": s * jax.random.normal(ks[0], (V, H), jnp.float32),
        "w_ih": s * jax.random.normal(ks[1], (3 * H, H), jnp.float32),
        "w_hh": s * jax.random.normal(ks[2], (3 * H, H), jnp.float32),
        "b_ih": s * jax.random.normal(ks[3], (3 * H,), jnp.float32),
        "b_hh": s * jax.random.normal(ks[4], (3 * H,), jnp.float32),
        "w_attn": s * jax.random.normal(ks[5], (H, 2 * H), jnp.float32),
        "b_attn": s * jax.random.normal(ks[6], (H,), jnp.float32),
        "v": s * jax.random.normal(ks[7], (H,), jnp.float32),
        "w_concat": s * jax.random.normal(ks[8], (H, 2 * H), jnp.float32),
        "b_concat": s * jax.random.normal(ks[9], (H,), jnp.float32),
        "w_out": s * jax.random.normal(ks[10], (V, H), jnp.float32),
        "b_out": s * jax.random.normal(ks[11], (V,), jnp.float32),
    }


if __name__ == "__main__":
    key = jax.random.PRNGKey(0)
    kp, k1, k2 = jax.random.split(key, 3)
    params = init_params(kp)

    encoder_output = 0.1 * jax.random.normal(k1, (L, 1, H), jnp.float32)   # (L, B=1, H)
    encoder_hidden = 0.1 * jax.random.normal(k2, (1, 1, H), jnp.float32)   # (n_layers, B=1, H)

    tokens, scores = greedy_search_decode(params, encoder_output, encoder_hidden)
    tokens, scores = jax.block_until_ready((tokens, scores))

    ref_tokens, ref_scores = reference_greedy(params, encoder_output, encoder_hidden)

    assert tokens.shape == (T,) and scores.shape == (T,)
    np.testing.assert_array_equal(np.asarray(tokens), np.asarray(ref_tokens))
    np.testing.assert_allclose(np.asarray(scores), np.asarray(ref_scores),
                               rtol=1e-5, atol=1e-6)
    print("KERNEL_OK")
</pallas_src>

<mosaic_0001>
module attributes {stable_mosaic.version = 11 : i64} {
  func.func @_greedy_decode_kernel(%arg0: memref<64x32xf32, #tpu.memory_space<vmem>>, %arg1: memref<8x32xf32, #tpu.memory_space<vmem>>, %arg2: memref<1x32xf32, #tpu.memory_space<vmem>>, %arg3: memref<32x96xf32, #tpu.memory_space<vmem>>, %arg4: memref<32x96xf32, #tpu.memory_space<vmem>>, %arg5: memref<1x96xf32, #tpu.memory_space<vmem>>, %arg6: memref<1x96xf32, #tpu.memory_space<vmem>>, %arg7: memref<32x32xf32, #tpu.memory_space<vmem>>, %arg8: memref<32x32xf32, #tpu.memory_space<vmem>>, %arg9: memref<1x32xf32, #tpu.memory_space<vmem>>, %arg10: memref<1x32xf32, #tpu.memory_space<vmem>>, %arg11: memref<32x32xf32, #tpu.memory_space<vmem>>, %arg12: memref<32x32xf32, #tpu.memory_space<vmem>>, %arg13: memref<1x32xf32, #tpu.memory_space<vmem>>, %arg14: memref<32x64xf32, #tpu.memory_space<vmem>>, %arg15: memref<1x64xf32, #tpu.memory_space<vmem>>, %arg16: memref<10x128xi32, #tpu.memory_space<vmem>>, %arg17: memref<10x128xf32, #tpu.memory_space<vmem>>) attributes {dimension_semantics = [], scalar_prefetch = 0 : i64, scratch_operands = 0 : i64, tpu.core_type = #tpu.core_type<tc>} {
    %c0 = arith.constant 0 : index
    %c0_0 = arith.constant 0 : index
    %0 = vector.load %arg0[%c0, %c0_0] : memref<64x32xf32, #tpu.memory_space<vmem>>, vector<64x32xf32>
    %c0_1 = arith.constant 0 : index
    %c0_2 = arith.constant 0 : index
    %1 = vector.load %arg1[%c0_1, %c0_2] : memref<8x32xf32, #tpu.memory_space<vmem>>, vector<8x32xf32>
    %c0_3 = arith.constant 0 : index
    %c0_4 = arith.constant 0 : index
    %2 = vector.load %arg10[%c0_3, %c0_4] : memref<1x32xf32, #tpu.memory_space<vmem>>, vector<1x32xf32>
    %c0_5 = arith.constant 0 : index
    %c0_6 = arith.constant 0 : index
    %3 = vector.load %arg8[%c0_5, %c0_6] : memref<32x32xf32, #tpu.memory_space<vmem>>, vector<32x32xf32>
    %cst = arith.constant dense<0.000000e+00> : vector<8x32xf32>
    %4 = tpu.matmul %1, %3, %cst {dimension_numbers = #tpu.dot_dimension_numbers<[1], [0], [0], [1], [0, 0, 1, 1], [], []>} : vector<8x32xf32>, vector<32x32xf32>, vector<8x32xf32> -> vector<8x32xf32>
    %c0_7 = arith.constant 0 : index
    %c0_8 = arith.constant 0 : index
    %5 = vector.load %arg9[%c0_7, %c0_8] : memref<1x32xf32, #tpu.memory_space<vmem>>, vector<1x32xf32>
    %6 = vector.broadcast %5 : vector<1x32xf32> to vector<8x32xf32>
    %7 = arith.addf %4, %6 : vector<8x32xf32>
    %c1 = arith.constant 1 : index
    %c0_9 = arith.constant 0 : index
    %8 = vector.load %arg0[%c1, %c0_9] : memref<64x32xf32, #tpu.memory_space<vmem>>, vector<1x32xf32>
    %c0_10 = arith.constant 0 : index
    %c0_11 = arith.constant 0 : index
    %9 = vector.load %arg2[%c0_10, %c0_11] : memref<1x32xf32, #tpu.memory_space<vmem>>, vector<1x32xf32>
    %10 = tpu.iota {dimensions = array<i32: 1>} : vector<1x64xi32>
    %c0_12 = arith.constant 0 : index
    %c0_13 = arith.constant 0 : index
    %11 = vector.load %arg3[%c0_12, %c0_13] : memref<32x96xf32, #tpu.memory_space<vmem>>, vector<32x96xf32>
    %cst_14 = arith.constant dense<0.000000e+00> : vector<1x96xf32>
    %12 = tpu.matmul %8, %11, %cst_14 {dimension_numbers = #tpu.dot_dimension_numbers<[1], [0], [0], [1], [0, 0, 1, 1], [], []>} : vector<1x32xf32>, vector<32x96xf32>, vector<1x96xf32> -> vector<1x96xf32>
    %c0_15 = arith.constant 0 : index
    %c0_16 = arith.constant 0 : index
    %13 = vector.load %arg5[%c0_15, %c0_16] : memref<1x96xf32, #tpu.memory_space<vmem>>, vector<1x96xf32>
    %14 = arith.addf %12, %13 : vector<1x96xf32>
    %c0_17 = arith.constant 0 : index
    %c0_18 = arith.constant 0 : index
    %15 = vector.load %arg4[%c0_17, %c0_18] : memref<32x96xf32, #tpu.memory_space<vmem>>, vector<32x96xf32>
    %cst_19 = arith.constant dense<0.000000e+00> : vector<1x96xf32>
    %16 = tpu.matmul %9, %15, %cst_19 {dimension_numbers = #tpu.dot_dimension_numbers<[1], [0], [0], [1], [0, 0, 1, 1], [], []>} : vector<1x32xf32>, vector<32x96xf32>, vector<1x96xf32> -> vector<1x96xf32>
    %c0_20 = arith.constant 0 : index
    %c0_21 = arith.constant 0 : index
    %17 = vector.load %arg6[%c0_20, %c0_21] : memref<1x96xf32, #tpu.memory_space<vmem>>, vector<1x96xf32>
    %18 = arith.addf %16, %17 : vector<1x96xf32>
    %19 = vector.extract_strided_slice %14 {offsets = [0, 0], sizes = [1, 32], strides = [1, 1]} : vector<1x96xf32> to vector<1x32xf32>
    %20 = vector.extract_strided_slice %18 {offsets = [0, 0], sizes = [1, 32], strides = [1, 1]} : vector<1x96xf32> to vector<1x32xf32>
    %21 = arith.addf %19, %20 : vector<1x32xf32>
    %22 = arith.negf %21 : vector<1x32xf32>
    %23 = math.exp %22 : vector<1x32xf32>
    %cst_22 = arith.constant 1.000000e+00 : f32
    %24 = vector.broadcast %cst_22 : f32 to vector<1x32xf32>
    %25 = arith.addf %24, %23 : vector<1x32xf32>
    %26 = arith.divf %24, %25 : vector<1x32xf32>
    %27 = vector.extract_strided_slice %14 {offsets = [0, 32], sizes = [1, 32], strides = [1, 1]} : vector<1x96xf32> to vector<1x32xf32>
    %28 = vector.extract_strided_slice %18 {offsets = [0, 32], sizes = [1, 32], strides = [1, 1]} : vector<1x96xf32> to vector<1x32xf32>
    %29 = arith.addf %27, %28 : vector<1x32xf32>
    %30 = arith.negf %29 : vector<1x32xf32>
    %31 = math.exp %30 : vector<1x32xf32>
    %cst_23 = arith.constant 1.000000e+00 : f32
    %32 = vector.broadcast %cst_23 : f32 to vector<1x32xf32>
    %33 = arith.addf %32, %31 : vector<1x32xf32>
    %34 = arith.divf %32, %33 : vector<1x32xf32>
    %35 = vector.extract_strided_slice %14 {offsets = [0, 64], sizes = [1, 32], strides = [1, 1]} : vector<1x96xf32> to vector<1x32xf32>
    %36 = vector.extract_strided_slice %18 {offsets = [0, 64], sizes = [1, 32], strides = [1, 1]} : vector<1x96xf32> to vector<1x32xf32>
    %37 = arith.mulf %26, %36 : vector<1x32xf32>
    %38 = arith.addf %35, %37 : vector<1x32xf32>
    %39 = math.tanh %38 : vector<1x32xf32>
    %cst_24 = arith.constant 1.000000e+00 : f32
    %40 = vector.broadcast %cst_24 : f32 to vector<1x32xf32>
    %41 = arith.subf %40, %34 : vector<1x32xf32>
    %42 = arith.mulf %41, %39 : vector<1x32xf32>
    %43 = arith.mulf %34, %9 : vector<1x32xf32>
    %44 = arith.addf %42, %43 : vector<1x32xf32>
    %c0_25 = arith.constant 0 : index
    %c0_26 = arith.constant 0 : index
    %45 = vector.load %arg7[%c0_25, %c0_26] : memref<32x32xf32, #tpu.memory_space<vmem>>, vector<32x32xf32>
    %cst_27 = arith.constant dense<0.000000e+00> : vector<1x32xf32>
    %46 = tpu.matmul %44, %45, %cst_27 {dimension_numbers = #tpu.dot_dimension_numbers<[1], [0], [0], [1], [0, 0, 1, 1], [], []>} : vector<1x32xf32>, vector<32x32xf32>, vector<1x32xf32> -> vector<1x32xf32>
    %47 = vector.broadcast %46 : vector<1x32xf32> to vector<8x32xf32>
    %48 = arith.addf %47, %7 : vector<8x32xf32>
    %49 = math.tanh %48 : vector<8x32xf32>
    %50 = vector.broadcast %2 : vector<1x32xf32> to vector<8x32xf32>
    %51 = arith.mulf %50, %49 : vector<8x32xf32>
    %cst_28 = arith.constant dense<0.000000e+00> : vector<8xf32>
    %52 = vector.multi_reduction <add>, %51, %cst_28 [1] : vector<8x32xf32> to vector<8xf32>
    %53 = vector.shape_cast %52 : vector<8xf32> to vector<8x1xf32>
    %cst_29 = arith.constant dense<0xFF800000> : vector<1xf32>
    %54 = vector.multi_reduction <maximumf>, %53, %cst_29 [0] : vector<8x1xf32> to vector<1xf32>
    %55 = vector.shape_cast %54 : vector<1xf32> to vector<1x1xf32>
    %56 = vector.broadcast %55 : vector<1x1xf32> to vector<8x1xf32>
    %57 = arith.subf %53, %56 : vector<8x1xf32>
    %58 = math.exp %57 : vector<8x1xf32>
    %cst_30 = arith.constant dense<0.000000e+00> : vector<1xf32>
    %59 = vector.multi_reduction <add>, %58, %cst_30 [0] : vector<8x1xf32> to vector<1xf32>
    %60 = vector.shape_cast %59 : vector<1xf32> to vector<1x1xf32>
    %61 = vector.broadcast %60 : vector<1x1xf32> to vector<8x1xf32>
    %62 = arith.divf %58, %61 : vector<8x1xf32>
    %63 = vector.broadcast %62 : vector<8x1xf32> to vector<8x32xf32>
    %64 = arith.mulf %63, %1 : vector<8x32xf32>
    %cst_31 = arith.constant dense<0.000000e+00> : vector<32xf32>
    %65 = vector.multi_reduction <add>, %64, %cst_31 [0] : vector<8x32xf32> to vector<32xf32>
    %66 = vector.shape_cast %65 : vector<32xf32> to vector<1x32xf32>
    %c0_32 = arith.constant 0 : index
    %c0_33 = arith.constant 0 : index
    %67 = vector.load %arg11[%c0_32, %c0_33] : memref<32x32xf32, #tpu.memory_space<vmem>>, vector<32x32xf32>
    %cst_34 = arith.constant dense<0.000000e+00> : vector<1x32xf32>
    %68 = tpu.matmul %44, %67, %cst_34 {dimension_numbers = #tpu.dot_dimension_numbers<[1], [0], [0], [1], [0, 0, 1, 1], [], []>} : vector<1x32xf32>, vector<32x32xf32>, vector<1x32xf32> -> vector<1x32xf32>
    %c0_35 = arith.constant 0 : index
    %c0_36 = arith.constant 0 : index
    %69 = vector.load %arg12[%c0_35, %c0_36] : memref<32x32xf32, #tpu.memory_space<vmem>>, vector<32x32xf32>
    %cst_37 = arith.constant dense<0.000000e+00> : vector<1x32xf32>
    %70 = tpu.matmul %66, %69, %cst_37 {dimension_numbers = #tpu.dot_dimension_numbers<[1], [0], [0], [1], [0, 0, 1, 1], [], []>} : vector<1x32xf32>, vector<32x32xf32>, vector<1x32xf32> -> vector<1x32xf32>
    %71 = arith.addf %68, %70 : vector<1x32xf32>
    %c0_38 = arith.constant 0 : index
    %c0_39 = arith.constant 0 : index
    %72 = vector.load %arg13[%c0_38, %c0_39] : memref<1x32xf32, #tpu.memory_space<vmem>>, vector<1x32xf32>
    %73 = arith.addf %71, %72 : vector<1x32xf32>
    %74 = math.tanh %73 : vector<1x32xf32>
    %c0_40 = arith.constant 0 : index
    %c0_41 = arith.constant 0 : index
    %75 = vector.load %arg14[%c0_40, %c0_41] : memref<32x64xf32, #tpu.memory_space<vmem>>, vector<32x64xf32>
    %cst_42 = arith.constant dense<0.000000e+00> : vector<1x64xf32>
    %76 = tpu.matmul %74, %75, %cst_42 {dimension_numbers = #tpu.dot_dimension_numbers<[1], [0], [0], [1], [0, 0, 1, 1], [], []>} : vector<1x32xf32>, vector<32x64xf32>, vector<1x64xf32> -> vector<1x64xf32>
    %c0_43 = arith.constant 0 : index
    %c0_44 = arith.constant 0 : index
    %77 = vector.load %arg15[%c0_43, %c0_44] : memref<1x64xf32, #tpu.memory_space<vmem>>, vector<1x64xf32>
    %78 = arith.addf %76, %77 : vector<1x64xf32>
    %cst_45 = arith.constant dense<0xFF800000> : vector<1xf32>
    %79 = vector.multi_reduction <maximumf>, %78, %cst_45 [1] : vector<1x64xf32> to vector<1xf32>
    %80 = vector.shape_cast %79 : vector<1xf32> to vector<1x1xf32>
    %81 = vector.broadcast %80 : vector<1x1xf32> to vector<1x64xf32>
    %82 = arith.subf %78, %81 : vector<1x64xf32>
    %83 = math.exp %82 : vector<1x64xf32>
    %cst_46 = arith.constant dense<0.000000e+00> : vector<1xf32>
    %84 = vector.multi_reduction <add>, %83, %cst_46 [1] : vector<1x64xf32> to vector<1xf32>
    %85 = vector.shape_cast %84 : vector<1xf32> to vector<1x1xf32>
    %cst_47 = arith.constant 1.000000e+00 : f32
    %86 = vector.broadcast %cst_47 : f32 to vector<1x1xf32>
    %87 = arith.divf %86, %85 : vector<1x1xf32>
    %88 = vector.broadcast %80 : vector<1x1xf32> to vector<1x64xf32>
    %89 = arith.cmpf oeq, %78, %88 : vector<1x64xf32>
    %c64_i32 = arith.constant 64 : i32
    %90 = vector.broadcast %c64_i32 : i32 to vector<1x64xi32>
    %91 = arith.select %89, %10, %90 : vector<1x64xi1>, vector<1x64xi32>
    %cst_48 = arith.constant dense<2147483647> : vector<1xi32>
    %92 = vector.multi_reduction <minsi>, %91, %cst_48 [1] : vector<1x64xi32> to vector<1xi32>
    %93 = vector.shape_cast %92 : vector<1xi32> to vector<1x1xi32>
    %94 = vector.broadcast %93 : vector<1x1xi32> to vector<1x64xi32>
    %95 = arith.cmpi eq, %10, %94 : vector<1x64xi32>
    %96 = arith.extui %95 : vector<1x64xi1> to vector<1x64xi32>
    %97 = arith.sitofp %96 : vector<1x64xi32> to vector<1x64xf32>
    %cst_49 = arith.constant dense<0.000000e+00> : vector<1x32xf32>
    %98 = tpu.matmul %97, %0, %cst_49 {dimension_numbers = #tpu.dot_dimension_numbers<[1], [0], [0], [1], [0, 0, 1, 1], [], []>} : vector<1x64xf32>, vector<64x32xf32>, vector<1x32xf32> -> vector<1x32xf32>
    %99 = vector.shape_cast %93 : vector<1x1xi32> to vector<1x1xi32>
    %100 = vector.broadcast %99 : vector<1x1xi32> to vector<1x128xi32>
    %c0_50 = arith.constant 0 : index
    %c0_51 = arith.constant 0 : index
    %101 = vector.load %arg16[%c0_50, %c0_51] : memref<10x128xi32, #tpu.memory_space<vmem>>, vector<1x128xi32>
    tpu.vector_store %arg16[%c0_50, %c0_51], %100 {strides = array<i32>} : memref<10x128xi32, #tpu.memory_space<vmem>>, vector<1x128xi32>,
    %102 = vector.shape_cast %87 : vector<1x1xf32> to vector<1x1xf32>
    %103 = vector.broadcast %102 : vector<1x1xf32> to vector<1x128xf32>
    %c0_52 = arith.constant 0 : index
    %c0_53 = arith.constant 0 : index
    %104 = vector.load %arg17[%c0_52, %c0_53] : memref<10x128xf32, #tpu.memory_space<vmem>>, vector<1x128xf32>
    tpu.vector_store %arg17[%c0_52, %c0_53], %103 {strides = array<i32>} : memref<10x128xf32, #tpu.memory_space<vmem>>, vector<1x128xf32>,
    %c0_54 = arith.constant 0 : index
    %c0_55 = arith.constant 0 : index
    %105 = vector.load %arg3[%c0_54, %c0_55] : memref<32x96xf32, #tpu.memory_space<vmem>>, vector<32x96xf32>
    %cst_56 = arith.constant dense<0.000000e+00> : vector<1x96xf32>
    %106 = tpu.matmul %98, %105, %cst_56 {dimension_numbers = #tpu.dot_dimension_numbers<[1], [0], [0], [1], [0, 0, 1, 1], [], []>} : vector<1x32xf32>, vector<32x96xf32>, vector<1x96xf32> -> vector<1x96xf32>
    %c0_57 = arith.constant 0 : index
    %c0_58 = arith.constant 0 : index
    %107 = vector.load %arg5[%c0_57, %c0_58] : memref<1x96xf32, #tpu.memory_space<vmem>>, vector<1x96xf32>
    %108 = arith.addf %106, %107 : vector<1x96xf32>
    %c0_59 = arith.constant 0 : index
    %c0_60 = arith.constant 0 : index
    %109 = vector.load %arg4[%c0_59, %c0_60] : memref<32x96xf32, #tpu.memory_space<vmem>>, vector<32x96xf32>
    %cst_61 = arith.constant dense<0.000000e+00> : vector<1x96xf32>
    %110 = tpu.matmul %44, %109, %cst_61 {dimension_numbers = #tpu.dot_dimension_numbers<[1], [0], [0], [1], [0, 0, 1, 1], [], []>} : vector<1x32xf32>, vector<32x96xf32>, vector<1x96xf32> -> vector<1x96xf32>
    %c0_62 = arith.constant 0 : index
    %c0_63 = arith.constant 0 : index
    %111 = vector.load %arg6[%c0_62, %c0_63] : memref<1x96xf32, #tpu.memory_space<vmem>>, vector<1x96xf32>
    %112 = arith.addf %110, %111 : vector<1x96xf32>
    %113 = vector.extract_strided_slice %108 {offsets = [0, 0], sizes = [1, 32], strides = [1, 1]} : vector<1x96xf32> to vector<1x32xf32>
    %114 = vector.extract_strided_slice %112 {offsets = [0, 0], sizes = [1, 32], strides = [1, 1]} : vector<1x96xf32> to vector<1x32xf32>
    %115 = arith.addf %113, %114 : vector<1x32xf32>
    %116 = arith.negf %115 : vector<1x32xf32>
    %117 = math.exp %116 : vector<1x32xf32>
    %cst_64 = arith.constant 1.000000e+00 : f32
    %118 = vector.broadcast %cst_64 : f32 to vector<1x32xf32>
    %119 = arith.addf %118, %117 : vector<1x32xf32>
    %120 = arith.divf %118, %119 : vector<1x32xf32>
    %121 = vector.extract_strided_slice %108 {offsets = [0, 32], sizes = [1, 32], strides = [1, 1]} : vector<1x96xf32> to vector<1x32xf32>
    %122 = vector.extract_strided_slice %112 {offsets = [0, 32], sizes = [1, 32], strides = [1, 1]} : vector<1x96xf32> to vector<1x32xf32>
    %123 = arith.addf %121, %122 : vector<1x32xf32>
    %124 = arith.negf %123 : vector<1x32xf32>
    %125 = math.exp %124 : vector<1x32xf32>
    %cst_65 = arith.constant 1.000000e+00 : f32
    %126 = vector.broadcast %cst_65 : f32 to vector<1x32xf32>
    %127 = arith.addf %126, %125 : vector<1x32xf32>
    %128 = arith.divf %126, %127 : vector<1x32xf32>
    %129 = vector.extract_strided_slice %108 {offsets = [0, 64], sizes = [1, 32], strides = [1, 1]} : vector<1x96xf32> to vector<1x32xf32>
    %130 = vector.extract_strided_slice %112 {offsets = [0, 64], sizes = [1, 32], strides = [1, 1]} : vector<1x96xf32> to vector<1x32xf32>
    %131 = arith.mulf %120, %130 : vector<1x32xf32>
    %132 = arith.addf %129, %131 : vector<1x32xf32>
    %133 = math.tanh %132 : vector<1x32xf32>
    %cst_66 = arith.constant 1.000000e+00 : f32
    %134 = vector.broadcast %cst_66 : f32 to vector<1x32xf32>
    %135 = arith.subf %134, %128 : vector<1x32xf32>
    %136 = arith.mulf %135, %133 : vector<1x32xf32>
    %137 = arith.mulf %128, %44 : vector<1x32xf32>
    %138 = arith.addf %136, %137 : vector<1x32xf32>
    %c0_67 = arith.constant 0 : index
    %c0_68 = arith.constant 0 : index
    %139 = vector.load %arg7[%c0_67, %c0_68] : memref<32x32xf32, #tpu.memory_space<vmem>>, vector<32x32xf32>
    %cst_69 = arith.constant dense<0.000000e+00> : vector<1x32xf32>
    %140 = tpu.matmul %138, %139, %cst_69 {dimension_numbers = #tpu.dot_dimension_numbers<[1], [0], [0], [1], [0, 0, 1, 1], [], []>} : vector<1x32xf32>, vector<32x32xf32>, vector<1x32xf32> -> vector<1x32xf32>
    %141 = vector.broadcast %140 : vector<1x32xf32> to vector<8x32xf32>
    %142 = arith.addf %141, %7 : vector<8x32xf32>
    %143 = math.tanh %142 : vector<8x32xf32>
    %144 = vector.broadcast %2 : vector<1x32xf32> to vector<8x32xf32>
    %145 = arith.mulf %144, %143 : vector<8x32xf32>
    %cst_70 = arith.constant dense<0.000000e+00> : vector<8xf32>
    %146 = vector.multi_reduction <add>, %145, %cst_70 [1] : vector<8x32xf32> to vector<8xf32>
    %147 = vector.shape_cast %146 : vector<8xf32> to vector<8x1xf32>
    %cst_71 = arith.constant dense<0xFF800000> : vector<1xf32>
    %148 = vector.multi_reduction <maximumf>, %147, %cst_71 [0] : vector<8x1xf32> to vector<1xf32>
    %149 = vector.shape_cast %148 : vector<1xf32> to vector<1x1xf32>
    %150 = vector.broadcast %149 : vector<1x1xf32> to vector<8x1xf32>
    %151 = arith.subf %147, %150 : vector<8x1xf32>
    %152 = math.exp %151 : vector<8x1xf32>
    %cst_72 = arith.constant dense<0.000000e+00> : vector<1xf32>
    %153 = vector.multi_reduction <add>, %152, %cst_72 [0] : vector<8x1xf32> to vector<1xf32>
    %154 = vector.shape_cast %153 : vector<1xf32> to vector<1x1xf32>
    %155 = vector.broadcast %154 : vector<1x1xf32> to vector<8x1xf32>
    %156 = arith.divf %152, %155 : vector<8x1xf32>
    %157 = vector.broadcast %156 : vector<8x1xf32> to vector<8x32xf32>
    %158 = arith.mulf %157, %1 : vector<8x32xf32>
    %cst_73 = arith.constant dense<0.000000e+00> : vector<32xf32>
    %159 = vector.multi_reduction <add>, %158, %cst_73 [0] : vector<8x32xf32> to vector<32xf32>
    %160 = vector.shape_cast %159 : vector<32xf32> to vector<1x32xf32>
    %c0_74 = arith.constant 0 : index
    %c0_75 = arith.constant 0 : index
    %161 = vector.load %arg11[%c0_74, %c0_75] : memref<32x32xf32, #tpu.memory_space<vmem>>, vector<32x32xf32>
    %cst_76 = arith.constant dense<0.000000e+00> : vector<1x32xf32>
    %162 = tpu.matmul %138, %161, %cst_76 {dimension_numbers = #tpu.dot_dimension_numbers<[1], [0], [0], [1], [0, 0, 1, 1], [], []>} : vector<1x32xf32>, vector<32x32xf32>, vector<1x32xf32> -> vector<1x32xf32>
    %c0_77 = arith.constant 0 : index
    %c0_78 = arith.constant 0 : index
    %163 = vector.load %arg12[%c0_77, %c0_78] : memref<32x32xf32, #tpu.memory_space<vmem>>, vector<32x32xf32>
    %cst_79 = arith.constant dense<0.000000e+00> : vector<1x32xf32>
    %164 = tpu.matmul %160, %163, %cst_79 {dimension_numbers = #tpu.dot_dimension_numbers<[1], [0], [0], [1], [0, 0, 1, 1], [], []>} : vector<1x32xf32>, vector<32x32xf32>, vector<1x32xf32> -> vector<1x32xf32>
    %165 = arith.addf %162, %164 : vector<1x32xf32>
    %c0_80 = arith.constant 0 : index
    %c0_81 = arith.constant 0 : index
    %166 = vector.load %arg13[%c0_80, %c0_81] : memref<1x32xf32, #tpu.memory_space<vmem>>, vector<1x32xf32>
    %167 = arith.addf %165, %166 : vector<1x32xf32>
    %168 = math.tanh %167 : vector<1x32xf32>
    %c0_82 = arith.constant 0 : index
    %c0_83 = arith.constant 0 : index
    %169 = vector.load %arg14[%c0_82, %c0_83] : memref<32x64xf32, #tpu.memory_space<vmem>>, vector<32x64xf32>
    %cst_84 = arith.constant dense<0.000000e+00> : vector<1x64xf32>
    %170 = tpu.matmul %168, %169, %cst_84 {dimension_numbers = #tpu.dot_dimension_numbers<[1], [0], [0], [1], [0, 0, 1, 1], [], []>} : vector<1x32xf32>, vector<32x64xf32>, vector<1x64xf32> -> vector<1x64xf32>
    %c0_85 = arith.constant 0 : index
    %c0_86 = arith.constant 0 : index
    %171 = vector.load %arg15[%c0_85, %c0_86] : memref<1x64xf32, #tpu.memory_space<vmem>>, vector<1x64xf32>
    %172 = arith.addf %170, %171 : vector<1x64xf32>
    %cst_87 = arith.constant dense<0xFF800000> : vector<1xf32>
    %173 = vector.multi_reduction <maximumf>, %172, %cst_87 [1] : vector<1x64xf32> to vector<1xf32>
    %174 = vector.shape_cast %173 : vector<1xf32> to vector<1x1xf32>
    %175 = vector.broadcast %174 : vector<1x1xf32> to vector<1x64xf32>
    %176 = arith.subf %172, %175 : vector<1x64xf32>
    %177 = math.exp %176 : vector<1x64xf32>
    %cst_88 = arith.constant dense<0.000000e+00> : vector<1xf32>
    %178 = vector.multi_reduction <add>, %177, %cst_88 [1] : vector<1x64xf32> to vector<1xf32>
    %179 = vector.shape_cast %178 : vector<1xf32> to vector<1x1xf32>
    %cst_89 = arith.constant 1.000000e+00 : f32
    %180 = vector.broadcast %cst_89 : f32 to vector<1x1xf32>
    %181 = arith.divf %180, %179 : vector<1x1xf32>
    %182 = vector.broadcast %174 : vector<1x1xf32> to vector<1x64xf32>
    %183 = arith.cmpf oeq, %172, %182 : vector<1x64xf32>
    %c64_i32_90 = arith.constant 64 : i32
    %184 = vector.broadcast %c64_i32_90 : i32 to vector<1x64xi32>
    %185 = arith.select %183, %10, %184 : vector<1x64xi1>, vector<1x64xi32>
    %cst_91 = arith.constant dense<2147483647> : vector<1xi32>
    %186 = vector.multi_reduction <minsi>, %185, %cst_91 [1] : vector<1x64xi32> to vector<1xi32>
    %187 = vector.shape_cast %186 : vector<1xi32> to vector<1x1xi32>
    %188 = vector.broadcast %187 : vector<1x1xi32> to vector<1x64xi32>
    %189 = arith.cmpi eq, %10, %188 : vector<1x64xi32>
    %190 = arith.extui %189 : vector<1x64xi1> to vector<1x64xi32>
    %191 = arith.sitofp %190 : vector<1x64xi32> to vector<1x64xf32>
    %cst_92 = arith.constant dense<0.000000e+00> : vector<1x32xf32>
    %192 = tpu.matmul %191, %0, %cst_92 {dimension_numbers = #tpu.dot_dimension_numbers<[1], [0], [0], [1], [0, 0, 1, 1], [], []>} : vector<1x64xf32>, vector<64x32xf32>, vector<1x32xf32> -> vector<1x32xf32>
    %193 = vector.shape_cast %187 : vector<1x1xi32> to vector<1x1xi32>
    %194 = vector.broadcast %193 : vector<1x1xi32> to vector<1x128xi32>
    %c1_93 = arith.constant 1 : index
    %c0_94 = arith.constant 0 : index
    %195 = vector.load %arg16[%c1_93, %c0_94] : memref<10x128xi32, #tpu.memory_space<vmem>>, vector<1x128xi32>
    tpu.vector_store %arg16[%c1_93, %c0_94], %194 {strides = array<i32>} : memref<10x128xi32, #tpu.memory_space<vmem>>, vector<1x128xi32>,
    %196 = vector.shape_cast %181 : vector<1x1xf32> to vector<1x1xf32>
    %197 = vector.broadcast %196 : vector<1x1xf32> to vector<1x128xf32>
    %c1_95 = arith.constant 1 : index
    %c0_96 = arith.constant 0 : index
    %198 = vector.load %arg17[%c1_95, %c0_96] : memref<10x128xf32, #tpu.memory_space<vmem>>, vector<1x128xf32>
    tpu.vector_store %arg17[%c1_95, %c0_96], %197 {strides = array<i32>} : memref<10x128xf32, #tpu.memory_space<vmem>>, vector<1x128xf32>,
    %c0_97 = arith.constant 0 : index
    %c0_98 = arith.constant 0 : index
    %199 = vector.load %arg3[%c0_97, %c0_98] : memref<32x96xf32, #tpu.memory_space<vmem>>, vector<32x96xf32>
    %cst_99 = arith.constant dense<0.000000e+00> : vector<1x96xf32>
    %200 = tpu.matmul %192, %199, %cst_99 {dimension_numbers = #tpu.dot_dimension_numbers<[1], [0], [0], [1], [0, 0, 1, 1], [], []>} : vector<1x32xf32>, vector<32x96xf32>, vector<1x96xf32> -> vector<1x96xf32>
    %c0_100 = arith.constant 0 : index
    %c0_101 = arith.constant 0 : index
    %201 = vector.load %arg5[%c0_100, %c0_101] : memref<1x96xf32, #tpu.memory_space<vmem>>, vector<1x96xf32>
    %202 = arith.addf %200, %201 : vector<1x96xf32>
    %c0_102 = arith.constant 0 : index
    %c0_103 = arith.constant 0 : index
    %203 = vector.load %arg4[%c0_102, %c0_103] : memref<32x96xf32, #tpu.memory_space<vmem>>, vector<32x96xf32>
    %cst_104 = arith.constant dense<0.000000e+00> : vector<1x96xf32>
    %204 = tpu.matmul %138, %203, %cst_104 {dimension_numbers = #tpu.dot_dimension_numbers<[1], [0], [0], [1], [0, 0, 1, 1], [], []>} : vector<1x32xf32>, vector<32x96xf32>, vector<1x96xf32> -> vector<1x96xf32>
    %c0_105 = arith.constant 0 : index
    %c0_106 = arith.constant 0 : index
    %205 = vector.load %arg6[%c0_105, %c0_106] : memref<1x96xf32, #tpu.memory_space<vmem>>, vector<1x96xf32>
    %206 = arith.addf %204, %205 : vector<1x96xf32>
    %207 = vector.extract_strided_slice %202 {offsets = [0, 0], sizes = [1, 32], strides = [1, 1]} : vector<1x96xf32> to vector<1x32xf32>
    %208 = vector.extract_strided_slice %206 {offsets = [0, 0], sizes = [1, 32], strides = [1, 1]} : vector<1x96xf32> to vector<1x32xf32>
    %209 = arith.addf %207, %208 : vector<1x32xf32>
    %210 = arith.negf %209 : vector<1x32xf32>
    %211 = math.exp %210 : vector<1x32xf32>
    %cst_107 = arith.constant 1.000000e+00 : f32
    %212 = vector.broadcast %cst_107 : f32 to vector<1x32xf32>
    %213 = arith.addf %212, %211 : vector<1x32xf32>
    %214 = arith.divf %212, %213 : vector<1x32xf32>
    %215 = vector.extract_strided_slice %202 {offsets = [0, 32], sizes = [1, 32], strides = [1, 1]} : vector<1x96xf32> to vector<1x32xf32>
    %216 = vector.extract_strided_slice %206 {offsets = [0, 32], sizes = [1, 32], strides = [1, 1]} : vector<1x96xf32> to vector<1x32xf32>
    %217 = arith.addf %215, %216 : vector<1x32xf32>
    %218 = arith.negf %217 : vector<1x32xf32>
    %219 = math.exp %218 : vector<1x32xf32>
    %cst_108 = arith.constant 1.000000e+00 : f32
    %220 = vector.broadcast %cst_108 : f32 to vector<1x32xf32>
    %221 = arith.addf %220, %219 : vector<1x32xf32>
    %222 = arith.divf %220, %221 : vector<1x32xf32>
    %223 = vector.extract_strided_slice %202 {offsets = [0, 64], sizes = [1, 32], strides = [1, 1]} : vector<1x96xf32> to vector<1x32xf32>
    %224 = vector.extract_strided_slice %206 {offsets = [0, 64], sizes = [1, 32], strides = [1, 1]} : vector<1x96xf32> to vector<1x32xf32>
    %225 = arith.mulf %214, %224 : vector<1x32xf32>
    %226 = arith.addf %223, %225 : vector<1x32xf32>
    %227 = math.tanh %226 : vector<1x32xf32>
    %cst_109 = arith.constant 1.000000e+00 : f32
    %228 = vector.broadcast %cst_109 : f32 to vector<1x32xf32>
    %229 = arith.subf %228, %222 : vector<1x32xf32>
    %230 = arith.mulf %229, %227 : vector<1x32xf32>
    %231 = arith.mulf %222, %138 : vector<1x32xf32>
    %232 = arith.addf %230, %231 : vector<1x32xf32>
    %c0_110 = arith.constant 0 : index
    %c0_111 = arith.constant 0 : index
    %233 = vector.load %arg7[%c0_110, %c0_111] : memref<32x32xf32, #tpu.memory_space<vmem>>, vector<32x32xf32>
    %cst_112 = arith.constant dense<0.000000e+00> : vector<1x32xf32>
    %234 = tpu.matmul %232, %233, %cst_112 {dimension_numbers = #tpu.dot_dimension_numbers<[1], [0], [0], [1], [0, 0, 1, 1], [], []>} : vector<1x32xf32>, vector<32x32xf32>, vector<1x32xf32> -> vector<1x32xf32>
    %235 = vector.broadcast %234 : vector<1x32xf32> to vector<8x32xf32>
    %236 = arith.addf %235, %7 : vector<8x32xf32>
    %237 = math.tanh %236 : vector<8x32xf32>
    %238 = vector.broadcast %2 : vector<1x32xf32> to vector<8x32xf32>
    %239 = arith.mulf %238, %237 : vector<8x32xf32>
    %cst_113 = arith.constant dense<0.000000e+00> : vector<8xf32>
    %240 = vector.multi_reduction <add>, %239, %cst_113 [1] : vector<8x32xf32> to vector<8xf32>
    %241 = vector.shape_cast %240 : vector<8xf32> to vector<8x1xf32>
    %cst_114 = arith.constant dense<0xFF800000> : vector<1xf32>
    %242 = vector.multi_reduction <maximumf>, %241, %cst_114 [0] : vector<8x1xf32> to vector<1xf32>
    %243 = vector.shape_cast %242 : vector<1xf32> to vector<1x1xf32>
    %244 = vector.broadcast %243 : vector<1x1xf32> to vector<8x1xf32>
    %245 = arith.subf %241, %244 : vector<8x1xf32>
    %246 = math.exp %245 : vector<8x1xf32>
    %cst_115 = arith.constant dense<0.000000e+00> : vector<1xf32>
    %247 = vector.multi_reduction <add>, %246, %cst_115 [0] : vector<8x1xf32> to vector<1xf32>
    %248 = vector.shape_cast %247 : vector<1xf32> to vector<1x1xf32>
    %249 = vector.broadcast %248 : vector<1x1xf32> to vector<8x1xf32>
    %250 = arith.divf %246, %249 : vector<8x1xf32>
    %251 = vector.broadcast %250 : vector<8x1xf32> to vector<8x32xf32>
    %252 = arith.mulf %251, %1 : vector<8x32xf32>
    %cst_116 = arith.constant dense<0.000000e+00> : vector<32xf32>
    %253 = vector.multi_reduction <add>, %252, %cst_116 [0] : vector<8x32xf32> to vector<32xf32>
    %254 = vector.shape_cast %253 : vector<32xf32> to vector<1x32xf32>
    %c0_117 = arith.constant 0 : index
    %c0_118 = arith.constant 0 : index
    %255 = vector.load %arg11[%c0_117, %c0_118] : memref<32x32xf32, #tpu.memory_space<vmem>>, vector<32x32xf32>
    %cst_119 = arith.constant dense<0.000000e+00> : vector<1x32xf32>
    %256 = tpu.matmul %232, %255, %cst_119 {dimension_numbers = #tpu.dot_dimension_numbers<[1], [0], [0], [1], [0, 0, 1, 1], [], []>} : vector<1x32xf32>, vector<32x32xf32>, vector<1x32xf32> -> vector<1x32xf32>
    %c0_120 = arith.constant 0 : index
    %c0_121 = arith.constant 0 : index
    %257 = vector.load %arg12[%c0_120, %c0_121] : memref<32x32xf32, #tpu.memory_space<vmem>>, vector<32x32xf32>
    %cst_122 = arith.constant dense<0.000000e+00> : vector<1x32xf32>
    %258 = tpu.matmul %254, %257, %cst_122 {dimension_numbers = #tpu.dot_dimension_numbers<[1], [0], [0], [1], [0, 0, 1, 1], [], []>} : vector<1x32xf32>, vector<32x32xf32>, vector<1x32xf32> -> vector<1x32xf32>
    %259 = arith.addf %256, %258 : vector<1x32xf32>
    %c0_123 = arith.constant 0 : index
    %c0_124 = arith.constant 0 : index
    %260 = vector.load %arg13[%c0_123, %c0_124] : memref<1x32xf32, #tpu.memory_space<vmem>>, vector<1x32xf32>
    %261 = arith.addf %259, %260 : vector<1x32xf32>
    %262 = math.tanh %261 : vector<1x32xf32>
    %c0_125 = arith.constant 0 : index
    %c0_126 = arith.constant 0 : index
    %263 = vector.load %arg14[%c0_125, %c0_126] : memref<32x64xf32, #tpu.memory_space<vmem>>, vector<32x64xf32>
    %cst_127 = arith.constant dense<0.000000e+00> : vector<1x64xf32>
    %264 = tpu.matmul %262, %263, %cst_127 {dimension_numbers = #tpu.dot_dimension_numbers<[1], [0], [0], [1], [0, 0, 1, 1], [], []>} : vector<1x32xf32>, vector<32x64xf32>, vector<1x64xf32> -> vector<1x64xf32>
    %c0_128 = arith.constant 0 : index
    %c0_129 = arith.constant 0 : index
    %265 = vector.load %arg15[%c0_128, %c0_129] : memref<1x64xf32, #tpu.memory_space<vmem>>, vector<1x64xf32>
    %266 = arith.addf %264, %265 : vector<1x64xf32>
    %cst_130 = arith.constant dense<0xFF800000> : vector<1xf32>
    %267 = vector.multi_reduction <maximumf>, %266, %cst_130 [1] : vector<1x64xf32> to vector<1xf32>
    %268 = vector.shape_cast %267 : vector<1xf32> to vector<1x1xf32>
    %269 = vector.broadcast %268 : vector<1x1xf32> to vector<1x64xf32>
    %270 = arith.subf %266, %269 : vector<1x64xf32>
    %271 = math.exp %270 : vector<1x64xf32>
    %cst_131 = arith.constant dense<0.000000e+00> : vector<1xf32>
    %272 = vector.multi_reduction <add>, %271, %cst_131 [1] : vector<1x64xf32> to vector<1xf32>
    %273 = vector.shape_cast %272 : vector<1xf32> to vector<1x1xf32>
    %cst_132 = arith.constant 1.000000e+00 : f32
    %274 = vector.broadcast %cst_132 : f32 to vector<1x1xf32>
    %275 = arith.divf %274, %273 : vector<1x1xf32>
    %276 = vector.broadcast %268 : vector<1x1xf32> to vector<1x64xf32>
    %277 = arith.cmpf oeq, %266, %276 : vector<1x64xf32>
    %c64_i32_133 = arith.constant 64 : i32
    %278 = vector.broadcast %c64_i32_133 : i32 to vector<1x64xi32>
    %279 = arith.select %277, %10, %278 : vector<1x64xi1>, vector<1x64xi32>
    %cst_134 = arith.constant dense<2147483647> : vector<1xi32>
    %280 = vector.multi_reduction <minsi>, %279, %cst_134 [1] : vector<1x64xi32> to vector<1xi32>
    %281 = vector.shape_cast %280 : vector<1xi32> to vector<1x1xi32>
    %282 = vector.broadcast %281 : vector<1x1xi32> to vector<1x64xi32>
    %283 = arith.cmpi eq, %10, %282 : vector<1x64xi32>
    %284 = arith.extui %283 : vector<1x64xi1> to vector<1x64xi32>
    %285 = arith.sitofp %284 : vector<1x64xi32> to vector<1x64xf32>
    %cst_135 = arith.constant dense<0.000000e+00> : vector<1x32xf32>
    %286 = tpu.matmul %285, %0, %cst_135 {dimension_numbers = #tpu.dot_dimension_numbers<[1], [0], [0], [1], [0, 0, 1, 1], [], []>} : vector<1x64xf32>, vector<64x32xf32>, vector<1x32xf32> -> vector<1x32xf32>
    %287 = vector.shape_cast %281 : vector<1x1xi32> to vector<1x1xi32>
    %288 = vector.broadcast %287 : vector<1x1xi32> to vector<1x128xi32>
    %c2 = arith.constant 2 : index
    %c0_136 = arith.constant 0 : index
    %289 = vector.load %arg16[%c2, %c0_136] : memref<10x128xi32, #tpu.memory_space<vmem>>, vector<1x128xi32>
    tpu.vector_store %arg16[%c2, %c0_136], %288 {strides = array<i32>} : memref<10x128xi32, #tpu.memory_space<vmem>>, vector<1x128xi32>,
    %290 = vector.shape_cast %275 : vector<1x1xf32> to vector<1x1xf32>
    %291 = vector.broadcast %290 : vector<1x1xf32> to vector<1x128xf32>
    %c2_137 = arith.constant 2 : index
    %c0_138 = arith.constant 0 : index
    %292 = vector.load %arg17[%c2_137, %c0_138] : memref<10x128xf32, #tpu.memory_space<vmem>>, vector<1x128xf32>
    tpu.vector_store %arg17[%c2_137, %c0_138], %291 {strides = array<i32>} : memref<10x128xf32, #tpu.memory_space<vmem>>, vector<1x128xf32>,
    %c0_139 = arith.constant 0 : index
    %c0_140 = arith.constant 0 : index
    %293 = vector.load %arg3[%c0_139, %c0_140] : memref<32x96xf32, #tpu.memory_space<vmem>>, vector<32x96xf32>
    %cst_141 = arith.constant dense<0.000000e+00> : vector<1x96xf32>
    %294 = tpu.matmul %286, %293, %cst_141 {dimension_numbers = #tpu.dot_dimension_numbers<[1], [0], [0], [1], [0, 0, 1, 1], [], []>} : vector<1x32xf32>, vector<32x96xf32>, vector<1x96xf32> -> vector<1x96xf32>
    %c0_142 = arith.constant 0 : index
    %c0_143 = arith.constant 0 : index
    %295 = vector.load %arg5[%c0_142, %c0_143] : memref<1x96xf32, #tpu.memory_space<vmem>>, vector<1x96xf32>
    %296 = arith.addf %294, %295 : vector<1x96xf32>
    %c0_144 = arith.constant 0 : index
    %c0_145 = arith.constant 0 : index
    %297 = vector.load %arg4[%c0_144, %c0_145] : memref<32x96xf32, #tpu.memory_space<vmem>>, vector<32x96xf32>
    %cst_146 = arith.constant dense<0.000000e+00> : vector<1x96xf32>
    %298 = tpu.matmul %232, %297, %cst_146 {dimension_numbers = #tpu.dot_dimension_numbers<[1], [0], [0], [1], [0, 0, 1, 1], [], []>} : vector<1x32xf32>, vector<32x96xf32>, vector<1x96xf32> -> vector<1x96xf32>
    %c0_147 = arith.constant 0 : index
    %c0_148 = arith.constant 0 : index
    %299 = vector.load %arg6[%c0_147, %c0_148] : memref<1x96xf32, #tpu.memory_space<vmem>>, vector<1x96xf32>
    %300 = arith.addf %298, %299 : vector<1x96xf32>
    %301 = vector.extract_strided_slice %296 {offsets = [0, 0], sizes = [1, 32], strides = [1, 1]} : vector<1x96xf32> to vector<1x32xf32>
    %302 = vector.extract_strided_slice %300 {offsets = [0, 0], sizes = [1, 32], strides = [1, 1]} : vector<1x96xf32> to vector<1x32xf32>
    %303 = arith.addf %301, %302 : vector<1x32xf32>
    %304 = arith.negf %303 : vector<1x32xf32>
    %305 = math.exp %304 : vector<1x32xf32>
    %cst_149 = arith.constant 1.000000e+00 : f32
    %306 = vector.broadcast %cst_149 : f32 to vector<1x32xf32>
    %307 = arith.addf %306, %305 : vector<1x32xf32>
    %308 = arith.divf %306, %307 : vector<1x32xf32>
    %309 = vector.extract_strided_slice %296 {offsets = [0, 32], sizes = [1, 32], strides = [1, 1]} : vector<1x96xf32> to vector<1x32xf32>
    %310 = vector.extract_strided_slice %300 {offsets = [0, 32], sizes = [1, 32], strides = [1, 1]} : vector<1x96xf32> to vector<1x32xf32>
    %311 = arith.addf %309, %310 : vector<1x32xf32>
    %312 = arith.negf %311 : vector<1x32xf32>
    %313 = math.exp %312 : vector<1x32xf32>
    %cst_150 = arith.constant 1.000000e+00 : f32
    %314 = vector.broadcast %cst_150 : f32 to vector<1x32xf32>
    %315 = arith.addf %314, %313 : vector<1x32xf32>
    %316 = arith.divf %314, %315 : vector<1x32xf32>
    %317 = vector.extract_strided_slice %296 {offsets = [0, 64], sizes = [1, 32], strides = [1, 1]} : vector<1x96xf32> to vector<1x32xf32>
    %318 = vector.extract_strided_slice %300 {offsets = [0, 64], sizes = [1, 32], strides = [1, 1]} : vector<1x96xf32> to vector<1x32xf32>
    %319 = arith.mulf %308, %318 : vector<1x32xf32>
    %320 = arith.addf %317, %319 : vector<1x32xf32>
    %321 = math.tanh %320 : vector<1x32xf32>
    %cst_151 = arith.constant 1.000000e+00 : f32
    %322 = vector.broadcast %cst_151 : f32 to vector<1x32xf32>
    %323 = arith.subf %322, %316 : vector<1x32xf32>
    %324 = arith.mulf %323, %321 : vector<1x32xf32>
    %325 = arith.mulf %316, %232 : vector<1x32xf32>
    %326 = arith.addf %324, %325 : vector<1x32xf32>
    %c0_152 = arith.constant 0 : index
    %c0_153 = arith.constant 0 : index
    %327 = vector.load %arg7[%c0_152, %c0_153] : memref<32x32xf32, #tpu.memory_space<vmem>>, vector<32x32xf32>
    %cst_154 = arith.constant dense<0.000000e+00> : vector<1x32xf32>
    %328 = tpu.matmul %326, %327, %cst_154 {dimension_numbers = #tpu.dot_dimension_numbers<[1], [0], [0], [1], [0, 0, 1, 1], [], []>} : vector<1x32xf32>, vector<32x32xf32>, vector<1x32xf32> -> vector<1x32xf32>
    %329 = vector.broadcast %328 : vector<1x32xf32> to vector<8x32xf32>
    %330 = arith.addf %329, %7 : vector<8x32xf32>
    %331 = math.tanh %330 : vector<8x32xf32>
    %332 = vector.broadcast %2 : vector<1x32xf32> to vector<8x32xf32>
    %333 = arith.mulf %332, %331 : vector<8x32xf32>
    %cst_155 = arith.constant dense<0.000000e+00> : vector<8xf32>
    %334 = vector.multi_reduction <add>, %333, %cst_155 [1] : vector<8x32xf32> to vector<8xf32>
    %335 = vector.shape_cast %334 : vector<8xf32> to vector<8x1xf32>
    %cst_156 = arith.constant dense<0xFF800000> : vector<1xf32>
    %336 = vector.multi_reduction <maximumf>, %335, %cst_156 [0] : vector<8x1xf32> to vector<1xf32>
    %337 = vector.shape_cast %336 : vector<1xf32> to vector<1x1xf32>
    %338 = vector.broadcast %337 : vector<1x1xf32> to vector<8x1xf32>
    %339 = arith.subf %335, %338 : vector<8x1xf32>
    %340 = math.exp %339 : vector<8x1xf32>
    %cst_157 = arith.constant dense<0.000000e+00> : vector<1xf32>
    %341 = vector.multi_reduction <add>, %340, %cst_157 [0] : vector<8x1xf32> to vector<1xf32>
    %342 = vector.shape_cast %341 : vector<1xf32> to vector<1x1xf32>
    %343 = vector.broadcast %342 : vector<1x1xf32> to vector<8x1xf32>
    %344 = arith.divf %340, %343 : vector<8x1xf32>
    %345 = vector.broadcast %344 : vector<8x1xf32> to vector<8x32xf32>
    %346 = arith.mulf %345, %1 : vector<8x32xf32>
    %cst_158 = arith.constant dense<0.000000e+00> : vector<32xf32>
    %347 = vector.multi_reduction <add>, %346, %cst_158 [0] : vector<8x32xf32> to vector<32xf32>
    %348 = vector.shape_cast %347 : vector<32xf32> to vector<1x32xf32>
    %c0_159 = arith.constant 0 : index
    %c0_160 = arith.constant 0 : index
    %349 = vector.load %arg11[%c0_159, %c0_160] : memref<32x32xf32, #tpu.memory_space<vmem>>, vector<32x32xf32>
    %cst_161 = arith.constant dense<0.000000e+00> : vector<1x32xf32>
    %350 = tpu.matmul %326, %349, %cst_161 {dimension_numbers = #tpu.dot_dimension_numbers<[1], [0], [0], [1], [0, 0, 1, 1], [], []>} : vector<1x32xf32>, vector<32x32xf32>, vector<1x32xf32> -> vector<1x32xf32>
    %c0_162 = arith.constant 0 : index
    %c0_163 = arith.constant 0 : index
    %351 = vector.load %arg12[%c0_162, %c0_163] : memref<32x32xf32, #tpu.memory_space<vmem>>, vector<32x32xf32>
    %cst_164 = arith.constant dense<0.000000e+00> : vector<1x32xf32>
    %352 = tpu.matmul %348, %351, %cst_164 {dimension_numbers = #tpu.dot_dimension_numbers<[1], [0], [0], [1], [0, 0, 1, 1], [], []>} : vector<1x32xf32>, vector<32x32xf32>, vector<1x32xf32> -> vector<1x32xf32>
    %353 = arith.addf %350, %352 : vector<1x32xf32>
    %c0_165 = arith.constant 0 : index
    %c0_166 = arith.constant 0 : index
    %354 = vector.load %arg13[%c0_165, %c0_166] : memref<1x32xf32, #tpu.memory_space<vmem>>, vector<1x32xf32>
    %355 = arith.addf %353, %354 : vector<1x32xf32>
    %356 = math.tanh %355 : vector<1x32xf32>
    %c0_167 = arith.constant 0 : index
    %c0_168 = arith.constant 0 : index
    %357 = vector.load %arg14[%c0_167, %c0_168] : memref<32x64xf32, #tpu.memory_space<vmem>>, vector<32x64xf32>
    %cst_169 = arith.constant dense<0.000000e+00> : vector<1x64xf32>
    %358 = tpu.matmul %356, %357, %cst_169 {dimension_numbers = #tpu.dot_dimension_numbers<[1], [0], [0], [1], [0, 0, 1, 1], [], []>} : vector<1x32xf32>, vector<32x64xf32>, vector<1x64xf32> -> vector<1x64xf32>
    %c0_170 = arith.constant 0 : index
    %c0_171 = arith.constant 0 : index
    %359 = vector.load %arg15[%c0_170, %c0_171] : memref<1x64xf32, #tpu.memory_space<vmem>>, vector<1x64xf32>
    %360 = arith.addf %358, %359 : vector<1x64xf32>
    %cst_172 = arith.constant dense<0xFF800000> : vector<1xf32>
    %361 = vector.multi_reduction <maximumf>, %360, %cst_172 [1] : vector<1x64xf32> to vector<1xf32>
    %362 = vector.shape_cast %361 : vector<1xf32> to vector<1x1xf32>
    %363 = vector.broadcast %362 : vector<1x1xf32> to vector<1x64xf32>
    %364 = arith.subf %360, %363 : vector<1x64xf32>
    %365 = math.exp %364 : vector<1x64xf32>
    %cst_173 = arith.constant dense<0.000000e+00> : vector<1xf32>
    %366 = vector.multi_reduction <add>, %365, %cst_173 [1] : vector<1x64xf32> to vector<1xf32>
    %367 = vector.shape_cast %366 : vector<1xf32> to vector<1x1xf32>
    %cst_174 = arith.constant 1.000000e+00 : f32
    %368 = vector.broadcast %cst_174 : f32 to vector<1x1xf32>
    %369 = arith.divf %368, %367 : vector<1x1xf32>
    %370 = vector.broadcast %362 : vector<1x1xf32> to vector<1x64xf32>
    %371 = arith.cmpf oeq, %360, %370 : vector<1x64xf32>
    %c64_i32_175 = arith.constant 64 : i32
    %372 = vector.broadcast %c64_i32_175 : i32 to vector<1x64xi32>
    %373 = arith.select %371, %10, %372 : vector<1x64xi1>, vector<1x64xi32>
    %cst_176 = arith.constant dense<2147483647> : vector<1xi32>
    %374 = vector.multi_reduction <minsi>, %373, %cst_176 [1] : vector<1x64xi32> to vector<1xi32>
    %375 = vector.shape_cast %374 : vector<1xi32> to vector<1x1xi32>
    %376 = vector.broadcast %375 : vector<1x1xi32> to vector<1x64xi32>
    %377 = arith.cmpi eq, %10, %376 : vector<1x64xi32>
    %378 = arith.extui %377 : vector<1x64xi1> to vector<1x64xi32>
    %379 = arith.sitofp %378 : vector<1x64xi32> to vector<1x64xf32>
    %cst_177 = arith.constant dense<0.000000e+00> : vector<1x32xf32>
    %380 = tpu.matmul %379, %0, %cst_177 {dimension_numbers = #tpu.dot_dimension_numbers<[1], [0], [0], [1], [0, 0, 1, 1], [], []>} : vector<1x64xf32>, vector<64x32xf32>, vector<1x32xf32> -> vector<1x32xf32>
    %381 = vector.shape_cast %375 : vector<1x1xi32> to vector<1x1xi32>
    %382 = vector.broadcast %381 : vector<1x1xi32> to vector<1x128xi32>
    %c3 = arith.constant 3 : index
    %c0_178 = arith.constant 0 : index
    %383 = vector.load %arg16[%c3, %c0_178] : memref<10x128xi32, #tpu.memory_space<vmem>>, vector<1x128xi32>
    tpu.vector_store %arg16[%c3, %c0_178], %382 {strides = array<i32>} : memref<10x128xi32, #tpu.memory_space<vmem>>, vector<1x128xi32>,
    %384 = vector.shape_cast %369 : vector<1x1xf32> to vector<1x1xf32>
    %385 = vector.broadcast %384 : vector<1x1xf32> to vector<1x128xf32>
    %c3_179 = arith.constant 3 : index
    %c0_180 = arith.constant 0 : index
    %386 = vector.load %arg17[%c3_179, %c0_180] : memref<10x128xf32, #tpu.memory_space<vmem>>, vector<1x128xf32>
    tpu.vector_store %arg17[%c3_179, %c0_180], %385 {strides = array<i32>} : memref<10x128xf32, #tpu.memory_space<vmem>>, vector<1x128xf32>,
    %c0_181 = arith.constant 0 : index
    %c0_182 = arith.constant 0 : index
    %387 = vector.load %arg3[%c0_181, %c0_182] : memref<32x96xf32, #tpu.memory_space<vmem>>, vector<32x96xf32>
    %cst_183 = arith.constant dense<0.000000e+00> : vector<1x96xf32>
    %388 = tpu.matmul %380, %387, %cst_183 {dimension_numbers = #tpu.dot_dimension_numbers<[1], [0], [0], [1], [0, 0, 1, 1], [], []>} : vector<1x32xf32>, vector<32x96xf32>, vector<1x96xf32> -> vector<1x96xf32>
    %c0_184 = arith.constant 0 : index
    %c0_185 = arith.constant 0 : index
    %389 = vector.load %arg5[%c0_184, %c0_185] : memref<1x96xf32, #tpu.memory_space<vmem>>, vector<1x96xf32>
    %390 = arith.addf %388, %389 : vector<1x96xf32>
    %c0_186 = arith.constant 0 : index
    %c0_187 = arith.constant 0 : index
    %391 = vector.load %arg4[%c0_186, %c0_187] : memref<32x96xf32, #tpu.memory_space<vmem>>, vector<32x96xf32>
    %cst_188 = arith.constant dense<0.000000e+00> : vector<1x96xf32>
    %392 = tpu.matmul %326, %391, %cst_188 {dimension_numbers = #tpu.dot_dimension_numbers<[1], [0], [0], [1], [0, 0, 1, 1], [], []>} : vector<1x32xf32>, vector<32x96xf32>, vector<1x96xf32> -> vector<1x96xf32>
    %c0_189 = arith.constant 0 : index
    %c0_190 = arith.constant 0 : index
    %393 = vector.load %arg6[%c0_189, %c0_190] : memref<1x96xf32, #tpu.memory_space<vmem>>, vector<1x96xf32>
    %394 = arith.addf %392, %393 : vector<1x96xf32>
    %395 = vector.extract_strided_slice %390 {offsets = [0, 0], sizes = [1, 32], strides = [1, 1]} : vector<1x96xf32> to vector<1x32xf32>
    %396 = vector.extract_strided_slice %394 {offsets = [0, 0], sizes = [1, 32], strides = [1, 1]} : vector<1x96xf32> to vector<1x32xf32>
    %397 = arith.addf %395, %396 : vector<1x32xf32>
    %398 = arith.negf %397 : vector<1x32xf32>
    %399 = math.exp %398 : vector<1x32xf32>
    %cst_191 = arith.constant 1.000000e+00 : f32
    %400 = vector.broadcast %cst_191 : f32 to vector<1x32xf32>
    %401 = arith.addf %400, %399 : vector<1x32xf32>
    %402 = arith.divf %400, %401 : vector<1x32xf32>
    %403 = vector.extract_strided_slice %390 {offsets = [0, 32], sizes = [1, 32], strides = [1, 1]} : vector<1x96xf32> to vector<1x32xf32>
    %404 = vector.extract_strided_slice %394 {offsets = [0, 32], sizes = [1, 32], strides = [1, 1]} : vector<1x96xf32> to vector<1x32xf32>
    %405 = arith.addf %403, %404 : vector<1x32xf32>
    %406 = arith.negf %405 : vector<1x32xf32>
    %407 = math.exp %406 : vector<1x32xf32>
    %cst_192 = arith.constant 1.000000e+00 : f32
    %408 = vector.broadcast %cst_192 : f32 to vector<1x32xf32>
    %409 = arith.addf %408, %407 : vector<1x32xf32>
    %410 = arith.divf %408, %409 : vector<1x32xf32>
    %411 = vector.extract_strided_slice %390 {offsets = [0, 64], sizes = [1, 32], strides = [1, 1]} : vector<1x96xf32> to vector<1x32xf32>
    %412 = vector.extract_strided_slice %394 {offsets = [0, 64], sizes = [1, 32], strides = [1, 1]} : vector<1x96xf32> to vector<1x32xf32>
    %413 = arith.mulf %402, %412 : vector<1x32xf32>
    %414 = arith.addf %411, %413 : vector<1x32xf32>
    %415 = math.tanh %414 : vector<1x32xf32>
    %cst_193 = arith.constant 1.000000e+00 : f32
    %416 = vector.broadcast %cst_193 : f32 to vector<1x32xf32>
    %417 = arith.subf %416, %410 : vector<1x32xf32>
    %418 = arith.mulf %417, %415 : vector<1x32xf32>
    %419 = arith.mulf %410, %326 : vector<1x32xf32>
    %420 = arith.addf %418, %419 : vector<1x32xf32>
    %c0_194 = arith.constant 0 : index
    %c0_195 = arith.constant 0 : index
    %421 = vector.load %arg7[%c0_194, %c0_195] : memref<32x32xf32, #tpu.memory_space<vmem>>, vector<32x32xf32>
    %cst_196 = arith.constant dense<0.000000e+00> : vector<1x32xf32>
    %422 = tpu.matmul %420, %421, %cst_196 {dimension_numbers = #tpu.dot_dimension_numbers<[1], [0], [0], [1], [0, 0, 1, 1], [], []>} : vector<1x32xf32>, vector<32x32xf32>, vector<1x32xf32> -> vector<1x32xf32>
    %423 = vector.broadcast %422 : vector<1x32xf32> to vector<8x32xf32>
    %424 = arith.addf %423, %7 : vector<8x32xf32>
    %425 = math.tanh %424 : vector<8x32xf32>
    %426 = vector.broadcast %2 : vector<1x32xf32> to vector<8x32xf32>
    %427 = arith.mulf %426, %425 : vector<8x32xf32>
    %cst_197 = arith.constant dense<0.000000e+00> : vector<8xf32>
    %428 = vector.multi_reduction <add>, %427, %cst_197 [1] : vector<8x32xf32> to vector<8xf32>
    %429 = vector.shape_cast %428 : vector<8xf32> to vector<8x1xf32>
    %cst_198 = arith.constant dense<0xFF800000> : vector<1xf32>
    %430 = vector.multi_reduction <maximumf>, %429, %cst_198 [0] : vector<8x1xf32> to vector<1xf32>
    %431 = vector.shape_cast %430 : vector<1xf32> to vector<1x1xf32>
    %432 = vector.broadcast %431 : vector<1x1xf32> to vector<8x1xf32>
    %433 = arith.subf %429, %432 : vector<8x1xf32>
    %434 = math.exp %433 : vector<8x1xf32>
    %cst_199 = arith.constant dense<0.000000e+00> : vector<1xf32>
    %435 = vector.multi_reduction <add>, %434, %cst_199 [0] : vector<8x1xf32> to vector<1xf32>
    %436 = vector.shape_cast %435 : vector<1xf32> to vector<1x1xf32>
    %437 = vector.broadcast %436 : vector<1x1xf32> to vector<8x1xf32>
    %438 = arith.divf %434, %437 : vector<8x1xf32>
    %439 = vector.broadcast %438 : vector<8x1xf32> to vector<8x32xf32>
    %440 = arith.mulf %439, %1 : vector<8x32xf32>
    %cst_200 = arith.constant dense<0.000000e+00> : vector<32xf32>
    %441 = vector.multi_reduction <add>, %440, %cst_200 [0] : vector<8x32xf32> to vector<32xf32>
    %442 = vector.shape_cast %441 : vector<32xf32> to vector<1x32xf32>
    %c0_201 = arith.constant 0 : index
    %c0_202 = arith.constant 0 : index
    %443 = vector.load %arg11[%c0_201, %c0_202] : memref<32x32xf32, #tpu.memory_space<vmem>>, vector<32x32xf32>
    %cst_203 = arith.constant dense<0.000000e+00> : vector<1x32xf32>
    %444 = tpu.matmul %420, %443, %cst_203 {dimension_numbers = #tpu.dot_dimension_numbers<[1], [0], [0], [1], [0, 0, 1, 1], [], []>} : vector<1x32xf32>, vector<32x32xf32>, vector<1x32xf32> -> vector<1x32xf32>
    %c0_204 = arith.constant 0 : index
    %c0_205 = arith.constant 0 : index
    %445 = vector.load %arg12[%c0_204, %c0_205] : memref<32x32xf32, #tpu.memory_space<vmem>>, vector<32x32xf32>
    %cst_206 = arith.constant dense<0.000000e+00> : vector<1x32xf32>
    %446 = tpu.matmul %442, %445, %cst_206 {dimension_numbers = #tpu.dot_dimension_numbers<[1], [0], [0], [1], [0, 0, 1, 1], [], []>} : vector<1x32xf32>, vector<32x32xf32>, vector<1x32xf32> -> vector<1x32xf32>
    %447 = arith.addf %444, %446 : vector<1x32xf32>
    %c0_207 = arith.constant 0 : index
    %c0_208 = arith.constant 0 : index
    %448 = vector.load %arg13[%c0_207, %c0_208] : memref<1x32xf32, #tpu.memory_space<vmem>>, vector<1x32xf32>
    %449 = arith.addf %447, %448 : vector<1x32xf32>
    %450 = math.tanh %449 : vector<1x32xf32>
    %c0_209 = arith.constant 0 : index
    %c0_210 = arith.constant 0 : index
    %451 = vector.load %arg14[%c0_209, %c0_210] : memref<32x64xf32, #tpu.memory_space<vmem>>, vector<32x64xf32>
    %cst_211 = arith.constant dense<0.000000e+00> : vector<1x64xf32>
    %452 = tpu.matmul %450, %451, %cst_211 {dimension_numbers = #tpu.dot_dimension_numbers<[1], [0], [0], [1], [0, 0, 1, 1], [], []>} : vector<1x32xf32>, vector<32x64xf32>, vector<1x64xf32> -> vector<1x64xf32>
    %c0_212 = arith.constant 0 : index
    %c0_213 = arith.constant 0 : index
    %453 = vector.load %arg15[%c0_212, %c0_213] : memref<1x64xf32, #tpu.memory_space<vmem>>, vector<1x64xf32>
    %454 = arith.addf %452, %453 : vector<1x64xf32>
    %cst_214 = arith.constant dense<0xFF800000> : vector<1xf32>
    %455 = vector.multi_reduction <maximumf>, %454, %cst_214 [1] : vector<1x64xf32> to vector<1xf32>
    %456 = vector.shape_cast %455 : vector<1xf32> to vector<1x1xf32>
    %457 = vector.broadcast %456 : vector<1x1xf32> to vector<1x64xf32>
    %458 = arith.subf %454, %457 : vector<1x64xf32>
    %459 = math.exp %458 : vector<1x64xf32>
    %cst_215 = arith.constant dense<0.000000e+00> : vector<1xf32>
    %460 = vector.multi_reduction <add>, %459, %cst_215 [1] : vector<1x64xf32> to vector<1xf32>
    %461 = vector.shape_cast %460 : vector<1xf32> to vector<1x1xf32>
    %cst_216 = arith.constant 1.000000e+00 : f32
    %462 = vector.broadcast %cst_216 : f32 to vector<1x1xf32>
    %463 = arith.divf %462, %461 : vector<1x1xf32>
    %464 = vector.broadcast %456 : vector<1x1xf32> to vector<1x64xf32>
    %465 = arith.cmpf oeq, %454, %464 : vector<1x64xf32>
    %c64_i32_217 = arith.constant 64 : i32
    %466 = vector.broadcast %c64_i32_217 : i32 to vector<1x64xi32>
    %467 = arith.select %465, %10, %466 : vector<1x64xi1>, vector<1x64xi32>
    %cst_218 = arith.constant dense<2147483647> : vector<1xi32>
    %468 = vector.multi_reduction <minsi>, %467, %cst_218 [1] : vector<1x64xi32> to vector<1xi32>
    %469 = vector.shape_cast %468 : vector<1xi32> to vector<1x1xi32>
    %470 = vector.broadcast %469 : vector<1x1xi32> to vector<1x64xi32>
    %471 = arith.cmpi eq, %10, %470 : vector<1x64xi32>
    %472 = arith.extui %471 : vector<1x64xi1> to vector<1x64xi32>
    %473 = arith.sitofp %472 : vector<1x64xi32> to vector<1x64xf32>
    %cst_219 = arith.constant dense<0.000000e+00> : vector<1x32xf32>
    %474 = tpu.matmul %473, %0, %cst_219 {dimension_numbers = #tpu.dot_dimension_numbers<[1], [0], [0], [1], [0, 0, 1, 1], [], []>} : vector<1x64xf32>, vector<64x32xf32>, vector<1x32xf32> -> vector<1x32xf32>
    %475 = vector.shape_cast %469 : vector<1x1xi32> to vector<1x1xi32>
    %476 = vector.broadcast %475 : vector<1x1xi32> to vector<1x128xi32>
    %c4 = arith.constant 4 : index
    %c0_220 = arith.constant 0 : index
    %477 = vector.load %arg16[%c4, %c0_220] : memref<10x128xi32, #tpu.memory_space<vmem>>, vector<1x128xi32>
    tpu.vector_store %arg16[%c4, %c0_220], %476 {strides = array<i32>} : memref<10x128xi32, #tpu.memory_space<vmem>>, vector<1x128xi32>,
    %478 = vector.shape_cast %463 : vector<1x1xf32> to vector<1x1xf32>
    %479 = vector.broadcast %478 : vector<1x1xf32> to vector<1x128xf32>
    %c4_221 = arith.constant 4 : index
    %c0_222 = arith.constant 0 : index
    %480 = vector.load %arg17[%c4_221, %c0_222] : memref<10x128xf32, #tpu.memory_space<vmem>>, vector<1x128xf32>
    tpu.vector_store %arg17[%c4_221, %c0_222], %479 {strides = array<i32>} : memref<10x128xf32, #tpu.memory_space<vmem>>, vector<1x128xf32>,
    %c0_223 = arith.constant 0 : index
    %c0_224 = arith.constant 0 : index
    %481 = vector.load %arg3[%c0_223, %c0_224] : memref<32x96xf32, #tpu.memory_space<vmem>>, vector<32x96xf32>
    %cst_225 = arith.constant dense<0.000000e+00> : vector<1x96xf32>
    %482 = tpu.matmul %474, %481, %cst_225 {dimension_numbers = #tpu.dot_dimension_numbers<[1], [0], [0], [1], [0, 0, 1, 1], [], []>} : vector<1x32xf32>, vector<32x96xf32>, vector<1x96xf32> -> vector<1x96xf32>
    %c0_226 = arith.constant 0 : index
    %c0_227 = arith.constant 0 : index
    %483 = vector.load %arg5[%c0_226, %c0_227] : memref<1x96xf32, #tpu.memory_space<vmem>>, vector<1x96xf32>
    %484 = arith.addf %482, %483 : vector<1x96xf32>
    %c0_228 = arith.constant 0 : index
    %c0_229 = arith.constant 0 : index
    %485 = vector.load %arg4[%c0_228, %c0_229] : memref<32x96xf32, #tpu.memory_space<vmem>>, vector<32x96xf32>
    %cst_230 = arith.constant dense<0.000000e+00> : vector<1x96xf32>
    %486 = tpu.matmul %420, %485, %cst_230 {dimension_numbers = #tpu.dot_dimension_numbers<[1], [0], [0], [1], [0, 0, 1, 1], [], []>} : vector<1x32xf32>, vector<32x96xf32>, vector<1x96xf32> -> vector<1x96xf32>
    %c0_231 = arith.constant 0 : index
    %c0_232 = arith.constant 0 : index
    %487 = vector.load %arg6[%c0_231, %c0_232] : memref<1x96xf32, #tpu.memory_space<vmem>>, vector<1x96xf32>
    %488 = arith.addf %486, %487 : vector<1x96xf32>
    %489 = vector.extract_strided_slice %484 {offsets = [0, 0], sizes = [1, 32], strides = [1, 1]} : vector<1x96xf32> to vector<1x32xf32>
    %490 = vector.extract_strided_slice %488 {offsets = [0, 0], sizes = [1, 32], strides = [1, 1]} : vector<1x96xf32> to vector<1x32xf32>
    %491 = arith.addf %489, %490 : vector<1x32xf32>
    %492 = arith.negf %491 : vector<1x32xf32>
    %493 = math.exp %492 : vector<1x32xf32>
    %cst_233 = arith.constant 1.000000e+00 : f32
    %494 = vector.broadcast %cst_233 : f32 to vector<1x32xf32>
    %495 = arith.addf %494, %493 : vector<1x32xf32>
    %496 = arith.divf %494, %495 : vector<1x32xf32>
    %497 = vector.extract_strided_slice %484 {offsets = [0, 32], sizes = [1, 32], strides = [1, 1]} : vector<1x96xf32> to vector<1x32xf32>
    %498 = vector.extract_strided_slice %488 {offsets = [0, 32], sizes = [1, 32], strides = [1, 1]} : vector<1x96xf32> to vector<1x32xf32>
    %499 = arith.addf %497, %498 : vector<1x32xf32>
    %500 = arith.negf %499 : vector<1x32xf32>
    %501 = math.exp %500 : vector<1x32xf32>
    %cst_234 = arith.constant 1.000000e+00 : f32
    %502 = vector.broadcast %cst_234 : f32 to vector<1x32xf32>
    %503 = arith.addf %502, %501 : vector<1x32xf32>
    %504 = arith.divf %502, %503 : vector<1x32xf32>
    %505 = vector.extract_strided_slice %484 {offsets = [0, 64], sizes = [1, 32], strides = [1, 1]} : vector<1x96xf32> to vector<1x32xf32>
    %506 = vector.extract_strided_slice %488 {offsets = [0, 64], sizes = [1, 32], strides = [1, 1]} : vector<1x96xf32> to vector<1x32xf32>
    %507 = arith.mulf %496, %506 : vector<1x32xf32>
    %508 = arith.addf %505, %507 : vector<1x32xf32>
    %509 = math.tanh %508 : vector<1x32xf32>
    %cst_235 = arith.constant 1.000000e+00 : f32
    %510 = vector.broadcast %cst_235 : f32 to vector<1x32xf32>
    %511 = arith.subf %510, %504 : vector<1x32xf32>
    %512 = arith.mulf %511, %509 : vector<1x32xf32>
    %513 = arith.mulf %504, %420 : vector<1x32xf32>
    %514 = arith.addf %512, %513 : vector<1x32xf32>
    %c0_236 = arith.constant 0 : index
    %c0_237 = arith.constant 0 : index
    %515 = vector.load %arg7[%c0_236, %c0_237] : memref<32x32xf32, #tpu.memory_space<vmem>>, vector<32x32xf32>
    %cst_238 = arith.constant dense<0.000000e+00> : vector<1x32xf32>
    %516 = tpu.matmul %514, %515, %cst_238 {dimension_numbers = #tpu.dot_dimension_numbers<[1], [0], [0], [1], [0, 0, 1, 1], [], []>} : vector<1x32xf32>, vector<32x32xf32>, vector<1x32xf32> -> vector<1x32xf32>
    %517 = vector.broadcast %516 : vector<1x32xf32> to vector<8x32xf32>
    %518 = arith.addf %517, %7 : vector<8x32xf32>
    %519 = math.tanh %518 : vector<8x32xf32>
    %520 = vector.broadcast %2 : vector<1x32xf32> to vector<8x32xf32>
    %521 = arith.mulf %520, %519 : vector<8x32xf32>
    %cst_239 = arith.constant dense<0.000000e+00> : vector<8xf32>
    %522 = vector.multi_reduction <add>, %521, %cst_239 [1] : vector<8x32xf32> to vector<8xf32>
    %523 = vector.shape_cast %522 : vector<8xf32> to vector<8x1xf32>
    %cst_240 = arith.constant dense<0xFF800000> : vector<1xf32>
    %524 = vector.multi_reduction <maximumf>, %523, %cst_240 [0] : vector<8x1xf32> to vector<1xf32>
    %525 = vector.shape_cast %524 : vector<1xf32> to vector<1x1xf32>
    %526 = vector.broadcast %525 : vector<1x1xf32> to vector<8x1xf32>
    %527 = arith.subf %523, %526 : vector<8x1xf32>
    %528 = math.exp %527 : vector<8x1xf32>
    %cst_241 = arith.constant dense<0.000000e+00> : vector<1xf32>
    %529 = vector.multi_reduction <add>, %528, %cst_241 [0] : vector<8x1xf32> to vector<1xf32>
    %530 = vector.shape_cast %529 : vector<1xf32> to vector<1x1xf32>
    %531 = vector.broadcast %530 : vector<1x1xf32> to vector<8x1xf32>
    %532 = arith.divf %528, %531 : vector<8x1xf32>
    %533 = vector.broadcast %532 : vector<8x1xf32> to vector<8x32xf32>
    %534 = arith.mulf %533, %1 : vector<8x32xf32>
    %cst_242 = arith.constant dense<0.000000e+00> : vector<32xf32>
    %535 = vector.multi_reduction <add>, %534, %cst_242 [0] : vector<8x32xf32> to vector<32xf32>
    %536 = vector.shape_cast %535 : vector<32xf32> to vector<1x32xf32>
    %c0_243 = arith.constant 0 : index
    %c0_244 = arith.constant 0 : index
    %537 = vector.load %arg11[%c0_243, %c0_244] : memref<32x32xf32, #tpu.memory_space<vmem>>, vector<32x32xf32>
    %cst_245 = arith.constant dense<0.000000e+00> : vector<1x32xf32>
    %538 = tpu.matmul %514, %537, %cst_245 {dimension_numbers = #tpu.dot_dimension_numbers<[1], [0], [0], [1], [0, 0, 1, 1], [], []>} : vector<1x32xf32>, vector<32x32xf32>, vector<1x32xf32> -> vector<1x32xf32>
    %c0_246 = arith.constant 0 : index
    %c0_247 = arith.constant 0 : index
    %539 = vector.load %arg12[%c0_246, %c0_247] : memref<32x32xf32, #tpu.memory_space<vmem>>, vector<32x32xf32>
    %cst_248 = arith.constant dense<0.000000e+00> : vector<1x32xf32>
    %540 = tpu.matmul %536, %539, %cst_248 {dimension_numbers = #tpu.dot_dimension_numbers<[1], [0], [0], [1], [0, 0, 1, 1], [], []>} : vector<1x32xf32>, vector<32x32xf32>, vector<1x32xf32> -> vector<1x32xf32>
    %541 = arith.addf %538, %540 : vector<1x32xf32>
    %c0_249 = arith.constant 0 : index
    %c0_250 = arith.constant 0 : index
    %542 = vector.load %arg13[%c0_249, %c0_250] : memref<1x32xf32, #tpu.memory_space<vmem>>, vector<1x32xf32>
    %543 = arith.addf %541, %542 : vector<1x32xf32>
    %544 = math.tanh %543 : vector<1x32xf32>
    %c0_251 = arith.constant 0 : index
    %c0_252 = arith.constant 0 : index
    %545 = vector.load %arg14[%c0_251, %c0_252] : memref<32x64xf32, #tpu.memory_space<vmem>>, vector<32x64xf32>
    %cst_253 = arith.constant dense<0.000000e+00> : vector<1x64xf32>
    %546 = tpu.matmul %544, %545, %cst_253 {dimension_numbers = #tpu.dot_dimension_numbers<[1], [0], [0], [1], [0, 0, 1, 1], [], []>} : vector<1x32xf32>, vector<32x64xf32>, vector<1x64xf32> -> vector<1x64xf32>
    %c0_254 = arith.constant 0 : index
    %c0_255 = arith.constant 0 : index
    %547 = vector.load %arg15[%c0_254, %c0_255] : memref<1x64xf32, #tpu.memory_space<vmem>>, vector<1x64xf32>
    %548 = arith.addf %546, %547 : vector<1x64xf32>
    %cst_256 = arith.constant dense<0xFF800000> : vector<1xf32>
    %549 = vector.multi_reduction <maximumf>, %548, %cst_256 [1] : vector<1x64xf32> to vector<1xf32>
    %550 = vector.shape_cast %549 : vector<1xf32> to vector<1x1xf32>
    %551 = vector.broadcast %550 : vector<1x1xf32> to vector<1x64xf32>
    %552 = arith.subf %548, %551 : vector<1x64xf32>
    %553 = math.exp %552 : vector<1x64xf32>
    %cst_257 = arith.constant dense<0.000000e+00> : vector<1xf32>
    %554 = vector.multi_reduction <add>, %553, %cst_257 [1] : vector<1x64xf32> to vector<1xf32>
    %555 = vector.shape_cast %554 : vector<1xf32> to vector<1x1xf32>
    %cst_258 = arith.constant 1.000000e+00 : f32
    %556 = vector.broadcast %cst_258 : f32 to vector<1x1xf32>
    %557 = arith.divf %556, %555 : vector<1x1xf32>
    %558 = vector.broadcast %550 : vector<1x1xf32> to vector<1x64xf32>
    %559 = arith.cmpf oeq, %548, %558 : vector<1x64xf32>
    %c64_i32_259 = arith.constant 64 : i32
    %560 = vector.broadcast %c64_i32_259 : i32 to vector<1x64xi32>
    %561 = arith.select %559, %10, %560 : vector<1x64xi1>, vector<1x64xi32>
    %cst_260 = arith.constant dense<2147483647> : vector<1xi32>
    %562 = vector.multi_reduction <minsi>, %561, %cst_260 [1] : vector<1x64xi32> to vector<1xi32>
    %563 = vector.shape_cast %562 : vector<1xi32> to vector<1x1xi32>
    %564 = vector.broadcast %563 : vector<1x1xi32> to vector<1x64xi32>
    %565 = arith.cmpi eq, %10, %564 : vector<1x64xi32>
    %566 = arith.extui %565 : vector<1x64xi1> to vector<1x64xi32>
    %567 = arith.sitofp %566 : vector<1x64xi32> to vector<1x64xf32>
    %cst_261 = arith.constant dense<0.000000e+00> : vector<1x32xf32>
    %568 = tpu.matmul %567, %0, %cst_261 {dimension_numbers = #tpu.dot_dimension_numbers<[1], [0], [0], [1], [0, 0, 1, 1], [], []>} : vector<1x64xf32>, vector<64x32xf32>, vector<1x32xf32> -> vector<1x32xf32>
    %569 = vector.shape_cast %563 : vector<1x1xi32> to vector<1x1xi32>
    %570 = vector.broadcast %569 : vector<1x1xi32> to vector<1x128xi32>
    %c5 = arith.constant 5 : index
    %c0_262 = arith.constant 0 : index
    %571 = vector.load %arg16[%c5, %c0_262] : memref<10x128xi32, #tpu.memory_space<vmem>>, vector<1x128xi32>
    tpu.vector_store %arg16[%c5, %c0_262], %570 {strides = array<i32>} : memref<10x128xi32, #tpu.memory_space<vmem>>, vector<1x128xi32>,
    %572 = vector.shape_cast %557 : vector<1x1xf32> to vector<1x1xf32>
    %573 = vector.broadcast %572 : vector<1x1xf32> to vector<1x128xf32>
    %c5_263 = arith.constant 5 : index
    %c0_264 = arith.constant 0 : index
    %574 = vector.load %arg17[%c5_263, %c0_264] : memref<10x128xf32, #tpu.memory_space<vmem>>, vector<1x128xf32>
    tpu.vector_store %arg17[%c5_263, %c0_264], %573 {strides = array<i32>} : memref<10x128xf32, #tpu.memory_space<vmem>>, vector<1x128xf32>,
    %c0_265 = arith.constant 0 : index
    %c0_266 = arith.constant 0 : index
    %575 = vector.load %arg3[%c0_265, %c0_266] : memref<32x96xf32, #tpu.memory_space<vmem>>, vector<32x96xf32>
    %cst_267 = arith.constant dense<0.000000e+00> : vector<1x96xf32>
    %576 = tpu.matmul %568, %575, %cst_267 {dimension_numbers = #tpu.dot_dimension_numbers<[1], [0], [0], [1], [0, 0, 1, 1], [], []>} : vector<1x32xf32>, vector<32x96xf32>, vector<1x96xf32> -> vector<1x96xf32>
    %c0_268 = arith.constant 0 : index
    %c0_269 = arith.constant 0 : index
    %577 = vector.load %arg5[%c0_268, %c0_269] : memref<1x96xf32, #tpu.memory_space<vmem>>, vector<1x96xf32>
    %578 = arith.addf %576, %577 : vector<1x96xf32>
    %c0_270 = arith.constant 0 : index
    %c0_271 = arith.constant 0 : index
    %579 = vector.load %arg4[%c0_270, %c0_271] : memref<32x96xf32, #tpu.memory_space<vmem>>, vector<32x96xf32>
    %cst_272 = arith.constant dense<0.000000e+00> : vector<1x96xf32>
    %580 = tpu.matmul %514, %579, %cst_272 {dimension_numbers = #tpu.dot_dimension_numbers<[1], [0], [0], [1], [0, 0, 1, 1], [], []>} : vector<1x32xf32>, vector<32x96xf32>, vector<1x96xf32> -> vector<1x96xf32>
    %c0_273 = arith.constant 0 : index
    %c0_274 = arith.constant 0 : index
    %581 = vector.load %arg6[%c0_273, %c0_274] : memref<1x96xf32, #tpu.memory_space<vmem>>, vector<1x96xf32>
    %582 = arith.addf %580, %581 : vector<1x96xf32>
    %583 = vector.extract_strided_slice %578 {offsets = [0, 0], sizes = [1, 32], strides = [1, 1]} : vector<1x96xf32> to vector<1x32xf32>
    %584 = vector.extract_strided_slice %582 {offsets = [0, 0], sizes = [1, 32], strides = [1, 1]} : vector<1x96xf32> to vector<1x32xf32>
    %585 = arith.addf %583, %584 : vector<1x32xf32>
    %586 = arith.negf %585 : vector<1x32xf32>
    %587 = math.exp %586 : vector<1x32xf32>
    %cst_275 = arith.constant 1.000000e+00 : f32
    %588 = vector.broadcast %cst_275 : f32 to vector<1x32xf32>
    %589 = arith.addf %588, %587 : vector<1x32xf32>
    %590 = arith.divf %588, %589 : vector<1x32xf32>
    %591 = vector.extract_strided_slice %578 {offsets = [0, 32], sizes = [1, 32], strides = [1, 1]} : vector<1x96xf32> to vector<1x32xf32>
    %592 = vector.extract_strided_slice %582 {offsets = [0, 32], sizes = [1, 32], strides = [1, 1]} : vector<1x96xf32> to vector<1x32xf32>
    %593 = arith.addf %591, %592 : vector<1x32xf32>
    %594 = arith.negf %593 : vector<1x32xf32>
    %595 = math.exp %594 : vector<1x32xf32>
    %cst_276 = arith.constant 1.000000e+00 : f32
    %596 = vector.broadcast %cst_276 : f32 to vector<1x32xf32>
    %597 = arith.addf %596, %595 : vector<1x32xf32>
    %598 = arith.divf %596, %597 : vector<1x32xf32>
    %599 = vector.extract_strided_slice %578 {offsets = [0, 64], sizes = [1, 32], strides = [1, 1]} : vector<1x96xf32> to vector<1x32xf32>
    %600 = vector.extract_strided_slice %582 {offsets = [0, 64], sizes = [1, 32], strides = [1, 1]} : vector<1x96xf32> to vector<1x32xf32>
    %601 = arith.mulf %590, %600 : vector<1x32xf32>
    %602 = arith.addf %599, %601 : vector<1x32xf32>
    %603 = math.tanh %602 : vector<1x32xf32>
    %cst_277 = arith.constant 1.000000e+00 : f32
    %604 = vector.broadcast %cst_277 : f32 to vector<1x32xf32>
    %605 = arith.subf %604, %598 : vector<1x32xf32>
    %606 = arith.mulf %605, %603 : vector<1x32xf32>
    %607 = arith.mulf %598, %514 : vector<1x32xf32>
    %608 = arith.addf %606, %607 : vector<1x32xf32>
    %c0_278 = arith.constant 0 : index
    %c0_279 = arith.constant 0 : index
    %609 = vector.load %arg7[%c0_278, %c0_279] : memref<32x32xf32, #tpu.memory_space<vmem>>, vector<32x32xf32>
    %cst_280 = arith.constant dense<0.000000e+00> : vector<1x32xf32>
    %610 = tpu.matmul %608, %609, %cst_280 {dimension_numbers = #tpu.dot_dimension_numbers<[1], [0], [0], [1], [0, 0, 1, 1], [], []>} : vector<1x32xf32>, vector<32x32xf32>, vector<1x32xf32> -> vector<1x32xf32>
    %611 = vector.broadcast %610 : vector<1x32xf32> to vector<8x32xf32>
    %612 = arith.addf %611, %7 : vector<8x32xf32>
    %613 = math.tanh %612 : vector<8x32xf32>
    %614 = vector.broadcast %2 : vector<1x32xf32> to vector<8x32xf32>
    %615 = arith.mulf %614, %613 : vector<8x32xf32>
    %cst_281 = arith.constant dense<0.000000e+00> : vector<8xf32>
    %616 = vector.multi_reduction <add>, %615, %cst_281 [1] : vector<8x32xf32> to vector<8xf32>
    %617 = vector.shape_cast %616 : vector<8xf32> to vector<8x1xf32>
    %cst_282 = arith.constant dense<0xFF800000> : vector<1xf32>
    %618 = vector.multi_reduction <maximumf>, %617, %cst_282 [0] : vector<8x1xf32> to vector<1xf32>
    %619 = vector.shape_cast %618 : vector<1xf32> to vector<1x1xf32>
    %620 = vector.broadcast %619 : vector<1x1xf32> to vector<8x1xf32>
    %621 = arith.subf %617, %620 : vector<8x1xf32>
    %622 = math.exp %621 : vector<8x1xf32>
    %cst_283 = arith.constant dense<0.000000e+00> : vector<1xf32>
    %623 = vector.multi_reduction <add>, %622, %cst_283 [0] : vector<8x1xf32> to vector<1xf32>
    %624 = vector.shape_cast %623 : vector<1xf32> to vector<1x1xf32>
    %625 = vector.broadcast %624 : vector<1x1xf32> to vector<8x1xf32>
    %626 = arith.divf %622, %625 : vector<8x1xf32>
    %627 = vector.broadcast %626 : vector<8x1xf32> to vector<8x32xf32>
    %628 = arith.mulf %627, %1 : vector<8x32xf32>
    %cst_284 = arith.constant dense<0.000000e+00> : vector<32xf32>
    %629 = vector.multi_reduction <add>, %628, %cst_284 [0] : vector<8x32xf32> to vector<32xf32>
    %630 = vector.shape_cast %629 : vector<32xf32> to vector<1x32xf32>
    %c0_285 = arith.constant 0 : index
    %c0_286 = arith.constant 0 : index
    %631 = vector.load %arg11[%c0_285, %c0_286] : memref<32x32xf32, #tpu.memory_space<vmem>>, vector<32x32xf32>
    %cst_287 = arith.constant dense<0.000000e+00> : vector<1x32xf32>
    %632 = tpu.matmul %608, %631, %cst_287 {dimension_numbers = #tpu.dot_dimension_numbers<[1], [0], [0], [1], [0, 0, 1, 1], [], []>} : vector<1x32xf32>, vector<32x32xf32>, vector<1x32xf32> -> vector<1x32xf32>
    %c0_288 = arith.constant 0 : index
    %c0_289 = arith.constant 0 : index
    %633 = vector.load %arg12[%c0_288, %c0_289] : memref<32x32xf32, #tpu.memory_space<vmem>>, vector<32x32xf32>
    %cst_290 = arith.constant dense<0.000000e+00> : vector<1x32xf32>
    %634 = tpu.matmul %630, %633, %cst_290 {dimension_numbers = #tpu.dot_dimension_numbers<[1], [0], [0], [1], [0, 0, 1, 1], [], []>} : vector<1x32xf32>, vector<32x32xf32>, vector<1x32xf32> -> vector<1x32xf32>
    %635 = arith.addf %632, %634 : vector<1x32xf32>
    %c0_291 = arith.constant 0 : index
    %c0_292 = arith.constant 0 : index
    %636 = vector.load %arg13[%c0_291, %c0_292] : memref<1x32xf32, #tpu.memory_space<vmem>>, vector<1x32xf32>
    %637 = arith.addf %635, %636 : vector<1x32xf32>
    %638 = math.tanh %637 : vector<1x32xf32>
    %c0_293 = arith.constant 0 : index
    %c0_294 = arith.constant 0 : index
    %639 = vector.load %arg14[%c0_293, %c0_294] : memref<32x64xf32, #tpu.memory_space<vmem>>, vector<32x64xf32>
    %cst_295 = arith.constant dense<0.000000e+00> : vector<1x64xf32>
    %640 = tpu.matmul %638, %639, %cst_295 {dimension_numbers = #tpu.dot_dimension_numbers<[1], [0], [0], [1], [0, 0, 1, 1], [], []>} : vector<1x32xf32>, vector<32x64xf32>, vector<1x64xf32> -> vector<1x64xf32>
    %c0_296 = arith.constant 0 : index
    %c0_297 = arith.constant 0 : index
    %641 = vector.load %arg15[%c0_296, %c0_297] : memref<1x64xf32, #tpu.memory_space<vmem>>, vector<1x64xf32>
    %642 = arith.addf %640, %641 : vector<1x64xf32>
    %cst_298 = arith.constant dense<0xFF800000> : vector<1xf32>
    %643 = vector.multi_reduction <maximumf>, %642, %cst_298 [1] : vector<1x64xf32> to vector<1xf32>
    %644 = vector.shape_cast %643 : vector<1xf32> to vector<1x1xf32>
    %645 = vector.broadcast %644 : vector<1x1xf32> to vector<1x64xf32>
    %646 = arith.subf %642, %645 : vector<1x64xf32>
    %647 = math.exp %646 : vector<1x64xf32>
    %cst_299 = arith.constant dense<0.000000e+00> : vector<1xf32>
    %648 = vector.multi_reduction <add>, %647, %cst_299 [1] : vector<1x64xf32> to vector<1xf32>
    %649 = vector.shape_cast %648 : vector<1xf32> to vector<1x1xf32>
    %cst_300 = arith.constant 1.000000e+00 : f32
    %650 = vector.broadcast %cst_300 : f32 to vector<1x1xf32>
    %651 = arith.divf %650, %649 : vector<1x1xf32>
    %652 = vector.broadcast %644 : vector<1x1xf32> to vector<1x64xf32>
    %653 = arith.cmpf oeq, %642, %652 : vector<1x64xf32>
    %c64_i32_301 = arith.constant 64 : i32
    %654 = vector.broadcast %c64_i32_301 : i32 to vector<1x64xi32>
    %655 = arith.select %653, %10, %654 : vector<1x64xi1>, vector<1x64xi32>
    %cst_302 = arith.constant dense<2147483647> : vector<1xi32>
    %656 = vector.multi_reduction <minsi>, %655, %cst_302 [1] : vector<1x64xi32> to vector<1xi32>
    %657 = vector.shape_cast %656 : vector<1xi32> to vector<1x1xi32>
    %658 = vector.broadcast %657 : vector<1x1xi32> to vector<1x64xi32>
    %659 = arith.cmpi eq, %10, %658 : vector<1x64xi32>
    %660 = arith.extui %659 : vector<1x64xi1> to vector<1x64xi32>
    %661 = arith.sitofp %660 : vector<1x64xi32> to vector<1x64xf32>
    %cst_303 = arith.constant dense<0.000000e+00> : vector<1x32xf32>
    %662 = tpu.matmul %661, %0, %cst_303 {dimension_numbers = #tpu.dot_dimension_numbers<[1], [0], [0], [1], [0, 0, 1, 1], [], []>} : vector<1x64xf32>, vector<64x32xf32>, vector<1x32xf32> -> vector<1x32xf32>
    %663 = vector.shape_cast %657 : vector<1x1xi32> to vector<1x1xi32>
    %664 = vector.broadcast %663 : vector<1x1xi32> to vector<1x128xi32>
    %c6 = arith.constant 6 : index
    %c0_304 = arith.constant 0 : index
    %665 = vector.load %arg16[%c6, %c0_304] : memref<10x128xi32, #tpu.memory_space<vmem>>, vector<1x128xi32>
    tpu.vector_store %arg16[%c6, %c0_304], %664 {strides = array<i32>} : memref<10x128xi32, #tpu.memory_space<vmem>>, vector<1x128xi32>,
    %666 = vector.shape_cast %651 : vector<1x1xf32> to vector<1x1xf32>
    %667 = vector.broadcast %666 : vector<1x1xf32> to vector<1x128xf32>
    %c6_305 = arith.constant 6 : index
    %c0_306 = arith.constant 0 : index
    %668 = vector.load %arg17[%c6_305, %c0_306] : memref<10x128xf32, #tpu.memory_space<vmem>>, vector<1x128xf32>
    tpu.vector_store %arg17[%c6_305, %c0_306], %667 {strides = array<i32>} : memref<10x128xf32, #tpu.memory_space<vmem>>, vector<1x128xf32>,
    %c0_307 = arith.constant 0 : index
    %c0_308 = arith.constant 0 : index
    %669 = vector.load %arg3[%c0_307, %c0_308] : memref<32x96xf32, #tpu.memory_space<vmem>>, vector<32x96xf32>
    %cst_309 = arith.constant dense<0.000000e+00> : vector<1x96xf32>
    %670 = tpu.matmul %662, %669, %cst_309 {dimension_numbers = #tpu.dot_dimension_numbers<[1], [0], [0], [1], [0, 0, 1, 1], [], []>} : vector<1x32xf32>, vector<32x96xf32>, vector<1x96xf32> -> vector<1x96xf32>
    %c0_310 = arith.constant 0 : index
    %c0_311 = arith.constant 0 : index
    %671 = vector.load %arg5[%c0_310, %c0_311] : memref<1x96xf32, #tpu.memory_space<vmem>>, vector<1x96xf32>
    %672 = arith.addf %670, %671 : vector<1x96xf32>
    %c0_312 = arith.constant 0 : index
    %c0_313 = arith.constant 0 : index
    %673 = vector.load %arg4[%c0_312, %c0_313] : memref<32x96xf32, #tpu.memory_space<vmem>>, vector<32x96xf32>
    %cst_314 = arith.constant dense<0.000000e+00> : vector<1x96xf32>
    %674 = tpu.matmul %608, %673, %cst_314 {dimension_numbers = #tpu.dot_dimension_numbers<[1], [0], [0], [1], [0, 0, 1, 1], [], []>} : vector<1x32xf32>, vector<32x96xf32>, vector<1x96xf32> -> vector<1x96xf32>
    %c0_315 = arith.constant 0 : index
    %c0_316 = arith.constant 0 : index
    %675 = vector.load %arg6[%c0_315, %c0_316] : memref<1x96xf32, #tpu.memory_space<vmem>>, vector<1x96xf32>
    %676 = arith.addf %674, %675 : vector<1x96xf32>
    %677 = vector.extract_strided_slice %672 {offsets = [0, 0], sizes = [1, 32], strides = [1, 1]} : vector<1x96xf32> to vector<1x32xf32>
    %678 = vector.extract_strided_slice %676 {offsets = [0, 0], sizes = [1, 32], strides = [1, 1]} : vector<1x96xf32> to vector<1x32xf32>
    %679 = arith.addf %677, %678 : vector<1x32xf32>
    %680 = arith.negf %679 : vector<1x32xf32>
    %681 = math.exp %680 : vector<1x32xf32>
    %cst_317 = arith.constant 1.000000e+00 : f32
    %682 = vector.broadcast %cst_317 : f32 to vector<1x32xf32>
    %683 = arith.addf %682, %681 : vector<1x32xf32>
    %684 = arith.divf %682, %683 : vector<1x32xf32>
    %685 = vector.extract_strided_slice %672 {offsets = [0, 32], sizes = [1, 32], strides = [1, 1]} : vector<1x96xf32> to vector<1x32xf32>
    %686 = vector.extract_strided_slice %676 {offsets = [0, 32], sizes = [1, 32], strides = [1, 1]} : vector<1x96xf32> to vector<1x32xf32>
    %687 = arith.addf %685, %686 : vector<1x32xf32>
    %688 = arith.negf %687 : vector<1x32xf32>
    %689 = math.exp %688 : vector<1x32xf32>
    %cst_318 = arith.constant 1.000000e+00 : f32
    %690 = vector.broadcast %cst_318 : f32 to vector<1x32xf32>
    %691 = arith.addf %690, %689 : vector<1x32xf32>
    %692 = arith.divf %690, %691 : vector<1x32xf32>
    %693 = vector.extract_strided_slice %672 {offsets = [0, 64], sizes = [1, 32], strides = [1, 1]} : vector<1x96xf32> to vector<1x32xf32>
    %694 = vector.extract_strided_slice %676 {offsets = [0, 64], sizes = [1, 32], strides = [1, 1]} : vector<1x96xf32> to vector<1x32xf32>
    %695 = arith.mulf %684, %694 : vector<1x32xf32>
    %696 = arith.addf %693, %695 : vector<1x32xf32>
    %697 = math.tanh %696 : vector<1x32xf32>
    %cst_319 = arith.constant 1.000000e+00 : f32
    %698 = vector.broadcast %cst_319 : f32 to vector<1x32xf32>
    %699 = arith.subf %698, %692 : vector<1x32xf32>
    %700 = arith.mulf %699, %697 : vector<1x32xf32>
    %701 = arith.mulf %692, %608 : vector<1x32xf32>
    %702 = arith.addf %700, %701 : vector<1x32xf32>
    %c0_320 = arith.constant 0 : index
    %c0_321 = arith.constant 0 : index
    %703 = vector.load %arg7[%c0_320, %c0_321] : memref<32x32xf32, #tpu.memory_space<vmem>>, vector<32x32xf32>
    %cst_322 = arith.constant dense<0.000000e+00> : vector<1x32xf32>
    %704 = tpu.matmul %702, %703, %cst_322 {dimension_numbers = #tpu.dot_dimension_numbers<[1], [0], [0], [1], [0, 0, 1, 1], [], []>} : vector<1x32xf32>, vector<32x32xf32>, vector<1x32xf32> -> vector<1x32xf32>
    %705 = vector.broadcast %704 : vector<1x32xf32> to vector<8x32xf32>
    %706 = arith.addf %705, %7 : vector<8x32xf32>
    %707 = math.tanh %706 : vector<8x32xf32>
    %708 = vector.broadcast %2 : vector<1x32xf32> to vector<8x32xf32>
    %709 = arith.mulf %708, %707 : vector<8x32xf32>
    %cst_323 = arith.constant dense<0.000000e+00> : vector<8xf32>
    %710 = vector.multi_reduction <add>, %709, %cst_323 [1] : vector<8x32xf32> to vector<8xf32>
    %711 = vector.shape_cast %710 : vector<8xf32> to vector<8x1xf32>
    %cst_324 = arith.constant dense<0xFF800000> : vector<1xf32>
    %712 = vector.multi_reduction <maximumf>, %711, %cst_324 [0] : vector<8x1xf32> to vector<1xf32>
    %713 = vector.shape_cast %712 : vector<1xf32> to vector<1x1xf32>
    %714 = vector.broadcast %713 : vector<1x1xf32> to vector<8x1xf32>
    %715 = arith.subf %711, %714 : vector<8x1xf32>
    %716 = math.exp %715 : vector<8x1xf32>
    %cst_325 = arith.constant dense<0.000000e+00> : vector<1xf32>
    %717 = vector.multi_reduction <add>, %716, %cst_325 [0] : vector<8x1xf32> to vector<1xf32>
    %718 = vector.shape_cast %717 : vector<1xf32> to vector<1x1xf32>
    %719 = vector.broadcast %718 : vector<1x1xf32> to vector<8x1xf32>
    %720 = arith.divf %716, %719 : vector<8x1xf32>
    %721 = vector.broadcast %720 : vector<8x1xf32> to vector<8x32xf32>
    %722 = arith.mulf %721, %1 : vector<8x32xf32>
    %cst_326 = arith.constant dense<0.000000e+00> : vector<32xf32>
    %723 = vector.multi_reduction <add>, %722, %cst_326 [0] : vector<8x32xf32> to vector<32xf32>
    %724 = vector.shape_cast %723 : vector<32xf32> to vector<1x32xf32>
    %c0_327 = arith.constant 0 : index
    %c0_328 = arith.constant 0 : index
    %725 = vector.load %arg11[%c0_327, %c0_328] : memref<32x32xf32, #tpu.memory_space<vmem>>, vector<32x32xf32>
    %cst_329 = arith.constant dense<0.000000e+00> : vector<1x32xf32>
    %726 = tpu.matmul %702, %725, %cst_329 {dimension_numbers = #tpu.dot_dimension_numbers<[1], [0], [0], [1], [0, 0, 1, 1], [], []>} : vector<1x32xf32>, vector<32x32xf32>, vector<1x32xf32> -> vector<1x32xf32>
    %c0_330 = arith.constant 0 : index
    %c0_331 = arith.constant 0 : index
    %727 = vector.load %arg12[%c0_330, %c0_331] : memref<32x32xf32, #tpu.memory_space<vmem>>, vector<32x32xf32>
    %cst_332 = arith.constant dense<0.000000e+00> : vector<1x32xf32>
    %728 = tpu.matmul %724, %727, %cst_332 {dimension_numbers = #tpu.dot_dimension_numbers<[1], [0], [0], [1], [0, 0, 1, 1], [], []>} : vector<1x32xf32>, vector<32x32xf32>, vector<1x32xf32> -> vector<1x32xf32>
    %729 = arith.addf %726, %728 : vector<1x32xf32>
    %c0_333 = arith.constant 0 : index
    %c0_334 = arith.constant 0 : index
    %730 = vector.load %arg13[%c0_333, %c0_334] : memref<1x32xf32, #tpu.memory_space<vmem>>, vector<1x32xf32>
    %731 = arith.addf %729, %730 : vector<1x32xf32>
    %732 = math.tanh %731 : vector<1x32xf32>
    %c0_335 = arith.constant 0 : index
    %c0_336 = arith.constant 0 : index
    %733 = vector.load %arg14[%c0_335, %c0_336] : memref<32x64xf32, #tpu.memory_space<vmem>>, vector<32x64xf32>
    %cst_337 = arith.constant dense<0.000000e+00> : vector<1x64xf32>
    %734 = tpu.matmul %732, %733, %cst_337 {dimension_numbers = #tpu.dot_dimension_numbers<[1], [0], [0], [1], [0, 0, 1, 1], [], []>} : vector<1x32xf32>, vector<32x64xf32>, vector<1x64xf32> -> vector<1x64xf32>
    %c0_338 = arith.constant 0 : index
    %c0_339 = arith.constant 0 : index
    %735 = vector.load %arg15[%c0_338, %c0_339] : memref<1x64xf32, #tpu.memory_space<vmem>>, vector<1x64xf32>
    %736 = arith.addf %734, %735 : vector<1x64xf32>
    %cst_340 = arith.constant dense<0xFF800000> : vector<1xf32>
    %737 = vector.multi_reduction <maximumf>, %736, %cst_340 [1] : vector<1x64xf32> to vector<1xf32>
    %738 = vector.shape_cast %737 : vector<1xf32> to vector<1x1xf32>
    %739 = vector.broadcast %738 : vector<1x1xf32> to vector<1x64xf32>
    %740 = arith.subf %736, %739 : vector<1x64xf32>
    %741 = math.exp %740 : vector<1x64xf32>
    %cst_341 = arith.constant dense<0.000000e+00> : vector<1xf32>
    %742 = vector.multi_reduction <add>, %741, %cst_341 [1] : vector<1x64xf32> to vector<1xf32>
    %743 = vector.shape_cast %742 : vector<1xf32> to vector<1x1xf32>
    %cst_342 = arith.constant 1.000000e+00 : f32
    %744 = vector.broadcast %cst_342 : f32 to vector<1x1xf32>
    %745 = arith.divf %744, %743 : vector<1x1xf32>
    %746 = vector.broadcast %738 : vector<1x1xf32> to vector<1x64xf32>
    %747 = arith.cmpf oeq, %736, %746 : vector<1x64xf32>
    %c64_i32_343 = arith.constant 64 : i32
    %748 = vector.broadcast %c64_i32_343 : i32 to vector<1x64xi32>
    %749 = arith.select %747, %10, %748 : vector<1x64xi1>, vector<1x64xi32>
    %cst_344 = arith.constant dense<2147483647> : vector<1xi32>
    %750 = vector.multi_reduction <minsi>, %749, %cst_344 [1] : vector<1x64xi32> to vector<1xi32>
    %751 = vector.shape_cast %750 : vector<1xi32> to vector<1x1xi32>
    %752 = vector.broadcast %751 : vector<1x1xi32> to vector<1x64xi32>
    %753 = arith.cmpi eq, %10, %752 : vector<1x64xi32>
    %754 = arith.extui %753 : vector<1x64xi1> to vector<1x64xi32>
    %755 = arith.sitofp %754 : vector<1x64xi32> to vector<1x64xf32>
    %cst_345 = arith.constant dense<0.000000e+00> : vector<1x32xf32>
    %756 = tpu.matmul %755, %0, %cst_345 {dimension_numbers = #tpu.dot_dimension_numbers<[1], [0], [0], [1], [0, 0, 1, 1], [], []>} : vector<1x64xf32>, vector<64x32xf32>, vector<1x32xf32> -> vector<1x32xf32>
    %757 = vector.shape_cast %751 : vector<1x1xi32> to vector<1x1xi32>
    %758 = vector.broadcast %757 : vector<1x1xi32> to vector<1x128xi32>
    %c7 = arith.constant 7 : index
    %c0_346 = arith.constant 0 : index
    %759 = vector.load %arg16[%c7, %c0_346] : memref<10x128xi32, #tpu.memory_space<vmem>>, vector<1x128xi32>
    tpu.vector_store %arg16[%c7, %c0_346], %758 {strides = array<i32>} : memref<10x128xi32, #tpu.memory_space<vmem>>, vector<1x128xi32>,
    %760 = vector.shape_cast %745 : vector<1x1xf32> to vector<1x1xf32>
    %761 = vector.broadcast %760 : vector<1x1xf32> to vector<1x128xf32>
    %c7_347 = arith.constant 7 : index
    %c0_348 = arith.constant 0 : index
    %762 = vector.load %arg17[%c7_347, %c0_348] : memref<10x128xf32, #tpu.memory_space<vmem>>, vector<1x128xf32>
    tpu.vector_store %arg17[%c7_347, %c0_348], %761 {strides = array<i32>} : memref<10x128xf32, #tpu.memory_space<vmem>>, vector<1x128xf32>,
    %c0_349 = arith.constant 0 : index
    %c0_350 = arith.constant 0 : index
    %763 = vector.load %arg3[%c0_349, %c0_350] : memref<32x96xf32, #tpu.memory_space<vmem>>, vector<32x96xf32>
    %cst_351 = arith.constant dense<0.000000e+00> : vector<1x96xf32>
    %764 = tpu.matmul %756, %763, %cst_351 {dimension_numbers = #tpu.dot_dimension_numbers<[1], [0], [0], [1], [0, 0, 1, 1], [], []>} : vector<1x32xf32>, vector<32x96xf32>, vector<1x96xf32> -> vector<1x96xf32>
    %c0_352 = arith.constant 0 : index
    %c0_353 = arith.constant 0 : index
    %765 = vector.load %arg5[%c0_352, %c0_353] : memref<1x96xf32, #tpu.memory_space<vmem>>, vector<1x96xf32>
    %766 = arith.addf %764, %765 : vector<1x96xf32>
    %c0_354 = arith.constant 0 : index
    %c0_355 = arith.constant 0 : index
    %767 = vector.load %arg4[%c0_354, %c0_355] : memref<32x96xf32, #tpu.memory_space<vmem>>, vector<32x96xf32>
    %cst_356 = arith.constant dense<0.000000e+00> : vector<1x96xf32>
    %768 = tpu.matmul %702, %767, %cst_356 {dimension_numbers = #tpu.dot_dimension_numbers<[1], [0], [0], [1], [0, 0, 1, 1], [], []>} : vector<1x32xf32>, vector<32x96xf32>, vector<1x96xf32> -> vector<1x96xf32>
    %c0_357 = arith.constant 0 : index
    %c0_358 = arith.constant 0 : index
    %769 = vector.load %arg6[%c0_357, %c0_358] : memref<1x96xf32, #tpu.memory_space<vmem>>, vector<1x96xf32>
    %770 = arith.addf %768, %769 : vector<1x96xf32>
    %771 = vector.extract_strided_slice %766 {offsets = [0, 0], sizes = [1, 32], strides = [1, 1]} : vector<1x96xf32> to vector<1x32xf32>
    %772 = vector.extract_strided_slice %770 {offsets = [0, 0], sizes = [1, 32], strides = [1, 1]} : vector<1x96xf32> to vector<1x32xf32>
    %773 = arith.addf %771, %772 : vector<1x32xf32>
    %774 = arith.negf %773 : vector<1x32xf32>
    %775 = math.exp %774 : vector<1x32xf32>
    %cst_359 = arith.constant 1.000000e+00 : f32
    %776 = vector.broadcast %cst_359 : f32 to vector<1x32xf32>
    %777 = arith.addf %776, %775 : vector<1x32xf32>
    %778 = arith.divf %776, %777 : vector<1x32xf32>
    %779 = vector.extract_strided_slice %766 {offsets = [0, 32], sizes = [1, 32], strides = [1, 1]} : vector<1x96xf32> to vector<1x32xf32>
    %780 = vector.extract_strided_slice %770 {offsets = [0, 32], sizes = [1, 32], strides = [1, 1]} : vector<1x96xf32> to vector<1x32xf32>
    %781 = arith.addf %779, %780 : vector<1x32xf32>
    %782 = arith.negf %781 : vector<1x32xf32>
    %783 = math.exp %782 : vector<1x32xf32>
    %cst_360 = arith.constant 1.000000e+00 : f32
    %784 = vector.broadcast %cst_360 : f32 to vector<1x32xf32>
    %785 = arith.addf %784, %783 : vector<1x32xf32>
    %786 = arith.divf %784, %785 : vector<1x32xf32>
    %787 = vector.extract_strided_slice %766 {offsets = [0, 64], sizes = [1, 32], strides = [1, 1]} : vector<1x96xf32> to vector<1x32xf32>
    %788 = vector.extract_strided_slice %770 {offsets = [0, 64], sizes = [1, 32], strides = [1, 1]} : vector<1x96xf32> to vector<1x32xf32>
    %789 = arith.mulf %778, %788 : vector<1x32xf32>
    %790 = arith.addf %787, %789 : vector<1x32xf32>
    %791 = math.tanh %790 : vector<1x32xf32>
    %cst_361 = arith.constant 1.000000e+00 : f32
    %792 = vector.broadcast %cst_361 : f32 to vector<1x32xf32>
    %793 = arith.subf %792, %786 : vector<1x32xf32>
    %794 = arith.mulf %793, %791 : vector<1x32xf32>
    %795 = arith.mulf %786, %702 : vector<1x32xf32>
    %796 = arith.addf %794, %795 : vector<1x32xf32>
    %c0_362 = arith.constant 0 : index
    %c0_363 = arith.constant 0 : index
    %797 = vector.load %arg7[%c0_362, %c0_363] : memref<32x32xf32, #tpu.memory_space<vmem>>, vector<32x32xf32>
    %cst_364 = arith.constant dense<0.000000e+00> : vector<1x32xf32>
    %798 = tpu.matmul %796, %797, %cst_364 {dimension_numbers = #tpu.dot_dimension_numbers<[1], [0], [0], [1], [0, 0, 1, 1], [], []>} : vector<1x32xf32>, vector<32x32xf32>, vector<1x32xf32> -> vector<1x32xf32>
    %799 = vector.broadcast %798 : vector<1x32xf32> to vector<8x32xf32>
    %800 = arith.addf %799, %7 : vector<8x32xf32>
    %801 = math.tanh %800 : vector<8x32xf32>
    %802 = vector.broadcast %2 : vector<1x32xf32> to vector<8x32xf32>
    %803 = arith.mulf %802, %801 : vector<8x32xf32>
    %cst_365 = arith.constant dense<0.000000e+00> : vector<8xf32>
    %804 = vector.multi_reduction <add>, %803, %cst_365 [1] : vector<8x32xf32> to vector<8xf32>
    %805 = vector.shape_cast %804 : vector<8xf32> to vector<8x1xf32>
    %cst_366 = arith.constant dense<0xFF800000> : vector<1xf32>
    %806 = vector.multi_reduction <maximumf>, %805, %cst_366 [0] : vector<8x1xf32> to vector<1xf32>
    %807 = vector.shape_cast %806 : vector<1xf32> to vector<1x1xf32>
    %808 = vector.broadcast %807 : vector<1x1xf32> to vector<8x1xf32>
    %809 = arith.subf %805, %808 : vector<8x1xf32>
    %810 = math.exp %809 : vector<8x1xf32>
    %cst_367 = arith.constant dense<0.000000e+00> : vector<1xf32>
    %811 = vector.multi_reduction <add>, %810, %cst_367 [0] : vector<8x1xf32> to vector<1xf32>
    %812 = vector.shape_cast %811 : vector<1xf32> to vector<1x1xf32>
    %813 = vector.broadcast %812 : vector<1x1xf32> to vector<8x1xf32>
    %814 = arith.divf %810, %813 : vector<8x1xf32>
    %815 = vector.broadcast %814 : vector<8x1xf32> to vector<8x32xf32>
    %816 = arith.mulf %815, %1 : vector<8x32xf32>
    %cst_368 = arith.constant dense<0.000000e+00> : vector<32xf32>
    %817 = vector.multi_reduction <add>, %816, %cst_368 [0] : vector<8x32xf32> to vector<32xf32>
    %818 = vector.shape_cast %817 : vector<32xf32> to vector<1x32xf32>
    %c0_369 = arith.constant 0 : index
    %c0_370 = arith.constant 0 : index
    %819 = vector.load %arg11[%c0_369, %c0_370] : memref<32x32xf32, #tpu.memory_space<vmem>>, vector<32x32xf32>
    %cst_371 = arith.constant dense<0.000000e+00> : vector<1x32xf32>
    %820 = tpu.matmul %796, %819, %cst_371 {dimension_numbers = #tpu.dot_dimension_numbers<[1], [0], [0], [1], [0, 0, 1, 1], [], []>} : vector<1x32xf32>, vector<32x32xf32>, vector<1x32xf32> -> vector<1x32xf32>
    %c0_372 = arith.constant 0 : index
    %c0_373 = arith.constant 0 : index
    %821 = vector.load %arg12[%c0_372, %c0_373] : memref<32x32xf32, #tpu.memory_space<vmem>>, vector<32x32xf32>
    %cst_374 = arith.constant dense<0.000000e+00> : vector<1x32xf32>
    %822 = tpu.matmul %818, %821, %cst_374 {dimension_numbers = #tpu.dot_dimension_numbers<[1], [0], [0], [1], [0, 0, 1, 1], [], []>} : vector<1x32xf32>, vector<32x32xf32>, vector<1x32xf32> -> vector<1x32xf32>
    %823 = arith.addf %820, %822 : vector<1x32xf32>
    %c0_375 = arith.constant 0 : index
    %c0_376 = arith.constant 0 : index
    %824 = vector.load %arg13[%c0_375, %c0_376] : memref<1x32xf32, #tpu.memory_space<vmem>>, vector<1x32xf32>
    %825 = arith.addf %823, %824 : vector<1x32xf32>
    %826 = math.tanh %825 : vector<1x32xf32>
    %c0_377 = arith.constant 0 : index
    %c0_378 = arith.constant 0 : index
    %827 = vector.load %arg14[%c0_377, %c0_378] : memref<32x64xf32, #tpu.memory_space<vmem>>, vector<32x64xf32>
    %cst_379 = arith.constant dense<0.000000e+00> : vector<1x64xf32>
    %828 = tpu.matmul %826, %827, %cst_379 {dimension_numbers = #tpu.dot_dimension_numbers<[1], [0], [0], [1], [0, 0, 1, 1], [], []>} : vector<1x32xf32>, vector<32x64xf32>, vector<1x64xf32> -> vector<1x64xf32>
    %c0_380 = arith.constant 0 : index
    %c0_381 = arith.constant 0 : index
    %829 = vector.load %arg15[%c0_380, %c0_381] : memref<1x64xf32, #tpu.memory_space<vmem>>, vector<1x64xf32>
    %830 = arith.addf %828, %829 : vector<1x64xf32>
    %cst_382 = arith.constant dense<0xFF800000> : vector<1xf32>
    %831 = vector.multi_reduction <maximumf>, %830, %cst_382 [1] : vector<1x64xf32> to vector<1xf32>
    %832 = vector.shape_cast %831 : vector<1xf32> to vector<1x1xf32>
    %833 = vector.broadcast %832 : vector<1x1xf32> to vector<1x64xf32>
    %834 = arith.subf %830, %833 : vector<1x64xf32>
    %835 = math.exp %834 : vector<1x64xf32>
    %cst_383 = arith.constant dense<0.000000e+00> : vector<1xf32>
    %836 = vector.multi_reduction <add>, %835, %cst_383 [1] : vector<1x64xf32> to vector<1xf32>
    %837 = vector.shape_cast %836 : vector<1xf32> to vector<1x1xf32>
    %cst_384 = arith.constant 1.000000e+00 : f32
    %838 = vector.broadcast %cst_384 : f32 to vector<1x1xf32>
    %839 = arith.divf %838, %837 : vector<1x1xf32>
    %840 = vector.broadcast %832 : vector<1x1xf32> to vector<1x64xf32>
    %841 = arith.cmpf oeq, %830, %840 : vector<1x64xf32>
    %c64_i32_385 = arith.constant 64 : i32
    %842 = vector.broadcast %c64_i32_385 : i32 to vector<1x64xi32>
    %843 = arith.select %841, %10, %842 : vector<1x64xi1>, vector<1x64xi32>
    %cst_386 = arith.constant dense<2147483647> : vector<1xi32>
    %844 = vector.multi_reduction <minsi>, %843, %cst_386 [1] : vector<1x64xi32> to vector<1xi32>
    %845 = vector.shape_cast %844 : vector<1xi32> to vector<1x1xi32>
    %846 = vector.broadcast %845 : vector<1x1xi32> to vector<1x64xi32>
    %847 = arith.cmpi eq, %10, %846 : vector<1x64xi32>
    %848 = arith.extui %847 : vector<1x64xi1> to vector<1x64xi32>
    %849 = arith.sitofp %848 : vector<1x64xi32> to vector<1x64xf32>
    %cst_387 = arith.constant dense<0.000000e+00> : vector<1x32xf32>
    %850 = tpu.matmul %849, %0, %cst_387 {dimension_numbers = #tpu.dot_dimension_numbers<[1], [0], [0], [1], [0, 0, 1, 1], [], []>} : vector<1x64xf32>, vector<64x32xf32>, vector<1x32xf32> -> vector<1x32xf32>
    %851 = vector.shape_cast %845 : vector<1x1xi32> to vector<1x1xi32>
    %852 = vector.broadcast %851 : vector<1x1xi32> to vector<1x128xi32>
    %c8 = arith.constant 8 : index
    %c0_388 = arith.constant 0 : index
    %853 = vector.load %arg16[%c8, %c0_388] : memref<10x128xi32, #tpu.memory_space<vmem>>, vector<1x128xi32>
    tpu.vector_store %arg16[%c8, %c0_388], %852 {strides = array<i32>} : memref<10x128xi32, #tpu.memory_space<vmem>>, vector<1x128xi32>,
    %854 = vector.shape_cast %839 : vector<1x1xf32> to vector<1x1xf32>
    %855 = vector.broadcast %854 : vector<1x1xf32> to vector<1x128xf32>
    %c8_389 = arith.constant 8 : index
    %c0_390 = arith.constant 0 : index
    %856 = vector.load %arg17[%c8_389, %c0_390] : memref<10x128xf32, #tpu.memory_space<vmem>>, vector<1x128xf32>
    tpu.vector_store %arg17[%c8_389, %c0_390], %855 {strides = array<i32>} : memref<10x128xf32, #tpu.memory_space<vmem>>, vector<1x128xf32>,
    %c0_391 = arith.constant 0 : index
    %c0_392 = arith.constant 0 : index
    %857 = vector.load %arg3[%c0_391, %c0_392] : memref<32x96xf32, #tpu.memory_space<vmem>>, vector<32x96xf32>
    %cst_393 = arith.constant dense<0.000000e+00> : vector<1x96xf32>
    %858 = tpu.matmul %850, %857, %cst_393 {dimension_numbers = #tpu.dot_dimension_numbers<[1], [0], [0], [1], [0, 0, 1, 1], [], []>} : vector<1x32xf32>, vector<32x96xf32>, vector<1x96xf32> -> vector<1x96xf32>
    %c0_394 = arith.constant 0 : index
    %c0_395 = arith.constant 0 : index
    %859 = vector.load %arg5[%c0_394, %c0_395] : memref<1x96xf32, #tpu.memory_space<vmem>>, vector<1x96xf32>
    %860 = arith.addf %858, %859 : vector<1x96xf32>
    %c0_396 = arith.constant 0 : index
    %c0_397 = arith.constant 0 : index
    %861 = vector.load %arg4[%c0_396, %c0_397] : memref<32x96xf32, #tpu.memory_space<vmem>>, vector<32x96xf32>
    %cst_398 = arith.constant dense<0.000000e+00> : vector<1x96xf32>
    %862 = tpu.matmul %796, %861, %cst_398 {dimension_numbers = #tpu.dot_dimension_numbers<[1], [0], [0], [1], [0, 0, 1, 1], [], []>} : vector<1x32xf32>, vector<32x96xf32>, vector<1x96xf32> -> vector<1x96xf32>
    %c0_399 = arith.constant 0 : index
    %c0_400 = arith.constant 0 : index
    %863 = vector.load %arg6[%c0_399, %c0_400] : memref<1x96xf32, #tpu.memory_space<vmem>>, vector<1x96xf32>
    %864 = arith.addf %862, %863 : vector<1x96xf32>
    %865 = vector.extract_strided_slice %860 {offsets = [0, 0], sizes = [1, 32], strides = [1, 1]} : vector<1x96xf32> to vector<1x32xf32>
    %866 = vector.extract_strided_slice %864 {offsets = [0, 0], sizes = [1, 32], strides = [1, 1]} : vector<1x96xf32> to vector<1x32xf32>
    %867 = arith.addf %865, %866 : vector<1x32xf32>
    %868 = arith.negf %867 : vector<1x32xf32>
    %869 = math.exp %868 : vector<1x32xf32>
    %cst_401 = arith.constant 1.000000e+00 : f32
    %870 = vector.broadcast %cst_401 : f32 to vector<1x32xf32>
    %871 = arith.addf %870, %869 : vector<1x32xf32>
    %872 = arith.divf %870, %871 : vector<1x32xf32>
    %873 = vector.extract_strided_slice %860 {offsets = [0, 32], sizes = [1, 32], strides = [1, 1]} : vector<1x96xf32> to vector<1x32xf32>
    %874 = vector.extract_strided_slice %864 {offsets = [0, 32], sizes = [1, 32], strides = [1, 1]} : vector<1x96xf32> to vector<1x32xf32>
    %875 = arith.addf %873, %874 : vector<1x32xf32>
    %876 = arith.negf %875 : vector<1x32xf32>
    %877 = math.exp %876 : vector<1x32xf32>
    %cst_402 = arith.constant 1.000000e+00 : f32
    %878 = vector.broadcast %cst_402 : f32 to vector<1x32xf32>
    %879 = arith.addf %878, %877 : vector<1x32xf32>
    %880 = arith.divf %878, %879 : vector<1x32xf32>
    %881 = vector.extract_strided_slice %860 {offsets = [0, 64], sizes = [1, 32], strides = [1, 1]} : vector<1x96xf32> to vector<1x32xf32>
    %882 = vector.extract_strided_slice %864 {offsets = [0, 64], sizes = [1, 32], strides = [1, 1]} : vector<1x96xf32> to vector<1x32xf32>
    %883 = arith.mulf %872, %882 : vector<1x32xf32>
    %884 = arith.addf %881, %883 : vector<1x32xf32>
    %885 = math.tanh %884 : vector<1x32xf32>
    %cst_403 = arith.constant 1.000000e+00 : f32
    %886 = vector.broadcast %cst_403 : f32 to vector<1x32xf32>
    %887 = arith.subf %886, %880 : vector<1x32xf32>
    %888 = arith.mulf %887, %885 : vector<1x32xf32>
    %889 = arith.mulf %880, %796 : vector<1x32xf32>
    %890 = arith.addf %888, %889 : vector<1x32xf32>
    %c0_404 = arith.constant 0 : index
    %c0_405 = arith.constant 0 : index
    %891 = vector.load %arg7[%c0_404, %c0_405] : memref<32x32xf32, #tpu.memory_space<vmem>>, vector<32x32xf32>
    %cst_406 = arith.constant dense<0.000000e+00> : vector<1x32xf32>
    %892 = tpu.matmul %890, %891, %cst_406 {dimension_numbers = #tpu.dot_dimension_numbers<[1], [0], [0], [1], [0, 0, 1, 1], [], []>} : vector<1x32xf32>, vector<32x32xf32>, vector<1x32xf32> -> vector<1x32xf32>
    %893 = vector.broadcast %892 : vector<1x32xf32> to vector<8x32xf32>
    %894 = arith.addf %893, %7 : vector<8x32xf32>
    %895 = math.tanh %894 : vector<8x32xf32>
    %896 = vector.broadcast %2 : vector<1x32xf32> to vector<8x32xf32>
    %897 = arith.mulf %896, %895 : vector<8x32xf32>
    %cst_407 = arith.constant dense<0.000000e+00> : vector<8xf32>
    %898 = vector.multi_reduction <add>, %897, %cst_407 [1] : vector<8x32xf32> to vector<8xf32>
    %899 = vector.shape_cast %898 : vector<8xf32> to vector<8x1xf32>
    %cst_408 = arith.constant dense<0xFF800000> : vector<1xf32>
    %900 = vector.multi_reduction <maximumf>, %899, %cst_408 [0] : vector<8x1xf32> to vector<1xf32>
    %901 = vector.shape_cast %900 : vector<1xf32> to vector<1x1xf32>
    %902 = vector.broadcast %901 : vector<1x1xf32> to vector<8x1xf32>
    %903 = arith.subf %899, %902 : vector<8x1xf32>
    %904 = math.exp %903 : vector<8x1xf32>
    %cst_409 = arith.constant dense<0.000000e+00> : vector<1xf32>
    %905 = vector.multi_reduction <add>, %904, %cst_409 [0] : vector<8x1xf32> to vector<1xf32>
    %906 = vector.shape_cast %905 : vector<1xf32> to vector<1x1xf32>
    %907 = vector.broadcast %906 : vector<1x1xf32> to vector<8x1xf32>
    %908 = arith.divf %904, %907 : vector<8x1xf32>
    %909 = vector.broadcast %908 : vector<8x1xf32> to vector<8x32xf32>
    %910 = arith.mulf %909, %1 : vector<8x32xf32>
    %cst_410 = arith.constant dense<0.000000e+00> : vector<32xf32>
    %911 = vector.multi_reduction <add>, %910, %cst_410 [0] : vector<8x32xf32> to vector<32xf32>
    %912 = vector.shape_cast %911 : vector<32xf32> to vector<1x32xf32>
    %c0_411 = arith.constant 0 : index
    %c0_412 = arith.constant 0 : index
    %913 = vector.load %arg11[%c0_411, %c0_412] : memref<32x32xf32, #tpu.memory_space<vmem>>, vector<32x32xf32>
    %cst_413 = arith.constant dense<0.000000e+00> : vector<1x32xf32>
    %914 = tpu.matmul %890, %913, %cst_413 {dimension_numbers = #tpu.dot_dimension_numbers<[1], [0], [0], [1], [0, 0, 1, 1], [], []>} : vector<1x32xf32>, vector<32x32xf32>, vector<1x32xf32> -> vector<1x32xf32>
    %c0_414 = arith.constant 0 : index
    %c0_415 = arith.constant 0 : index
    %915 = vector.load %arg12[%c0_414, %c0_415] : memref<32x32xf32, #tpu.memory_space<vmem>>, vector<32x32xf32>
    %cst_416 = arith.constant dense<0.000000e+00> : vector<1x32xf32>
    %916 = tpu.matmul %912, %915, %cst_416 {dimension_numbers = #tpu.dot_dimension_numbers<[1], [0], [0], [1], [0, 0, 1, 1], [], []>} : vector<1x32xf32>, vector<32x32xf32>, vector<1x32xf32> -> vector<1x32xf32>
    %917 = arith.addf %914, %916 : vector<1x32xf32>
    %c0_417 = arith.constant 0 : index
    %c0_418 = arith.constant 0 : index
    %918 = vector.load %arg13[%c0_417, %c0_418] : memref<1x32xf32, #tpu.memory_space<vmem>>, vector<1x32xf32>
    %919 = arith.addf %917, %918 : vector<1x32xf32>
    %920 = math.tanh %919 : vector<1x32xf32>
    %c0_419 = arith.constant 0 : index
    %c0_420 = arith.constant 0 : index
    %921 = vector.load %arg14[%c0_419, %c0_420] : memref<32x64xf32, #tpu.memory_space<vmem>>, vector<32x64xf32>
    %cst_421 = arith.constant dense<0.000000e+00> : vector<1x64xf32>
    %922 = tpu.matmul %920, %921, %cst_421 {dimension_numbers = #tpu.dot_dimension_numbers<[1], [0], [0], [1], [0, 0, 1, 1], [], []>} : vector<1x32xf32>, vector<32x64xf32>, vector<1x64xf32> -> vector<1x64xf32>
    %c0_422 = arith.constant 0 : index
    %c0_423 = arith.constant 0 : index
    %923 = vector.load %arg15[%c0_422, %c0_423] : memref<1x64xf32, #tpu.memory_space<vmem>>, vector<1x64xf32>
    %924 = arith.addf %922, %923 : vector<1x64xf32>
    %cst_424 = arith.constant dense<0xFF800000> : vector<1xf32>
    %925 = vector.multi_reduction <maximumf>, %924, %cst_424 [1] : vector<1x64xf32> to vector<1xf32>
    %926 = vector.shape_cast %925 : vector<1xf32> to vector<1x1xf32>
    %927 = vector.broadcast %926 : vector<1x1xf32> to vector<1x64xf32>
    %928 = arith.subf %924, %927 : vector<1x64xf32>
    %929 = math.exp %928 : vector<1x64xf32>
    %cst_425 = arith.constant dense<0.000000e+00> : vector<1xf32>
    %930 = vector.multi_reduction <add>, %929, %cst_425 [1] : vector<1x64xf32> to vector<1xf32>
    %931 = vector.shape_cast %930 : vector<1xf32> to vector<1x1xf32>
    %cst_426 = arith.constant 1.000000e+00 : f32
    %932 = vector.broadcast %cst_426 : f32 to vector<1x1xf32>
    %933 = arith.divf %932, %931 : vector<1x1xf32>
    %934 = vector.broadcast %926 : vector<1x1xf32> to vector<1x64xf32>
    %935 = arith.cmpf oeq, %924, %934 : vector<1x64xf32>
    %c64_i32_427 = arith.constant 64 : i32
    %936 = vector.broadcast %c64_i32_427 : i32 to vector<1x64xi32>
    %937 = arith.select %935, %10, %936 : vector<1x64xi1>, vector<1x64xi32>
    %cst_428 = arith.constant dense<2147483647> : vector<1xi32>
    %938 = vector.multi_reduction <minsi>, %937, %cst_428 [1] : vector<1x64xi32> to vector<1xi32>
    %939 = vector.shape_cast %938 : vector<1xi32> to vector<1x1xi32>
    %940 = vector.shape_cast %939 : vector<1x1xi32> to vector<1x1xi32>
    %941 = vector.broadcast %940 : vector<1x1xi32> to vector<1x128xi32>
    %c9 = arith.constant 9 : index
    %c0_429 = arith.constant 0 : index
    %942 = vector.load %arg16[%c9, %c0_429] : memref<10x128xi32, #tpu.memory_space<vmem>>, vector<1x128xi32>
    tpu.vector_store %arg16[%c9, %c0_429], %941 {strides = array<i32>} : memref<10x128xi32, #tpu.memory_space<vmem>>, vector<1x128xi32>,
    %943 = vector.shape_cast %933 : vector<1x1xf32> to vector<1x1xf32>
    %944 = vector.broadcast %943 : vector<1x1xf32> to vector<1x128xf32>
    %c9_430 = arith.constant 9 : index
    %c0_431 = arith.constant 0 : index
    %945 = vector.load %arg17[%c9_430, %c0_431] : memref<10x128xf32, #tpu.memory_space<vmem>>, vector<1x128xf32>
    tpu.vector_store %arg17[%c9_430, %c0_431], %944 {strides = array<i32>} : memref<10x128xf32, #tpu.memory_space<vmem>>, vector<1x128xf32>,
    return
  }
}

</mosaic_0001>

<bundles_post_ra>
// kernel: tpu_custom_call.1
= control target key start
LH: loop header
LB: loop body
LE: loop exit
PB: predicated region body
PF: predicated region fallthrough
CT: control target
= control target key end

     0   :  { %s10193_s0 = inlined_call_operand.vmem [shape: f32[64,32], index: 0, kind: input, shape index: {}]   ;;  %s10194_s1 = inlined_call_operand.hbm [shape: f32[8,32], index: 1, kind: input, shape index: {}]   ;;  %s10195_s2 = inlined_call_operand.vmem [shape: f32[1,32], index: 2, kind: input, shape index: {}]   ;;  %s10196_s3 = inlined_call_operand.vmem [shape: f32[32,96], index: 3, kind: input, shape index: {}]   ;;  %s10197_s4 = inlined_call_operand.vmem [shape: f32[32,96], index: 4, kind: input, shape index: {}]   ;;  %s10198_s5 = inlined_call_operand.vmem [shape: f32[1,96], index: 5, kind: input, shape index: {}]   ;;  %s10199_s6 = inlined_call_operand.hbm [shape: f32[1,96], index: 6, kind: input, shape index: {}]   ;;  %s10200_s7 = inlined_call_operand.vmem [shape: f32[32,32], index: 7, kind: input, shape index: {}]   ;;  %s10201_s8 = inlined_call_operand.hbm [shape: f32[32,32], index: 8, kind: input, shape index: {}]   ;;  %s10202_s9 = inlined_call_operand.hbm [shape: f32[1,32], index: 9, kind: input, shape index: {}]   ;;  %s10203_s10 = inlined_call_operand.vmem [shape: f32[1,32], index: 10, kind: input, shape index: {}]   ;;  %s10204_s11 = inlined_call_operand.vmem [shape: f32[32,32], index: 11, kind: input, shape index: {}]   ;;  %s10205_s12 = inlined_call_operand.hbm [shape: f32[32,32], index: 12, kind: input, shape index: {}]   ;;  %s10206_s13 = inlined_call_operand.vmem [shape: f32[1,32], index: 13, kind: input, shape index: {}]   ;;  %s10207_s14 = inlined_call_operand.hbm [shape: f32[32,64], index: 14, kind: input, shape index: {}]   ;;  %s10208_s15 = inlined_call_operand.vmem [shape: f32[1,64], index: 15, kind: input, shape index: {}]   ;;  %s10209_s16 = inlined_call_operand.hbm [shape: s32[10,128], index: 16, kind: output, shape index: {0}]   ;;  %s10210_s17 = inlined_call_operand.hbm [shape: f32[10,128], index: 17, kind: output, shape index: {1}]  }
   0x1   :  { %10213 = sst [smem:[#allocation22_spill]] %s10193_s0 }
   0x2   :  { %10214 = sst [smem:[#allocation23_spill]] %s10194_s1 }
   0x3   :  { %23 = vsyncpa [#allocation3], 0 }
   0x4   :  { %24 = vsyncpa [#allocation6], 0 }
   0x5   :  { %25 = vsyncpa [#allocation9], 0 }
   0x6   :  { %26 = vsyncpa [#allocation12], 0 }
   0x7   :  { %27 = vsyncpa [#allocation4], 0 }
   0x8   :  { %28 = vsyncpa [#allocation15], 0  ;;  %s8701_s24 = smov [#allocation5]   ;;  %s8702_s26 = smov [#allocation8]  }
   0x9   :  { %s55_s25 = sshll.u32 %s8701_s24, 4  ;;  %s79_s27 = sshll.u32 %s8702_s26, 4  ;;  %s56_s25 = int_to_ptr.vmem [resolvable:$true] %s55_s25  ;;  %s80_s27 = int_to_ptr.vmem [resolvable:$true] %s79_s27 }
   0xa   :  { %s8513_s0 = scalar_lea.hbm %s10199_s6, 16 }
   0xb   :  { %p8514_p0 = scmp.ne.s32.totalorder %s10199_s6, %s8513_s0  ;;  %p8517_p1 = scmp.lt.u32.totalorder %s8513_s0, %s10199_s6 }
   0xd   :  { %p8519_p2 = pnand %p8517_p1, %p8514_p0 }
   0xf   :  { %8522 = shalt.err (!%p8519_p2)
}
  0x10   :  { %s8523_s20 = scalar_lea.vmem %s56_s25, 16  ;;  %s8527_s21 = scalar_lea.vmem %s56_s25, 32 }
  0x11   :  { %p8524_p3 = scmp.ne.s32.totalorder %s56_s25, %s8523_s20  ;;  %p8528_p4 = scmp.lt.s32.totalorder %s56_s25, %s56_s25 }
  0x12   :  { %p8529_p5 = scmp.lt.s32.totalorder %s8527_s21, %s8523_s20 }
  0x14   :  { %p8530_p6 = por %p8529_p5, %p8528_p4 }
  0x16   :  { %p8531_p7 = pnand %p8530_p6, %p8524_p3 }
  0x18   :  { %8534 = shalt.err (!%p8531_p7)
}
  0x19   :  { %58 = dma.hbm_to_vmem [thread:$0]  %s10199_s6, 16, %s56_s25, [#allocation6]  }
  0x1a   :  { %s8535_s28 = scalar_lea.hbm %s10202_s9, 16 }
  0x1b   :  { %p8536_p8 = scmp.ne.s32.totalorder %s10202_s9, %s8535_s28  ;;  %p8539_p9 = scmp.lt.u32.totalorder %s8535_s28, %s10202_s9 }
  0x1d   :  { %p8541_p10 = pnand %p8539_p9, %p8536_p8 }
  0x1f   :  { %8544 = shalt.err (!%p8541_p10)
}
  0x20   :  { %s8545_s19 = scalar_lea.vmem %s80_s27, 16  ;;  %s8549_s1 = scalar_lea.vmem %s80_s27, 32 }
  0x21   :  { %p8546_p11 = scmp.ne.s32.totalorder %s80_s27, %s8545_s19  ;;  %p8550_p12 = scmp.lt.s32.totalorder %s80_s27, %s80_s27 }
  0x22   :  { %p8551_p13 = scmp.lt.s32.totalorder %s8549_s1, %s8545_s19 }
  0x24   :  { %p8552_p0 = por %p8551_p13, %p8550_p12 }
  0x26   :  { %p8553_p1 = pnand %p8552_p0, %p8546_p11 }
  0x28   :  { %8556 = shalt.err (!%p8553_p1)
}
  0x29   :  { %82 = dma.hbm_to_vmem [thread:$0]  %s10202_s9, 16, %s80_s27, [#allocation9]  }
  0x2a   :  { %s8703_s20 = smov [#allocation2]   ;;  %s8704_s22 = smov [#allocation7]  }
  0x2b   :  { %s37_s21 = sshll.u32 %s8703_s20, 4  ;;  %s66_s23 = sshll.u32 %s8704_s22, 4  ;;  %s38_s21 = int_to_ptr.vmem [resolvable:$true] %s37_s21  ;;  %s8831_s23 = int_to_ptr.vmem [resolvable:$true] %s66_s23 }
  0x2c   :  { %s10215_s28 = sld [smem:[#allocation23_spill]] }
  0x32   :  { %s8557_s29 = scalar_lea.hbm %s10215_s28, 128 }
  0x33   :  { %p8558_p2 = scmp.ne.s32.totalorder %s10215_s28, %s8557_s29  ;;  %p8561_p3 = scmp.lt.u32.totalorder %s8557_s29, %s10215_s28 }
  0x35   :  { %p8563_p4 = pnand %p8561_p3, %p8558_p2 }
  0x37   :  { %8566 = shalt.err (!%p8563_p4)
}
  0x38   :  { %s8567_s9 = scalar_lea.vmem %s38_s21, 128  ;;  %p8572_p6 = scmp.lt.s32.totalorder %s38_s21, %s38_s21 }
  0x39   :  { %p8568_p5 = scmp.ne.s32.totalorder %s38_s21, %s8567_s9  ;;  %p8573_p7 = scmp.lt.s32.totalorder %s8567_s9, %s8567_s9 }
  0x3b   :  { %p8574_p8 = por %p8573_p7, %p8572_p6 }
  0x3d   :  { %p8575_p9 = pnand %p8574_p8, %p8568_p5 }
  0x3f   :  { %8578 = shalt.err (!%p8575_p9)
}
  0x40   :  { %40 = dma.hbm_to_vmem [thread:$0]  %s10215_s28, 128, %s38_s21, [#allocation3]  }
  0x41   :  { %s8579_s20 = scalar_lea.hbm %s10201_s8, 512 }
  0x42   :  { %p8580_p10 = scmp.ne.s32.totalorder %s10201_s8, %s8579_s20  ;;  %p8583_p11 = scmp.lt.u32.totalorder %s8579_s20, %s10201_s8 }
  0x44   :  { %p8585_p12 = pnand %p8583_p11, %p8580_p10 }
  0x46   :  { %8588 = shalt.err (!%p8585_p12)
}
  0x47   :  { %s8589_s0 = scalar_lea.vmem %s8831_s23, 512  ;;  %p8594_p0 = scmp.lt.s32.totalorder %s8831_s23, %s8831_s23 }
  0x48   :  { %p8590_p13 = scmp.ne.s32.totalorder %s8831_s23, %s8589_s0  ;;  %p8595_p1 = scmp.lt.s32.totalorder %s8589_s0, %s8589_s0 }
  0x4a   :  { %p8596_p2 = por %p8595_p1, %p8594_p0 }
  0x4c   :  { %p8597_p3 = pnand %p8596_p2, %p8590_p13 }
  0x4e   :  { %8600 = shalt.err (!%p8597_p3)
}
  0x4f   :  { %s8705_s21 = smov 128   ;;  %s8706_s28 = smov 8  }
  0x50   :  { %72 = dma.hbm_to_vmem [thread:$0]  %s10201_s8, 512, %s8831_s23, [#allocation6], %s8705_s21, %s8705_s21, %s8706_s28  }
  0x51   :  { %s8707_s19 = smov [#allocation10]   ;;  %s8708_s27 = smov [#allocation11]  }
  0x52   :  { %s92_s9 = sshll.u32 %s8707_s19, 4  ;;  %s106_s1 = sshll.u32 %s8708_s27, 4  ;;  %s93_s9 = int_to_ptr.vmem [resolvable:$true] %s92_s9  ;;  %s8865_s1 = int_to_ptr.vmem [resolvable:$true] %s106_s1 }
  0x53   :  { %s8601_s20 = scalar_lea.hbm %s10205_s12, 512 }
  0x54   :  { %p8602_p4 = scmp.ne.s32.totalorder %s10205_s12, %s8601_s20  ;;  %p8605_p5 = scmp.lt.u32.totalorder %s8601_s20, %s10205_s12 }
  0x56   :  { %p8607_p6 = pnand %p8605_p5, %p8602_p4 }
  0x58   :  { %8610 = shalt.err (!%p8607_p6)
}
  0x59   :  { %s8611_s8 = scalar_lea.vmem %s93_s9, 512  ;;  %p8616_p8 = scmp.lt.s32.totalorder %s93_s9, %s93_s9 }
  0x5a   :  { %p8612_p7 = scmp.ne.s32.totalorder %s93_s9, %s8611_s8  ;;  %p8617_p9 = scmp.lt.s32.totalorder %s8611_s8, %s8611_s8 }
  0x5c   :  { %p8618_p10 = por %p8617_p9, %p8616_p8 }
  0x5e   :  { %p8619_p11 = pnand %p8618_p10, %p8612_p7 }
  0x60   :  { %8622 = shalt.err (!%p8619_p11)
}
  0x61   :  { %98 = dma.hbm_to_vmem [thread:$0]  %s10205_s12, 512, %s93_s9, [#allocation9], %s8705_s21, %s8705_s21, %s8706_s28  }
  0x62   :  { %s8623_s19 = scalar_lea.hbm %s10207_s14, 512 }
  0x63   :  { %p8624_p12 = scmp.ne.s32.totalorder %s10207_s14, %s8623_s19  ;;  %p8627_p13 = scmp.lt.u32.totalorder %s8623_s19, %s10207_s14 }
  0x65   :  { %p8629_p0 = pnand %p8627_p13, %p8624_p12 }
  0x67   :  { %8632 = shalt.err (!%p8629_p0)
}
  0x68   :  { %s8633_s22 = scalar_lea.vmem %s8865_s1, 512  ;;  %p8638_p2 = scmp.lt.s32.totalorder %s8865_s1, %s8865_s1 }
  0x69   :  { %p8634_p1 = scmp.ne.s32.totalorder %s8865_s1, %s8633_s22  ;;  %p8639_p3 = scmp.lt.s32.totalorder %s8633_s22, %s8633_s22 }
  0x6b   :  { %p8640_p4 = por %p8639_p3, %p8638_p2 }
  0x6d   :  { %p8641_p5 = pnand %p8640_p4, %p8634_p1 }
  0x6f   :  { %8644 = shalt.err (!%p8641_p5)
}
  0x70   :  { %112 = dma.hbm_to_vmem [thread:$0]  %s10207_s14, 512, %s8865_s1, [#allocation12], %s8705_s21, %s8705_s21, %s8706_s28  }
  0x71   :  { %8689 = dma.done.wait [#allocation3], 128  }
  0x72   :  { %8690 = vsyncadd [#allocation3], 4294967168 }
  0x73   :  { %8691 = dma.done.wait [#allocation6], 528  }
  0x74   :  { %8692 = vsyncadd [#allocation6], 4294966768 }
  0x75   :  { %8693 = dma.done.wait [#allocation9], 528  }
  0x76   :  { %8694 = vsyncadd [#allocation9], 4294966768 }
  0x77   :  { %8695 = dma.done.wait [#allocation12], 512  }
  0x78   :  { %8696 = vsyncadd [#allocation12], 4294966784  ;;  %v8709_v0 = vmov 0.0|0.0   ;;  %vm8710_vm0 = vmmov 0   ;;  %v8711_v1 = vmov 0.0   ;;  %v143_v2 = vld [vmem:[#allocation7] sm:$0xff]  ;;  %v230_v42 = vlaneseq }
  0x79   :  { %7839 = vmatprep.subr.bf16.mxu0 %v8709_v0  ;;  %7005 = vmatprep.mubr.msk.f32.mxu0 %vm8710_vm0, %v8711_v1  ;;  %v144_v3 = vld [vmem:[#allocation7 + $0x8] sm:$0xff]  ;;  %v145_v4 = vld [vmem:[#allocation7 + $0x10] sm:$0xff]  ;;  %v146_v6 = vld [vmem:[#allocation7 + $0x18] sm:$0xff]  ;;  %vm154_vm1 = vcmask 261120   ;;  %s10216_s14 = sld [smem:[#allocation22_spill]]  ;;  %s8712_s26 = smov 64  }
  0x7a   :  { %7845 = vmatprep.subr.bf16.mxu1 %v8709_v0  ;;  %7016 = vmatprep.mubr.msk.f32.mxu1 %vm8710_vm0, %v8711_v1  ;;  %v7840_v5 = vpack.c.bf16 %v144_v3, %v143_v2  ;;  %v232_v7 = vld [vmem:[%s10196_s3] sm:$0xff]  ;;  %v233_v8 = vld [vmem:[%s10196_s3 + $0x8] sm:$0xff]  ;;  %v7843_v9 = vpack.c.bf16 %v146_v6, %v145_v4  ;;  %v234_v11 = vld [vmem:[%s10196_s3 + $0x10] sm:$0xff]  ;;  %v413_v43 = vshrl.u32 %v230_v42, 7  ;;  %s8713_s25 = smov 96   ;;  %s8714_s20 = smov 32  }
  0x7b   :  { %v8914_v10 = vpack.c.bf16 %v233_v8, %v232_v7  ;;  %v235_v12 = vld [vmem:[%s10196_s3 + $0x18] sm:$0xff]  ;;  %v310_v13 = vld [vmem:[%s10197_s4] sm:$0xff]  ;;  %v311_v14 = vld [vmem:[%s10197_s4 + $0x8] sm:$0xff]  ;;  %vm773_vm2 = vcmask 516096   ;;  %vm805_vm5 = vcmask 523264  }
  0x7c   :  { %7841 = vmatpush3.bf16.msra.mxu0 %v7840_v5  ;;  %v8930_v15 = vpack.c.bf16 %v235_v12, %v234_v11  ;;  %v8933_v16 = vld [vmem:[#allocation2] sm:$0xff]  ;;  %v8935_v17 = vpack.c.bf16 %v311_v14, %v310_v13  ;;  %v312_v18 = vld [vmem:[%s10197_s4 + $0x10] sm:$0xff]  ;;  %v313_v19 = vld [vmem:[%s10197_s4 + $0x18] sm:$0xff]  ;;  %v8985_v47 = vsub.s32 0, %v413_v43 }
  0x7d   :  { %7842 = vmatprep.subr.bf16.mxu0 %v8709_v0  ;;  %7847 = vmatpush3.bf16.msra.mxu1 %v8914_v10  ;;  %v8952_v21 = vpack.c.bf16 %v313_v19, %v312_v18  ;;  %v229_v22 = vld [vmem:[%s10195_s2] sm:$0x1]  ;;  %v314_v27 = vld [vmem:[#allocation5] sm:$0x1]  ;;  %v423_v46 = vld [vmem:[%s10200_s7 + $0x10] sm:$0xff] }
  0x7e   :  { %7848 = vmatprep.subr.bf16.mxu1 %v8709_v0  ;;  %v236_v31 = vld [vmem:[%s10198_s5] sm:$0x1]  ;;  %v422_v45 = vld [vmem:[%s10200_s7 + $0x8] sm:$0xff]  ;;  %v424_v49 = vld [vmem:[%s10200_s7 + $0x18] sm:$0xff]  ;;  %v415_v52 = vrot.slane %v229_v22, %v8985_v47 }
  0x7f   :  { %v228_v20 = vld [vmem:[%s10216_s14 + $0x1] sm:$0x1]  ;;  %v8993_v50 = vpack.c.bf16 %v424_v49, %v423_v46  ;;  %v542_v60 = vld [vmem:[%s10204_s11 + $0x8] sm:$0xff]  ;;  %v543_v62 = vld [vmem:[%s10204_s11 + $0x10] sm:$0xff] }
  0x80   :  { %7844 = vmatpush3.bf16.msra.mxu0 %v7843_v9  ;;  %v421_v44 = vld [vmem:[%s10200_s7] sm:$0xff]  ;;  %v544_v63 = vld [vmem:[%s10204_s11 + $0x18] sm:$0xff]  ;;  %v6520_v4 = vld [vmem:[#allocation8] ss:$0 sm:$0xff] }
  0x81   :  { %7851 = vmatprep.subr.bf16.mxu0 %v8709_v0  ;;  %7850 = vmatpush3.bf16.msra.mxu1 %v8930_v15  ;;  %v8987_v48 = vpack.c.bf16 %v422_v45, %v421_v44  ;;  %v541_v59 = vld [vmem:[%s10204_s11] sm:$0xff]  ;;  %v9023_v3 = vpack.c.bf16 %v544_v63, %v543_v62 }
  0x82   :  { %7857 = vmatprep.subr.bf16.mxu1 %v8709_v0  ;;  %v9010_v61 = vpack.c.bf16 %v542_v60, %v541_v59  ;;  %v9042_v13 = vld [vmem:[%s10203_s10] ss:$0 sm:$0xff]  ;;  %v696_v59 = vld [vmem:[#allocation11 + $0x8] sm:$0xff]  ;;  %v698_v63 = vld [vmem:[#allocation11 + $0x18] sm:$0xff] }
  0x83   :  { %7006 = vmatmul.mubr.msk.f32.vlgmr.msra.gmra.mrb[0].mxu0 %vm154_vm1, %v8933_v16  ;;  %v697_v60 = vld [vmem:[#allocation11 + $0x10] sm:$0xff] }
  0x84   :  { %7853 = vmatpush3.bf16.msra.mxu0 %v8935_v17  ;;  %7027 = vmatprep.mubr.msk.f32.mxu0 %vm8710_vm0, %v8711_v1 }
  0x85   :  { %7854 = vmatprep.subr.bf16.mxu0 %v8709_v0  ;;  %7017 = vmatmul.mubr.msk.f32.vlgmr.msra.gmra.mrb[0].mxu1 %vm154_vm1, %v228_v20  ;;  %v545_v20 = vld [vmem:[#allocation10] sm:$0xff] }
  0x86   :  { %7038 = vmatprep.mubr.msk.f32.mxu1 %vm8710_vm0, %v8711_v1  ;;  %7859 = vmatpush3.bf16.msra.mxu1 %v8987_v48 }
  0x87   :  { %7860 = vmatprep.subr.bf16.mxu1 %v8709_v0 }
  0x88   :  { %7856 = vmatpush3.bf16.msra.mxu0 %v8952_v21 }
  0x89   :  { %7863 = vmatprep.subr.bf16.mxu0 %v8709_v0 }
  0x8a   :  { %7862 = vmatpush3.bf16.msra.mxu1 %v8993_v50 }
  0x8b   :  { %7028 = vmatmul.mubr.msk.f32.vlgmr.msra.gmra.mrb[2].mxu0 %vm154_vm1, %v229_v22  ;;  %7869 = vmatprep.subr.bf16.mxu1 %v8709_v0  ;;  %v546_v22 = vld [vmem:[#allocation10 + $0x8] sm:$0xff] }
  0x8c   :  { %7049 = vmatprep.mubr.msk.f32.mxu0 %vm8710_vm0, %v8711_v1 }
 0x156   :  { %v8968_v23 = vpop.f32.mrb[0].mxu0 }
 0x157   :  { %v7007_v24 = vpop.f32.mrb[1].mxu0  ;;  %v9035_v6 = vadd.f32 %v6520_v4, %v8968_v23  ;;  %v547_v23 = vld [vmem:[#allocation10 + $0x10] sm:$0xff]  ;;  %v9062_v4 = vpack.c.bf16 %v698_v63, %v697_v60  ;;  %v963_v63 = vld [vmem:[#allocation5] sm:$0x1] }
 0x158   :  { %v306_v25 = vpop.f32.mrb[0].mxu1  ;;  %v9046_v24 = vpack.c.bf16 %v546_v22, %v545_v20 }
 0x159   :  { %v7018_v26 = vpop.f32.mrb[1].mxu1  ;;  %v307_v32 = vadd.f32 %v306_v25, %v236_v31  ;;  %v548_v25 = vld [vmem:[#allocation10 + $0x18] sm:$0xff] }
 0x15a   :  { %7865 = vmatpush3.bf16.msra.mxu0 %v9046_v24  ;;  %v9049_v26 = vpack.c.bf16 %v548_v25, %v547_v23  ;;  %v9085_v23 = vand.u32 127, %v230_v42  ;;  %v134_v42 = vld [vmem:[%s10216_s14 + $0x8] sm:$0xff] }
 0x15b   :  { %7866 = vmatprep.subr.bf16.mxu0 %v8709_v0 }
 0x15e   :  { %v384_v28 = vpop.f32.mrb[2].mxu0  ;;  %7868 = vmatpush3.bf16.msra.mxu0 %v9049_v26 }
 0x15f   :  { %v385_v29 = vadd.f32 %v384_v28, %v314_v27  ;;  %v7029_v30 = vpop.f32.mrb[3].mxu0  ;;  %7875 = vmatprep.subr.bf16.mxu0 %v8709_v0 }
 0x161   :  { %396 = vrot.lane.b32.xlu0 %v385_v29, %s8712_s26  ;;  %v388_v33 = vadd.f32 %v385_v29, %v307_v32 }
 0x163   :  { %v6524_v34 = vmul.f32 -1.442695, %v388_v33 }
 0x165   :  { %8329 = vpow2.f32 %v6524_v34 }
 0x16f   :  { %v8330_v35 = vpop.eup %8329 }
 0x170   :  { %v392_v36 = vadd.f32 1.0, %v8330_v35 }
 0x172   :  { %8331 = vrcp.f32 %v392_v36 }
 0x17c   :  { %v8332_v37 = vpop.eup %8331 }
 0x17d   :  { %v406_v54 = vsub.f32 1.0, %v8332_v37 }
 0x1d3   :  { %v397_v38 = vpop.permute.xlu0 %396 }
 0x1d4   :  { %v399_v39 = vmul.f32 %v8332_v37, %v397_v38 }
 0x1d6   :  { %401 = vrot.lane.b32.xlu0 %v399_v39, %s8712_s26 }
 0x248   :  { %v402_v40 = vpop.permute.xlu0 %401 }
 0x249   :  { %v404_v41 = vadd.f32 %v402_v40, %v307_v32 }
 0x24b   :  { %8333 = vtanh.f32 %v404_v41 }
 0x255   :  { %v8334_v51 = vpop.eup %8333 }
 0x256   :  { %408 = vrot.lane.b32.xlu1 %v8334_v51, %s8713_s25 }
 0x25a   :  { %416 = vrot.lane.b32.xlu1 %v415_v52, %s8714_s20 }
 0x2c8   :  { %v409_v53 = vpop.permute.xlu1 %408 }
 0x2c9   :  { %v411_v56 = vmul.f32 %v409_v53, %v406_v54 }
 0x2cc   :  { %v417_v55 = vpop.permute.xlu1 %416 }
 0x2cd   :  { %v419_v57 = vmul.f32 %v8332_v37, %v417_v55 }
 0x2cf   :  { %v9000_v58 = vadd.f32 %v419_v57, %v411_v56  ;;  %v695_v57 = vld [vmem:[#allocation11] sm:$0xff] }
 0x2d0   :  { %v9059_v62 = vpack.c.bf16 %v696_v59, %v695_v57 }
 0x2d1   :  { %426 = vrot.lane.b32.xlu0 %v9000_v58, %s8713_s25 }
 0x343   :  { %v9018_v2 = vpop.permute.xlu0 %426 }
 0x344   :  { %7039 = vmatmul.mubr.msk.f32.vlgmr.msra.gmra.mrb[2].mxu1 %vm154_vm1, %v9018_v2 }
 0x345   :  { %7871 = vmatpush3.bf16.msra.mxu1 %v9010_v61  ;;  %7060 = vmatprep.mubr.msk.f32.mxu1 %vm8710_vm0, %v8711_v1 }
 0x346   :  { %7872 = vmatprep.subr.bf16.mxu1 %v8709_v0 }
 0x349   :  { %7874 = vmatpush3.bf16.msra.mxu1 %v9023_v3 }
 0x34a   :  { %7881 = vmatprep.subr.bf16.mxu1 %v8709_v0 }
 0x34c   :  { %7061 = vmatmul.mubr.msk.f32.vlgmr.msra.gmra.mrb[4].mxu1 %vm154_vm1, %v9018_v2 }
 0x34d   :  { %7090 = vmatprep.mubr.msk.f32.mxu1 %vm8710_vm0, %v8711_v1 }
 0x417   :  { %v496_v5 = vpop.f32.mrb[2].mxu1 }
 0x418   :  { %v503_v7 = vrot.slane %v496_v5, %v8985_v47  ;;  %v7040_v8 = vpop.f32.mrb[3].mxu1 }
 0x41a   :  { %v504_v9 = vadd.f32 %v503_v7, %v9035_v6  ;;  %v692_v7 = vld [vmem:[%s10206_s13] sm:$0x1] }
 0x41c   :  { %8335 = vtanh.f32 %v504_v9 }
 0x41f   :  { %v688_v11 = vpop.f32.mrb[4].mxu1 }
 0x420   :  { %v7062_v12 = vpop.f32.mrb[5].mxu1 }
 0x426   :  { %v8336_v14 = vpop.eup %8335 }
 0x427   :  { %v512_v18 = vmul.f32 %v8336_v14, %v9042_v13 }
 0x429   :  { %v513_v19 = vsel %vm154_vm1, %v512_v18, 0.0 }
 0x42a   :  { %514 = vadd.xlane.f32.xlu1 %v513_v19 }
 0x4b7   :  { %v515_v27 = vpop.xlane.xlu1 %514 }
 0x4b8   :  { %v516_v28 = vrot.slane %v515_v27, 4 }
 0x4ba   :  { %v517_v29 = vmax.f32 %v515_v27, %v516_v28 }
 0x4bc   :  { %v518_v30 = vrot.slane %v517_v29, 2 }
 0x4be   :  { %v519_v31 = vmax.f32 %v517_v29, %v518_v30 }
 0x4c0   :  { %v520_v32 = vrot.slane %v519_v31, 1 }
 0x4c2   :  { %v521_v33 = vmax.f32 %v519_v31, %v520_v32  ;;  %v133_v31 = vld [vmem:[%s10216_s14] sm:$0xff]  ;;  %v135_v32 = vld [vmem:[%s10216_s14 + $0x10] sm:$0xff] }
 0x4c4   :  { %v522_v34 = vsub.f32 %v515_v27, %v521_v33  ;;  %v9102_v33 = vpack.c.bf16 %v134_v42, %v133_v31 }
 0x4c6   :  { %v523_v35 = vmul.f32 1.442695, %v522_v34  ;;  %v136_v34 = vld [vmem:[%s10216_s14 + $0x18] sm:$0xff]  ;;  %7883 = vmatpush3.bf16.msra.mxu1 %v9102_v33 }
 0x4c7   :  { %7884 = vmatprep.subr.bf16.mxu1 %v8709_v0 }
 0x4c8   :  { %8337 = vpow2.f32 %v523_v35  ;;  %v9108_v35 = vpack.c.bf16 %v136_v34, %v135_v32 }
 0x4ca   :  { %7886 = vmatpush3.bf16.msra.mxu1 %v9108_v35 }
 0x4cb   :  { %7887 = vmatprep.subr.bf16.mxu1 %v8709_v0 }
 0x4d2   :  { %v8338_v36 = vpop.eup %8337 }
 0x4d3   :  { %v525_v37 = vrot.slane %v8338_v36, 4 }
 0x4d5   :  { %v526_v38 = vadd.f32 %v8338_v36, %v525_v37 }
 0x4d7   :  { %v527_v39 = vrot.slane %v526_v38, 2 }
 0x4d9   :  { %v528_v40 = vadd.f32 %v527_v39, %v526_v38 }
 0x4db   :  { %v529_v41 = vrot.slane %v528_v40, 1 }
 0x4dd   :  { %v530_v43 = vadd.f32 %v529_v41, %v528_v40  ;;  %v137_v40 = vld [vmem:[%s10216_s14 + $0x20] sm:$0xff]  ;;  %v138_v41 = vld [vmem:[%s10216_s14 + $0x28] sm:$0xff] }
 0x4df   :  { %8339 = vrcp.f32 %v530_v43  ;;  %v9119_v43 = vpack.c.bf16 %v138_v41, %v137_v40 }
 0x4e1   :  { %7889 = vmatpush3.bf16.msra.mxu1 %v9119_v43 }
 0x4e2   :  { %7890 = vmatprep.subr.bf16.mxu1 %v8709_v0 }
 0x4e9   :  { %v8340_v44 = vpop.eup %8339 }
 0x4ea   :  { %v532_v45 = vmul.f32 %v8340_v44, %v8338_v36  ;;  %v139_v44 = vld [vmem:[%s10216_s14 + $0x30] sm:$0xff] }
 0x4ec   :  { %v533_v46 = vmul.f32 %v532_v45, %v8933_v16  ;;  %v140_v45 = vld [vmem:[%s10216_s14 + $0x38] sm:$0xff] }
 0x4ee   :  { %v534_v49 = vsel %vm154_vm1, %v533_v46, 0.0  ;;  %v9129_v46 = vpack.c.bf16 %v140_v45, %v139_v44 }
 0x4ef   :  { %v535_v51 = vrot.slane %v534_v49, 4 }
 0x4f0   :  { %7892 = vmatpush3.bf16.msra.mxu1 %v9129_v46 }
 0x4f1   :  { %v536_v52 = vadd.f32 %v535_v51, %v534_v49  ;;  %7905 = vmatprep.subr.bf16.mxu1 %v8709_v0 }
 0x4f3   :  { %v537_v53 = vrot.slane %v536_v52, 2 }
 0x4f5   :  { %v538_v54 = vadd.f32 %v537_v53, %v536_v52 }
 0x4f7   :  { %v539_v55 = vrot.slane %v538_v54, 1 }
 0x4f9   :  { %v540_v56 = vadd.f32 %v539_v55, %v538_v54 }
 0x4fb   :  { %7050 = vmatmul.mubr.msk.f32.vlgmr.msra.gmra.mrb[4].mxu0 %vm154_vm1, %v540_v56 }
 0x4fc   :  { %7071 = vmatprep.mubr.msk.f32.mxu0 %vm8710_vm0, %v8711_v1  ;;  %7877 = vmatpush3.bf16.msra.mxu0 %v9059_v62 }
 0x4fd   :  { %7878 = vmatprep.subr.bf16.mxu0 %v8709_v0 }
 0x500   :  { %7880 = vmatpush3.bf16.msra.mxu0 %v9062_v4 }
 0x501   :  { %7893 = vmatprep.subr.bf16.mxu0 %v8709_v0 }
 0x5ce   :  { %v618_v5 = vpop.f32.mrb[4].mxu0 }
 0x5cf   :  { %v689_v8 = vadd.f32 %v688_v11, %v618_v5  ;;  %v7051_v9 = vpop.f32.mrb[5].mxu0  ;;  %v699_v11 = vld [vmem:[%s10208_s15] sm:$0x1] }
 0x5d1   :  { %v693_v12 = vadd.f32 %v692_v7, %v689_v8 }
 0x5d3   :  { %8341 = vtanh.f32 %v693_v12 }
 0x5dd   :  { %v8342_v14 = vpop.eup %8341 }
 0x5de   :  { %7072 = vmatmul.mubr.msk.f32.vlgmr.msra.gmra.mrb[6].mxu0 %vm154_vm1, %v8342_v14 }
 0x5df   :  { %7895 = vmatpush3.bf16.msra.mxu0 %v8914_v10  ;;  %7101 = vmatprep.mubr.msk.f32.mxu0 %vm8710_vm0, %v8711_v1 }
 0x5e0   :  { %7896 = vmatprep.subr.bf16.mxu0 %v8709_v0 }
 0x5e3   :  { %7898 = vmatpush3.bf16.msra.mxu0 %v8930_v15 }
 0x5e4   :  { %7899 = vmatprep.subr.bf16.mxu0 %v8709_v0 }
 0x6b1   :  { %v769_v18 = vpop.f32.mrb[6].mxu0 }
 0x6b2   :  { %v9080_v19 = vadd.f32 %v769_v18, %v699_v11  ;;  %v7073_v20 = vpop.f32.mrb[7].mxu0 }
 0x6b4   :  { %v774_v22 = vsel %vm773_vm2, %v9080_v19, -inf }
 0x6b5   :  { %775 = vmax.xlane.f32.xlu0 %v774_v22 }
 0x742   :  { %v9087_v25 = vpop.xlane.xlu0 %775 }
 0x743   :  { %vm785_vm3 = vcmp.eq.f32.partialorder %v9080_v19, %v9087_v25 }
 0x744   :  { %v786_v27 = vsel %vm785_vm3, %v9085_v23, 64 }
 0x745   :  { %v787_v28 = vsel %vm773_vm2, %v786_v27, 2147483647 }
 0x746   :  { %v789_v29 = vshra.s32 %v787_v28, 16  ;;  %v788_v36 = vand.u32 65535, %v787_v28 }
 0x748   :  { %v791_v30 = vcvt.s32.f32 %v789_v29  ;;  %v790_v38 = vcvt.s32.f32 %v788_v36 }
 0x74a   :  { %792 = vmin.xlane.f32.xlu0 %v791_v30 }
 0x7d7   :  { %v793_v37 = vpop.xlane.xlu0 %792 }
 0x7d8   :  { %vm794_vm4 = vcmp.eq.f32.partialorder %v791_v30, %v793_v37  ;;  %v799_v49 = vcvt.f32.s32 %v793_v37 }
 0x7d9   :  { %v795_v39 = vsel %vm794_vm4, %v790_v38, inf }
 0x7da   :  { %796 = vmin.xlane.f32.xlu1 %v795_v39  ;;  %v800_v52 = vshll.u32 %v799_v49, 16 }
 0x867   :  { %v797_v51 = vpop.xlane.xlu1 %796 }
 0x868   :  { %v798_v53 = vcvt.f32.s32 %v797_v51 }
 0x86a   :  { %v801_v54 = vadd.s32 %v800_v52, %v798_v53 }
 0x86c   :  { %vm802_vm6 = vcmp.eq.s32.totalorder %v9085_v23, %v801_v54  ;;  %879 = vst [vmem:[#allocation13] sm:$0x1] %v801_v54 }
 0x86d   :  { %v6530_v55 = vsel %vm802_vm6, 1.0, %v8711_v1 }
 0x86e   :  { %7091 = vmatmul.mubr.msk.f32.vlgmr.msra.gmra.mrb[6].mxu1 %vm805_vm5, %v6530_v55 }
 0x86f   :  { %7907 = vmatpush3.bf16.msra.mxu1 %v8987_v48  ;;  %7123 = vmatprep.mubr.msk.f32.mxu1 %vm8710_vm0, %v8711_v1 }
 0x870   :  { %7908 = vmatprep.subr.bf16.mxu1 %v8709_v0 }
 0x873   :  { %7910 = vmatpush3.bf16.msra.mxu1 %v8993_v50 }
 0x874   :  { %7917 = vmatprep.subr.bf16.mxu1 %v8709_v0 }
 0x941   :  { %v875_v56 = vpop.f32.mrb[6].mxu1 }
 0x942   :  { %v7092_v57 = vpop.f32.mrb[7].mxu1  ;;  %7102 = vmatmul.mubr.msk.f32.vlgmr.msra.gmra.mrb[8].mxu0 %vm154_vm1, %v875_v56 }
 0x943   :  { %7901 = vmatpush3.bf16.msra.mxu0 %v8935_v17  ;;  %7112 = vmatprep.mubr.msk.f32.mxu0 %vm8710_vm0, %v8711_v1 }
 0x944   :  { %7902 = vmatprep.subr.bf16.mxu0 %v8709_v0 }
 0x947   :  { %7904 = vmatpush3.bf16.msra.mxu0 %v8952_v21 }
 0x948   :  { %7911 = vmatprep.subr.bf16.mxu0 %v8709_v0 }
 0x94a   :  { %7113 = vmatmul.mubr.msk.f32.vlgmr.msra.gmra.mrb[10].mxu0 %vm154_vm1, %v9018_v2  ;;  %v885_v2 = vld [vmem:[%s10198_s5] sm:$0x1] }
 0x94b   :  { %7913 = vmatpush3.bf16.msra.mxu0 %v9046_v24  ;;  %7134 = vmatprep.mubr.msk.f32.mxu0 %vm8710_vm0, %v8711_v1 }
 0x94c   :  { %7914 = vmatprep.subr.bf16.mxu0 %v8709_v0 }
 0x94f   :  { %7916 = vmatpush3.bf16.msra.mxu0 %v9049_v26 }
 0x950   :  { %7923 = vmatprep.subr.bf16.mxu0 %v8709_v0 }
 0xa15   :  { %v955_v59 = vpop.f32.mrb[8].mxu0 }
 0xa16   :  { %v7103_v60 = vpop.f32.mrb[9].mxu0  ;;  %v956_v9 = vadd.f32 %v955_v59, %v885_v2 }
 0xa1d   :  { %v1030_v5 = vpop.f32.mrb[10].mxu0 }
 0xa1e   :  { %v1031_v7 = vadd.f32 %v1030_v5, %v963_v63  ;;  %v7114_v8 = vpop.f32.mrb[11].mxu0 }
 0xa20   :  { %1042 = vrot.lane.b32.xlu0 %v1031_v7, %s8712_s26  ;;  %v1034_v12 = vadd.f32 %v1031_v7, %v956_v9 }
 0xa22   :  { %v6534_v14 = vmul.f32 -1.442695, %v1034_v12 }
 0xa24   :  { %8343 = vpow2.f32 %v6534_v14 }
 0xa2e   :  { %v8344_v11 = vpop.eup %8343 }
 0xa2f   :  { %v1038_v18 = vadd.f32 1.0, %v8344_v11 }
 0xa31   :  { %8345 = vrcp.f32 %v1038_v18 }
 0xa3b   :  { %v8346_v20 = vpop.eup %8345 }
 0xa3c   :  { %v1052_v31 = vsub.f32 1.0, %v8346_v20  ;;  %v1058_v32 = vmul.f32 %v8346_v20, %v9000_v58 }
 0xa92   :  { %v1043_v22 = vpop.permute.xlu0 %1042 }
 0xa93   :  { %v1045_v27 = vmul.f32 %v8346_v20, %v1043_v22 }
 0xa95   :  { %1047 = vrot.lane.b32.xlu1 %v1045_v27, %s8712_s26 }
 0xb07   :  { %v1048_v28 = vpop.permute.xlu1 %1047 }
 0xb08   :  { %v1050_v29 = vadd.f32 %v1048_v28, %v956_v9 }
 0xb0a   :  { %8347 = vtanh.f32 %v1050_v29 }
 0xb14   :  { %v8348_v30 = vpop.eup %8347 }
 0xb15   :  { %1054 = vrot.lane.b32.xlu1 %v8348_v30, %s8713_s25 }
 0xb87   :  { %v1055_v42 = vpop.permute.xlu1 %1054 }
 0xb88   :  { %v1057_v34 = vmul.f32 %v1055_v42, %v1052_v31 }
 0xb8a   :  { %v9164_v36 = vadd.f32 %v1058_v32, %v1057_v34  ;;  %v1325_v34 = vld [vmem:[%s10206_s13] sm:$0x1] }
 0xb8c   :  { %1065 = vrot.lane.b32.xlu0 %v9164_v36, %s8713_s25 }
 0xbfe   :  { %v9168_v37 = vpop.permute.xlu0 %1065 }
 0xbff   :  { %7124 = vmatmul.mubr.msk.f32.vlgmr.msra.gmra.mrb[8].mxu1 %vm154_vm1, %v9168_v37 }
 0xc00   :  { %7919 = vmatpush3.bf16.msra.mxu1 %v9010_v61  ;;  %7145 = vmatprep.mubr.msk.f32.mxu1 %vm8710_vm0, %v8711_v1 }
 0xc01   :  { %7920 = vmatprep.subr.bf16.mxu1 %v8709_v0 }
 0xc04   :  { %7922 = vmatpush3.bf16.msra.mxu1 %v9023_v3 }
 0xc05   :  { %7929 = vmatprep.subr.bf16.mxu1 %v8709_v0 }
 0xc07   :  { %7146 = vmatmul.mubr.msk.f32.vlgmr.msra.gmra.mrb[10].mxu1 %vm154_vm1, %v9168_v37 }
 0xc08   :  { %7931 = vmatpush3.bf16.msra.mxu1 %v9102_v33  ;;  %7175 = vmatprep.mubr.msk.f32.mxu1 %vm8710_vm0, %v8711_v1 }
 0xc09   :  { %7932 = vmatprep.subr.bf16.mxu1 %v8709_v0 }
 0xc0c   :  { %7934 = vmatpush3.bf16.msra.mxu1 %v9108_v35 }
 0xc0d   :  { %7935 = vmatprep.subr.bf16.mxu1 %v8709_v0 }
 0xc10   :  { %7937 = vmatpush3.bf16.msra.mxu1 %v9119_v43 }
 0xc11   :  { %7938 = vmatprep.subr.bf16.mxu1 %v8709_v0 }
 0xc14   :  { %7940 = vmatpush3.bf16.msra.mxu1 %v9129_v46 }
 0xc15   :  { %7953 = vmatprep.subr.bf16.mxu1 %v8709_v0 }
 0xcd2   :  { %v1135_v58 = vpop.f32.mrb[8].mxu1 }
 0xcd3   :  { %v1142_v38 = vrot.slane %v1135_v58, %v8985_v47  ;;  %v7125_v39 = vpop.f32.mrb[9].mxu1 }
 0xcd5   :  { %v1143_v40 = vadd.f32 %v1142_v38, %v9035_v6 }
 0xcd7   :  { %8349 = vtanh.f32 %v1143_v40 }
 0xcda   :  { %v1321_v41 = vpop.f32.mrb[10].mxu1 }
 0xcdb   :  { %v7147_v44 = vpop.f32.mrb[11].mxu1 }
 0xce1   :  { %v8350_v45 = vpop.eup %8349 }
 0xce2   :  { %v1145_v49 = vmul.f32 %v8350_v45, %v9042_v13 }
 0xce4   :  { %v1146_v51 = vsel %vm154_vm1, %v1145_v49, 0.0 }
 0xce5   :  { %1147 = vadd.xlane.f32.xlu1 %v1146_v51 }
 0xd72   :  { %v1148_v52 = vpop.xlane.xlu1 %1147 }
 0xd73   :  { %v1149_v53 = vrot.slane %v1148_v52, 4 }
 0xd75   :  { %v1150_v54 = vmax.f32 %v1148_v52, %v1149_v53 }
 0xd77   :  { %v1151_v55 = vrot.slane %v1150_v54, 2 }
 0xd79   :  { %v1152_v56 = vmax.f32 %v1150_v54, %v1151_v55 }
 0xd7b   :  { %v1153_v57 = vrot.slane %v1152_v56, 1 }
 0xd7d   :  { %v1154_v59 = vmax.f32 %v1152_v56, %v1153_v57 }
 0xd7f   :  { %v1155_v60 = vsub.f32 %v1148_v52, %v1154_v59 }
 0xd81   :  { %v1156_v63 = vmul.f32 1.442695, %v1155_v60 }
 0xd83   :  { %8351 = vpow2.f32 %v1156_v63 }
 0xd8d   :  { %v8352_v5 = vpop.eup %8351 }
 0xd8e   :  { %v1158_v7 = vrot.slane %v8352_v5, 4 }
 0xd90   :  { %v1159_v8 = vadd.f32 %v8352_v5, %v1158_v7 }
 0xd92   :  { %v1160_v2 = vrot.slane %v1159_v8, 2 }
 0xd94   :  { %v1161_v9 = vadd.f32 %v1160_v2, %v1159_v8 }
 0xd96   :  { %v1162_v12 = vrot.slane %v1161_v9, 1 }
 0xd98   :  { %v1163_v14 = vadd.f32 %v1162_v12, %v1161_v9 }
 0xd9a   :  { %8353 = vrcp.f32 %v1163_v14 }
 0xda4   :  { %v8354_v11 = vpop.eup %8353 }
 0xda5   :  { %v1165_v18 = vmul.f32 %v8354_v11, %v8352_v5 }
 0xda7   :  { %v1166_v20 = vmul.f32 %v1165_v18, %v8933_v16 }
 0xda9   :  { %v1167_v22 = vsel %vm154_vm1, %v1166_v20, 0.0 }
 0xdaa   :  { %v1168_v27 = vrot.slane %v1167_v22, 4 }
 0xdac   :  { %v1169_v28 = vadd.f32 %v1168_v27, %v1167_v22 }
 0xdae   :  { %v1170_v29 = vrot.slane %v1169_v28, 2 }
 0xdb0   :  { %v1171_v30 = vadd.f32 %v1170_v29, %v1169_v28 }
 0xdb2   :  { %v1172_v31 = vrot.slane %v1171_v30, 1 }
 0xdb4   :  { %v1173_v42 = vadd.f32 %v1172_v31, %v1171_v30 }
 0xdb6   :  { %7135 = vmatmul.mubr.msk.f32.vlgmr.msra.gmra.mrb[12].mxu0 %vm154_vm1, %v1173_v42 }
 0xdb7   :  { %7925 = vmatpush3.bf16.msra.mxu0 %v9059_v62  ;;  %7156 = vmatprep.mubr.msk.f32.mxu0 %vm8710_vm0, %v8711_v1 }
 0xdb8   :  { %7926 = vmatprep.subr.bf16.mxu0 %v8709_v0 }
 0xdbb   :  { %7928 = vmatpush3.bf16.msra.mxu0 %v9062_v4 }
 0xdbc   :  { %7941 = vmatprep.subr.bf16.mxu0 %v8709_v0 }
 0xe89   :  { %v1251_v32 = vpop.f32.mrb[12].mxu0 }
 0xe8a   :  { %v1322_v58 = vadd.f32 %v1321_v41, %v1251_v32  ;;  %v7136_v38 = vpop.f32.mrb[13].mxu0  ;;  %v1332_v41 = vld [vmem:[%s10208_s15] sm:$0x1] }
 0xe8c   :  { %v1326_v39 = vadd.f32 %v1325_v34, %v1322_v58 }
 0xe8e   :  { %8355 = vtanh.f32 %v1326_v39 }
 0xe98   :  { %v8356_v40 = vpop.eup %8355 }
 0xe99   :  { %7157 = vmatmul.mubr.msk.f32.vlgmr.msra.gmra.mrb[14].mxu0 %vm154_vm1, %v8356_v40 }
 0xe9a   :  { %7943 = vmatpush3.bf16.msra.mxu0 %v8914_v10  ;;  %7186 = vmatprep.mubr.msk.f32.mxu0 %vm8710_vm0, %v8711_v1 }
 0xe9b   :  { %7944 = vmatprep.subr.bf16.mxu0 %v8709_v0 }
 0xe9e   :  { %7946 = vmatpush3.bf16.msra.mxu0 %v8930_v15 }
 0xe9f   :  { %7947 = vmatprep.subr.bf16.mxu0 %v8709_v0 }
 0xf6c   :  { %v1402_v44 = vpop.f32.mrb[14].mxu0 }
 0xf6d   :  { %v9216_v45 = vadd.f32 %v1402_v44, %v1332_v41  ;;  %v7158_v49 = vpop.f32.mrb[15].mxu0 }
 0xf6f   :  { %v1406_v10 = vsel %vm773_vm2, %v9216_v45, -inf }
 0xf70   :  { %1407 = vmax.xlane.f32.xlu0 %v1406_v10 }
 0xffd   :  { %v9220_v51 = vpop.xlane.xlu0 %1407 }
 0xffe   :  { %vm1417_vm7 = vcmp.eq.f32.partialorder %v9216_v45, %v9220_v51 }
 0xfff   :  { %v1418_v15 = vsel %vm1417_vm7, %v9085_v23, 64 }
0x1000   :  { %v1419_v52 = vsel %vm773_vm2, %v1418_v15, 2147483647 }
0x1001   :  { %v1421_v53 = vshra.s32 %v1419_v52, 16  ;;  %v1420_v55 = vand.u32 65535, %v1419_v52 }
0x1003   :  { %v1423_v54 = vcvt.s32.f32 %v1421_v53  ;;  %v1422_v57 = vcvt.s32.f32 %v1420_v55 }
0x1005   :  { %1424 = vmin.xlane.f32.xlu0 %v1423_v54 }
0x1092   :  { %v1425_v56 = vpop.xlane.xlu0 %1424 }
0x1093   :  { %vm1426_vm8 = vcmp.eq.f32.partialorder %v1423_v54, %v1425_v56  ;;  %v1431_v60 = vcvt.f32.s32 %v1425_v56 }
0x1094   :  { %v1427_v59 = vsel %vm1426_vm8, %v1422_v57, inf }
0x1095   :  { %1428 = vmin.xlane.f32.xlu1 %v1427_v59  ;;  %v1432_v5 = vshll.u32 %v1431_v60, 16 }
0x1122   :  { %v1429_v63 = vpop.xlane.xlu1 %1428 }
0x1123   :  { %v1430_v7 = vcvt.f32.s32 %v1429_v63 }
0x1125   :  { %v1433_v8 = vadd.s32 %v1432_v5, %v1430_v7 }
0x1127   :  { %vm1434_vm9 = vcmp.eq.s32.totalorder %v9085_v23, %v1433_v8  ;;  %1510 = vst [vmem:[#allocation13 + $0x1] sm:$0x1] %v1433_v8 }
0x1128   :  { %v6539_v2 = vsel %vm1434_vm9, 1.0, %v8711_v1 }
0x1129   :  { %7176 = vmatmul.mubr.msk.f32.vlgmr.msra.gmra.mrb[12].mxu1 %vm805_vm5, %v6539_v2 }
0x112a   :  { %7955 = vmatpush3.bf16.msra.mxu1 %v8987_v48  ;;  %7208 = vmatprep.mubr.msk.f32.mxu1 %vm8710_vm0, %v8711_v1 }
0x112b   :  { %7956 = vmatprep.subr.bf16.mxu1 %v8709_v0 }
0x112e   :  { %7958 = vmatpush3.bf16.msra.mxu1 %v8993_v50  ;;  %v1594_v50 = vld [vmem:[#allocation5] sm:$0x1] }
0x112f   :  { %7965 = vmatprep.subr.bf16.mxu1 %v8709_v0 }
0x11fc   :  { %v1506_v9 = vpop.f32.mrb[12].mxu1 }
0x11fd   :  { %v7177_v12 = vpop.f32.mrb[13].mxu1  ;;  %7187 = vmatmul.mubr.msk.f32.vlgmr.msra.gmra.mrb[16].mxu0 %vm154_vm1, %v1506_v9 }
0x11fe   :  { %7949 = vmatpush3.bf16.msra.mxu0 %v8935_v17  ;;  %7197 = vmatprep.mubr.msk.f32.mxu0 %vm8710_vm0, %v8711_v1 }
0x11ff   :  { %7950 = vmatprep.subr.bf16.mxu0 %v8709_v0 }
0x1202   :  { %7952 = vmatpush3.bf16.msra.mxu0 %v8952_v21 }
0x1203   :  { %7959 = vmatprep.subr.bf16.mxu0 %v8709_v0 }
0x1205   :  { %7198 = vmatmul.mubr.msk.f32.vlgmr.msra.gmra.mrb[18].mxu0 %vm154_vm1, %v9168_v37 }
0x1206   :  { %7961 = vmatpush3.bf16.msra.mxu0 %v9046_v24  ;;  %7219 = vmatprep.mubr.msk.f32.mxu0 %vm8710_vm0, %v8711_v1  ;;  %v1516_v24 = vld [vmem:[%s10198_s5] sm:$0x1] }
0x1207   :  { %7962 = vmatprep.subr.bf16.mxu0 %v8709_v0 }
0x120a   :  { %7964 = vmatpush3.bf16.msra.mxu0 %v9049_v26 }
0x120b   :  { %7971 = vmatprep.subr.bf16.mxu0 %v8709_v0 }
0x12d0   :  { %v1586_v17 = vpop.f32.mrb[16].mxu0 }
0x12d1   :  { %v7188_v48 = vpop.f32.mrb[17].mxu0  ;;  %v1587_v37 = vadd.f32 %v1586_v17, %v1516_v24 }
0x12d8   :  { %v1661_v21 = vpop.f32.mrb[18].mxu0 }
0x12d9   :  { %v1662_v14 = vadd.f32 %v1661_v21, %v1594_v50  ;;  %v7199_v11 = vpop.f32.mrb[19].mxu0 }
0x12db   :  { %1673 = vrot.lane.b32.xlu0 %v1662_v14, %s8712_s26  ;;  %v1665_v18 = vadd.f32 %v1662_v14, %v1587_v37 }
0x12dd   :  { %v6543_v20 = vmul.f32 -1.442695, %v1665_v18 }
0x12df   :  { %8357 = vpow2.f32 %v6543_v20 }
0x12e9   :  { %v8358_v22 = vpop.eup %8357 }
0x12ea   :  { %v1669_v26 = vadd.f32 1.0, %v8358_v22 }
0x12ec   :  { %8359 = vrcp.f32 %v1669_v26  ;;  %v1956_v26 = vld [vmem:[%s10206_s13] sm:$0x1] }
0x12f6   :  { %v8360_v27 = vpop.eup %8359 }
0x12f7   :  { %v1683_v32 = vsub.f32 1.0, %v8360_v27  ;;  %v1689_v58 = vmul.f32 %v8360_v27, %v9164_v36 }
0x134d   :  { %v1674_v28 = vpop.permute.xlu0 %1673 }
0x134e   :  { %v1676_v29 = vmul.f32 %v8360_v27, %v1674_v28 }
0x1350   :  { %1678 = vrot.lane.b32.xlu1 %v1676_v29, %s8712_s26 }
0x13c2   :  { %v1679_v30 = vpop.permute.xlu1 %1678 }
0x13c3   :  { %v1681_v31 = vadd.f32 %v1679_v30, %v1587_v37 }
0x13c5   :  { %8361 = vtanh.f32 %v1681_v31 }
0x13cf   :  { %v8362_v42 = vpop.eup %8361 }
0x13d0   :  { %1685 = vrot.lane.b32.xlu1 %v8362_v42, %s8713_s25 }
0x1442   :  { %v1686_v34 = vpop.permute.xlu1 %1685 }
0x1443   :  { %v1688_v38 = vmul.f32 %v1686_v34, %v1683_v32 }
0x1445   :  { %v9257_v39 = vadd.f32 %v1689_v58, %v1688_v38 }
0x1447   :  { %1696 = vrot.lane.b32.xlu0 %v9257_v39, %s8713_s25 }
0x14b9   :  { %v9261_v40 = vpop.permute.xlu0 %1696 }
0x14ba   :  { %7209 = vmatmul.mubr.msk.f32.vlgmr.msra.gmra.mrb[14].mxu1 %vm154_vm1, %v9261_v40 }
0x14bb   :  { %7967 = vmatpush3.bf16.msra.mxu1 %v9010_v61  ;;  %7230 = vmatprep.mubr.msk.f32.mxu1 %vm8710_vm0, %v8711_v1 }
0x14bc   :  { %7968 = vmatprep.subr.bf16.mxu1 %v8709_v0 }
0x14bf   :  { %7970 = vmatpush3.bf16.msra.mxu1 %v9023_v3 }
0x14c0   :  { %7977 = vmatprep.subr.bf16.mxu1 %v8709_v0 }
0x14c2   :  { %7231 = vmatmul.mubr.msk.f32.vlgmr.msra.gmra.mrb[16].mxu1 %vm154_vm1, %v9261_v40 }
0x14c3   :  { %7979 = vmatpush3.bf16.msra.mxu1 %v9102_v33  ;;  %7260 = vmatprep.mubr.msk.f32.mxu1 %vm8710_vm0, %v8711_v1 }
0x14c4   :  { %7980 = vmatprep.subr.bf16.mxu1 %v8709_v0 }
0x14c7   :  { %7982 = vmatpush3.bf16.msra.mxu1 %v9108_v35 }
0x14c8   :  { %7983 = vmatprep.subr.bf16.mxu1 %v8709_v0 }
0x14cb   :  { %7985 = vmatpush3.bf16.msra.mxu1 %v9119_v43 }
0x14cc   :  { %7986 = vmatprep.subr.bf16.mxu1 %v8709_v0 }
0x14cf   :  { %7988 = vmatpush3.bf16.msra.mxu1 %v9129_v46 }
0x14d0   :  { %8001 = vmatprep.subr.bf16.mxu1 %v8709_v0 }
0x158d   :  { %v1766_v61 = vpop.f32.mrb[14].mxu1 }
0x158e   :  { %v1773_v3 = vrot.slane %v1766_v61, %v8985_v47  ;;  %v7210_v36 = vpop.f32.mrb[15].mxu1 }
0x1590   :  { %v1774_v41 = vadd.f32 %v1773_v3, %v9035_v6 }
0x1592   :  { %8363 = vtanh.f32 %v1774_v41 }
0x1595   :  { %v1952_v44 = vpop.f32.mrb[16].mxu1 }
0x1596   :  { %v7232_v49 = vpop.f32.mrb[17].mxu1 }
0x159c   :  { %v8364_v10 = vpop.eup %8363 }
0x159d   :  { %v1776_v15 = vmul.f32 %v8364_v10, %v9042_v13  ;;  %v2143_v10 = vld [vmem:[%s10196_s3] sm:$0xff] }
0x159f   :  { %v1777_v52 = vsel %vm154_vm1, %v1776_v15, 0.0  ;;  %v2144_v15 = vld [vmem:[%s10196_s3 + $0x8] sm:$0xff] }
0x15a0   :  { %1778 = vadd.xlane.f32.xlu1 %v1777_v52  ;;  %v2145_v52 = vld [vmem:[%s10196_s3 + $0x10] sm:$0xff] }
0x162d   :  { %v1779_v53 = vpop.xlane.xlu1 %1778 }
0x162e   :  { %v1780_v54 = vrot.slane %v1779_v53, 4 }
0x1630   :  { %v1781_v55 = vmax.f32 %v1779_v53, %v1780_v54  ;;  %v2146_v54 = vld [vmem:[%s10196_s3 + $0x18] sm:$0xff] }
0x1632   :  { %v1782_v56 = vrot.slane %v1781_v55, 2 }
0x1634   :  { %v1783_v57 = vmax.f32 %v1781_v55, %v1782_v56  ;;  %v9330_v55 = vpack.c.bf16 %v2146_v54, %v2145_v52  ;;  %v2437_v52 = vld [vmem:[%s10204_s11 + $0x8] sm:$0xff] }
0x1636   :  { %v1784_v59 = vrot.slane %v1783_v57, 1 }
0x1638   :  { %v1785_v60 = vmax.f32 %v1783_v57, %v1784_v59 }
0x163a   :  { %v1786_v63 = vsub.f32 %v1779_v53, %v1785_v60  ;;  %v9324_v53 = vpack.c.bf16 %v2144_v15, %v2143_v10  ;;  %v2436_v15 = vld [vmem:[%s10204_s11] sm:$0xff] }
0x163b   :  { %v9404_v54 = vpack.c.bf16 %v2437_v52, %v2436_v15 }
0x163c   :  { %v1787_v5 = vmul.f32 1.442695, %v1786_v63 }
0x163e   :  { %8365 = vpow2.f32 %v1787_v5 }
0x1648   :  { %v8366_v7 = vpop.eup %8365 }
0x1649   :  { %v1789_v8 = vrot.slane %v8366_v7, 4 }
0x164b   :  { %v1790_v2 = vadd.f32 %v8366_v7, %v1789_v8  ;;  %v2222_v8 = vld [vmem:[%s10197_s4 + $0x8] sm:$0xff] }
0x164d   :  { %v1791_v9 = vrot.slane %v1790_v2, 2 }
0x164f   :  { %v1792_v12 = vadd.f32 %v1791_v9, %v1790_v2  ;;  %v2223_v9 = vld [vmem:[%s10197_s4 + $0x10] sm:$0xff] }
0x1651   :  { %v1793_v17 = vrot.slane %v1792_v12, 1 }
0x1653   :  { %v1794_v13 = vadd.f32 %v1793_v17, %v1792_v12  ;;  %v2224_v12 = vld [vmem:[%s10197_s4 + $0x18] sm:$0xff] }
0x1655   :  { %8367 = vrcp.f32 %v1794_v13 }
0x165f   :  { %v8368_v48 = vpop.eup %8367 }
0x1660   :  { %v1796_v50 = vmul.f32 %v8368_v48, %v8366_v7  ;;  %v2221_v7 = vld [vmem:[%s10197_s4] sm:$0xff]  ;;  %v9356_v48 = vpack.c.bf16 %v2224_v12, %v2223_v9 }
0x1661   :  { %v9346_v2 = vpack.c.bf16 %v2222_v8, %v2221_v7 }
0x1662   :  { %v1797_v21 = vmul.f32 %v1796_v50, %v8933_v16 }
0x1664   :  { %v1798_v14 = vsel %vm154_vm1, %v1797_v21, 0.0 }
0x1665   :  { %v1799_v11 = vrot.slane %v1798_v14, 4 }
0x1667   :  { %v1800_v24 = vadd.f32 %v1799_v11, %v1798_v14  ;;  %v2225_v14 = vld [vmem:[#allocation5] sm:$0x1] }
0x1669   :  { %v1801_v37 = vrot.slane %v1800_v24, 2 }
0x166b   :  { %v1802_v18 = vadd.f32 %v1801_v37, %v1800_v24 }
0x166d   :  { %v1803_v20 = vrot.slane %v1802_v18, 1 }
0x166f   :  { %v1804_v22 = vadd.f32 %v1803_v20, %v1802_v18  ;;  %v2147_v18 = vld [vmem:[%s10198_s5] sm:$0x1] }
0x1671   :  { %7220 = vmatmul.mubr.msk.f32.vlgmr.msra.gmra.mrb[20].mxu0 %vm154_vm1, %v1804_v22 }
0x1672   :  { %7973 = vmatpush3.bf16.msra.mxu0 %v9059_v62  ;;  %7241 = vmatprep.mubr.msk.f32.mxu0 %vm8710_vm0, %v8711_v1  ;;  %v1963_v62 = vld [vmem:[%s10208_s15] sm:$0x1] }
0x1673   :  { %7974 = vmatprep.subr.bf16.mxu0 %v8709_v0 }
0x1676   :  { %7976 = vmatpush3.bf16.msra.mxu0 %v9062_v4 }
0x1677   :  { %7989 = vmatprep.subr.bf16.mxu0 %v8709_v0 }
0x1744   :  { %v1882_v16 = vpop.f32.mrb[20].mxu0 }
0x1745   :  { %v1953_v27 = vadd.f32 %v1952_v44, %v1882_v16  ;;  %v7221_v28 = vpop.f32.mrb[21].mxu0 }
0x1747   :  { %v1957_v29 = vadd.f32 %v1956_v26, %v1953_v27 }
0x1749   :  { %8369 = vtanh.f32 %v1957_v29 }
0x1753   :  { %v8370_v30 = vpop.eup %8369 }
0x1754   :  { %7242 = vmatmul.mubr.msk.f32.vlgmr.msra.gmra.mrb[22].mxu0 %vm154_vm1, %v8370_v30 }
0x1755   :  { %7271 = vmatprep.mubr.msk.f32.mxu0 %vm8710_vm0, %v8711_v1  ;;  %7991 = vmatpush3.bf16.msra.mxu0 %v9324_v53 }
0x1756   :  { %7992 = vmatprep.subr.bf16.mxu0 %v8709_v0 }
0x1759   :  { %7994 = vmatpush3.bf16.msra.mxu0 %v9330_v55 }
0x175a   :  { %7995 = vmatprep.subr.bf16.mxu0 %v8709_v0 }
0x1827   :  { %v2033_v4 = vpop.f32.mrb[22].mxu0 }
0x1828   :  { %v9305_v31 = vadd.f32 %v2033_v4, %v1963_v62  ;;  %v7243_v42 = vpop.f32.mrb[23].mxu0  ;;  %v2322_v4 = vld [vmem:[%s10200_s7] sm:$0xff] }
0x1829   :  { %v2323_v42 = vld [vmem:[%s10200_s7 + $0x8] sm:$0xff] }
0x182a   :  { %v2037_v32 = vsel %vm773_vm2, %v9305_v31, -inf }
0x182b   :  { %2038 = vmax.xlane.f32.xlu0 %v2037_v32  ;;  %v2324_v32 = vld [vmem:[%s10200_s7 + $0x10] sm:$0xff] }
0x18b8   :  { %v9309_v34 = vpop.xlane.xlu0 %2038 }
0x18b9   :  { %vm2048_vm10 = vcmp.eq.f32.partialorder %v9305_v31, %v9309_v34 }
0x18ba   :  { %v2049_v58 = vsel %vm2048_vm10, %v9085_v23, 64 }
0x18bb   :  { %v2050_v38 = vsel %vm773_vm2, %v2049_v58, 2147483647  ;;  %v9381_v58 = vpack.c.bf16 %v2323_v42, %v2322_v4 }
0x18bc   :  { %v2052_v61 = vshra.s32 %v2050_v38, 16  ;;  %v2051_v36 = vand.u32 65535, %v2050_v38  ;;  %v2325_v38 = vld [vmem:[%s10200_s7 + $0x18] sm:$0xff] }
0x18be   :  { %v2054_v3 = vcvt.s32.f32 %v2052_v61  ;;  %v2053_v44 = vcvt.s32.f32 %v2051_v36  ;;  %v9387_v61 = vpack.c.bf16 %v2325_v38, %v2324_v32 }
0x18c0   :  { %2055 = vmin.xlane.f32.xlu0 %v2054_v3 }
0x194d   :  { %v2056_v41 = vpop.xlane.xlu0 %2055 }
0x194e   :  { %vm2057_vm11 = vcmp.eq.f32.partialorder %v2054_v3, %v2056_v41  ;;  %v2062_v56 = vcvt.f32.s32 %v2056_v41 }
0x194f   :  { %v2058_v49 = vsel %vm2057_vm11, %v2053_v44, inf }
0x1950   :  { %2059 = vmin.xlane.f32.xlu1 %v2058_v49  ;;  %v2063_v59 = vshll.u32 %v2062_v56, 16  ;;  %v2439_v56 = vld [vmem:[%s10204_s11 + $0x18] sm:$0xff] }
0x19dd   :  { %v2060_v57 = vpop.xlane.xlu1 %2059 }
0x19de   :  { %v2061_v60 = vcvt.f32.s32 %v2060_v57 }
0x19e0   :  { %v2064_v63 = vadd.s32 %v2063_v59, %v2061_v60 }
0x19e2   :  { %vm2065_vm12 = vcmp.eq.s32.totalorder %v9085_v23, %v2064_v63  ;;  %2141 = vst [vmem:[#allocation13 + $0x2] sm:$0x1] %v2064_v63 }
0x19e3   :  { %v6548_v5 = vsel %vm2065_vm12, 1.0, %v8711_v1 }
0x19e4   :  { %7261 = vmatmul.mubr.msk.f32.vlgmr.msra.gmra.mrb[18].mxu1 %vm805_vm5, %v6548_v5 }
0x19e5   :  { %7293 = vmatprep.mubr.msk.f32.mxu1 %vm8710_vm0, %v8711_v1  ;;  %8003 = vmatpush3.bf16.msra.mxu1 %v9381_v58 }
0x19e6   :  { %8004 = vmatprep.subr.bf16.mxu1 %v8709_v0 }
0x19e9   :  { %8006 = vmatpush3.bf16.msra.mxu1 %v9387_v61 }
0x19ea   :  { %8013 = vmatprep.subr.bf16.mxu1 %v8709_v0 }
0x1ab7   :  { %v2137_v17 = vpop.f32.mrb[18].mxu1 }
0x1ab8   :  { %v7262_v13 = vpop.f32.mrb[19].mxu1  ;;  %7272 = vmatmul.mubr.msk.f32.vlgmr.msra.gmra.mrb[24].mxu0 %vm154_vm1, %v2137_v17  ;;  %v9441_v17 = vld [vmem:[%s10203_s10] ss:$0 sm:$0xff] }
0x1ab9   :  { %7997 = vmatpush3.bf16.msra.mxu0 %v9346_v2  ;;  %7282 = vmatprep.mubr.msk.f32.mxu0 %vm8710_vm0, %v8711_v1 }
0x1aba   :  { %7998 = vmatprep.subr.bf16.mxu0 %v8709_v0 }
0x1abd   :  { %8000 = vmatpush3.bf16.msra.mxu0 %v9356_v48 }
0x1abe   :  { %8007 = vmatprep.subr.bf16.mxu0 %v8709_v0 }
0x1ac0   :  { %7283 = vmatmul.mubr.msk.f32.vlgmr.msra.gmra.mrb[26].mxu0 %vm154_vm1, %v9261_v40 }
0x1ac1   :  { %7304 = vmatprep.mubr.msk.f32.mxu0 %vm8710_vm0, %v8711_v1 }
0x1b8b   :  { %v2217_v50 = vpop.f32.mrb[24].mxu0 }
0x1b8c   :  { %v7273_v21 = vpop.f32.mrb[25].mxu0  ;;  %v2218_v20 = vadd.f32 %v2217_v50, %v2147_v18 }
0x1b8d   :  { %v2440_v21 = vld [vmem:[#allocation10] sm:$0xff] }
0x1b93   :  { %v2292_v11 = vpop.f32.mrb[26].mxu0 }
0x1b94   :  { %v2293_v24 = vadd.f32 %v2292_v11, %v2225_v14  ;;  %v7284_v37 = vpop.f32.mrb[27].mxu0  ;;  %v2441_v14 = vld [vmem:[#allocation10 + $0x8] sm:$0xff]  ;;  %v2442_v11 = vld [vmem:[#allocation10 + $0x10] sm:$0xff] }
0x1b95   :  { %v2443_v37 = vld [vmem:[#allocation10 + $0x18] sm:$0xff] }
0x1b96   :  { %2304 = vrot.lane.b32.xlu0 %v2293_v24, %s8712_s26  ;;  %v2296_v22 = vadd.f32 %v2293_v24, %v2218_v20  ;;  %v9445_v24 = vpack.c.bf16 %v2441_v14, %v2440_v21  ;;  %v9448_v18 = vpack.c.bf16 %v2443_v37, %v2442_v11  ;;  %v2593_v21 = vld [vmem:[#allocation11 + $0x18] sm:$0xff]  ;;  %v2587_v37 = vld [vmem:[%s10206_s13] sm:$0x1] }
0x1b98   :  { %v6552_v16 = vmul.f32 -1.442695, %v2296_v22  ;;  %8009 = vmatpush3.bf16.msra.mxu0 %v9445_v24 }
0x1b99   :  { %8010 = vmatprep.subr.bf16.mxu0 %v8709_v0 }
0x1b9a   :  { %8371 = vpow2.f32 %v6552_v16 }
0x1b9c   :  { %8012 = vmatpush3.bf16.msra.mxu0 %v9448_v18 }
0x1b9d   :  { %8019 = vmatprep.subr.bf16.mxu0 %v8709_v0 }
0x1ba4   :  { %v8372_v40 = vpop.eup %8371 }
0x1ba5   :  { %v2300_v26 = vadd.f32 1.0, %v8372_v40 }
0x1ba7   :  { %8373 = vrcp.f32 %v2300_v26 }
0x1bb1   :  { %v8374_v27 = vpop.eup %8373 }
0x1bb2   :  { %v2314_v36 = vsub.f32 1.0, %v8374_v27  ;;  %v2320_v44 = vmul.f32 %v8374_v27, %v9257_v39  ;;  %v2438_v39 = vld [vmem:[%s10204_s11 + $0x10] sm:$0xff] }
0x1bb3   :  { %v9417_v59 = vpack.c.bf16 %v2439_v56, %v2438_v39 }
0x1c08   :  { %v2305_v28 = vpop.permute.xlu0 %2304 }
0x1c09   :  { %v2307_v29 = vmul.f32 %v8374_v27, %v2305_v28 }
0x1c0b   :  { %2309 = vrot.lane.b32.xlu1 %v2307_v29, %s8712_s26 }
0x1c7d   :  { %v2310_v30 = vpop.permute.xlu1 %2309 }
0x1c7e   :  { %v2312_v62 = vadd.f32 %v2310_v30, %v2218_v20 }
0x1c80   :  { %8375 = vtanh.f32 %v2312_v62 }
0x1c8a   :  { %v8376_v3 = vpop.eup %8375 }
0x1c8b   :  { %2316 = vrot.lane.b32.xlu1 %v8376_v3, %s8713_s25 }
0x1cfd   :  { %v2317_v41 = vpop.permute.xlu1 %2316 }
0x1cfe   :  { %v2319_v49 = vmul.f32 %v2317_v41, %v2314_v36 }
0x1d00   :  { %v9394_v10 = vadd.f32 %v2320_v44, %v2319_v49  ;;  %v9453_v49 = vld [vmem:[#allocation2] sm:$0xff] }
0x1d02   :  { %2327 = vrot.lane.b32.xlu0 %v9394_v10, %s8713_s25 }
0x1d74   :  { %v9412_v57 = vpop.permute.xlu0 %2327 }
0x1d75   :  { %7294 = vmatmul.mubr.msk.f32.vlgmr.msra.gmra.mrb[20].mxu1 %vm154_vm1, %v9412_v57 }
0x1d76   :  { %8015 = vmatpush3.bf16.msra.mxu1 %v9404_v54  ;;  %7315 = vmatprep.mubr.msk.f32.mxu1 %vm8710_vm0, %v8711_v1 }
0x1d77   :  { %8016 = vmatprep.subr.bf16.mxu1 %v8709_v0 }
0x1d7a   :  { %8018 = vmatpush3.bf16.msra.mxu1 %v9417_v59 }
0x1d7b   :  { %8025 = vmatprep.subr.bf16.mxu1 %v8709_v0 }
0x1d7d   :  { %7316 = vmatmul.mubr.msk.f32.vlgmr.msra.gmra.mrb[22].mxu1 %vm154_vm1, %v9412_v57 }
0x1d7e   :  { %8027 = vmatpush3.bf16.msra.mxu1 %v9102_v33  ;;  %7345 = vmatprep.mubr.msk.f32.mxu1 %vm8710_vm0, %v8711_v1 }
0x1d7f   :  { %8028 = vmatprep.subr.bf16.mxu1 %v8709_v0 }
0x1d82   :  { %8030 = vmatpush3.bf16.msra.mxu1 %v9108_v35 }
0x1d83   :  { %8031 = vmatprep.subr.bf16.mxu1 %v8709_v0 }
0x1d86   :  { %8033 = vmatpush3.bf16.msra.mxu1 %v9119_v43 }
0x1d87   :  { %8034 = vmatprep.subr.bf16.mxu1 %v8709_v0 }
0x1d8a   :  { %8036 = vmatpush3.bf16.msra.mxu1 %v9129_v46 }
0x1d8b   :  { %8049 = vmatprep.subr.bf16.mxu1 %v8709_v0 }
0x1e48   :  { %v2397_v60 = vpop.f32.mrb[20].mxu1 }
0x1e49   :  { %v2404_v63 = vrot.slane %v2397_v60, %v8985_v47  ;;  %v7295_v5 = vpop.f32.mrb[21].mxu1 }
0x1e4b   :  { %v2405_v7 = vadd.f32 %v2404_v63, %v9035_v6 }
0x1e4d   :  { %8377 = vtanh.f32 %v2405_v7 }
0x1e50   :  { %v2583_v8 = vpop.f32.mrb[22].mxu1 }
0x1e51   :  { %v7317_v9 = vpop.f32.mrb[23].mxu1 }
0x1e52   :  { %v2590_v9 = vld [vmem:[#allocation11] sm:$0xff] }
0x1e57   :  { %v8378_v12 = vpop.eup %8377 }
0x1e58   :  { %v2407_v13 = vmul.f32 %v9441_v17, %v8378_v12  ;;  %v2591_v12 = vld [vmem:[#allocation11 + $0x8] sm:$0xff] }
0x1e5a   :  { %v2408_v50 = vsel %vm154_vm1, %v2407_v13, 0.0  ;;  %v2592_v13 = vld [vmem:[#allocation11 + $0x10] sm:$0xff] }
0x1e5b   :  { %2409 = vadd.xlane.f32.xlu1 %v2408_v50  ;;  %v9460_v50 = vpack.c.bf16 %v2591_v12, %v2590_v9  ;;  %v9463_v14 = vpack.c.bf16 %v2593_v21, %v2592_v13  ;;  %v2856_v12 = vld [vmem:[#allocation5] sm:$0x1] }
0x1ee8   :  { %v2410_v20 = vpop.xlane.xlu1 %2409 }
0x1ee9   :  { %v2411_v22 = vrot.slane %v2410_v20, 4 }
0x1eeb   :  { %v2412_v16 = vmax.f32 %v2410_v20, %v2411_v22 }
0x1eed   :  { %v2413_v40 = vrot.slane %v2412_v16, 2 }
0x1eef   :  { %v2414_v26 = vmax.f32 %v2412_v16, %v2413_v40 }
0x1ef1   :  { %v2415_v27 = vrot.slane %v2414_v26, 1 }
0x1ef3   :  { %v2416_v28 = vmax.f32 %v2414_v26, %v2415_v27 }
0x1ef5   :  { %v2417_v29 = vsub.f32 %v2410_v20, %v2416_v28 }
0x1ef7   :  { %v2418_v30 = vmul.f32 1.442695, %v2417_v29 }
0x1ef9   :  { %8379 = vpow2.f32 %v2418_v30 }
0x1f03   :  { %v8380_v62 = vpop.eup %8379 }
0x1f04   :  { %v2420_v4 = vrot.slane %v8380_v62, 4 }
0x1f06   :  { %v2421_v42 = vadd.f32 %v8380_v62, %v2420_v4 }
0x1f08   :  { %v2422_v32 = vrot.slane %v2421_v42, 2 }
0x1f0a   :  { %v2423_v38 = vadd.f32 %v2422_v32, %v2421_v42 }
0x1f0c   :  { %v2424_v3 = vrot.slane %v2423_v38, 1 }
0x1f0e   :  { %v2425_v36 = vadd.f32 %v2424_v3, %v2423_v38 }
0x1f10   :  { %8381 = vrcp.f32 %v2425_v36 }
0x1f1a   :  { %v8382_v41 = vpop.eup %8381 }
0x1f1b   :  { %v2427_v44 = vmul.f32 %v8382_v41, %v8380_v62 }
0x1f1d   :  { %v2428_v15 = vmul.f32 %v9453_v49, %v2427_v44 }
0x1f1f   :  { %v2429_v52 = vsel %vm154_vm1, %v2428_v15, 0.0 }
0x1f20   :  { %v2430_v39 = vrot.slane %v2429_v52, 4 }
0x1f22   :  { %v2431_v56 = vadd.f32 %v2430_v39, %v2429_v52 }
0x1f24   :  { %v2432_v60 = vrot.slane %v2431_v56, 2 }
0x1f26   :  { %v2433_v63 = vadd.f32 %v2432_v60, %v2431_v56 }
0x1f28   :  { %v2434_v5 = vrot.slane %v2433_v63, 1 }
0x1f2a   :  { %v2435_v7 = vadd.f32 %v2434_v5, %v2433_v63 }
0x1f2c   :  { %7305 = vmatmul.mubr.msk.f32.vlgmr.msra.gmra.mrb[28].mxu0 %vm154_vm1, %v2435_v7 }
0x1f2d   :  { %7326 = vmatprep.mubr.msk.f32.mxu0 %vm8710_vm0, %v8711_v1  ;;  %8021 = vmatpush3.bf16.msra.mxu0 %v9460_v50 }
0x1f2e   :  { %8022 = vmatprep.subr.bf16.mxu0 %v8709_v0 }
0x1f31   :  { %8024 = vmatpush3.bf16.msra.mxu0 %v9463_v14 }
0x1f32   :  { %8037 = vmatprep.subr.bf16.mxu0 %v8709_v0 }
0x1fff   :  { %v2513_v11 = vpop.f32.mrb[28].mxu0 }
0x2000   :  { %v2584_v20 = vadd.f32 %v2583_v8, %v2513_v11  ;;  %v7306_v22 = vpop.f32.mrb[29].mxu0  ;;  %v2594_v8 = vld [vmem:[%s10208_s15] sm:$0x1] }
0x2002   :  { %v2588_v16 = vadd.f32 %v2587_v37, %v2584_v20 }
0x2004   :  { %8383 = vtanh.f32 %v2588_v16 }
0x200e   :  { %v8384_v40 = vpop.eup %8383 }
0x200f   :  { %7327 = vmatmul.mubr.msk.f32.vlgmr.msra.gmra.mrb[30].mxu0 %vm154_vm1, %v8384_v40 }
0x2010   :  { %8039 = vmatpush3.bf16.msra.mxu0 %v9324_v53  ;;  %7356 = vmatprep.mubr.msk.f32.mxu0 %vm8710_vm0, %v8711_v1 }
0x2011   :  { %8040 = vmatprep.subr.bf16.mxu0 %v8709_v0 }
0x2014   :  { %8042 = vmatpush3.bf16.msra.mxu0 %v9330_v55 }
0x2015   :  { %8043 = vmatprep.subr.bf16.mxu0 %v8709_v0 }
0x20e2   :  { %v2664_v26 = vpop.f32.mrb[30].mxu0 }
0x20e3   :  { %v9481_v27 = vadd.f32 %v2664_v26, %v2594_v8  ;;  %v7328_v28 = vpop.f32.mrb[31].mxu0 }
0x20e5   :  { %v2668_v29 = vsel %vm773_vm2, %v9481_v27, -inf }
0x20e6   :  { %2669 = vmax.xlane.f32.xlu0 %v2668_v29 }
0x2173   :  { %v9485_v30 = vpop.xlane.xlu0 %2669 }
0x2174   :  { %vm2679_vm13 = vcmp.eq.f32.partialorder %v9481_v27, %v9485_v30 }
0x2175   :  { %v2680_v62 = vsel %vm2679_vm13, %v9085_v23, 64 }
0x2176   :  { %v2681_v4 = vsel %vm773_vm2, %v2680_v62, 2147483647 }
0x2177   :  { %v2683_v42 = vshra.s32 %v2681_v4, 16  ;;  %v2682_v38 = vand.u32 65535, %v2681_v4 }
0x2179   :  { %v2685_v32 = vcvt.s32.f32 %v2683_v42  ;;  %v2684_v36 = vcvt.s32.f32 %v2682_v38 }
0x217b   :  { %2686 = vmin.xlane.f32.xlu0 %v2685_v32 }
0x2208   :  { %v2687_v3 = vpop.xlane.xlu0 %2686 }
0x2209   :  { %vm2688_vm14 = vcmp.eq.f32.partialorder %v2685_v32, %v2687_v3  ;;  %v2693_v44 = vcvt.f32.s32 %v2687_v3 }
0x220a   :  { %v2689_v41 = vsel %vm2688_vm14, %v2684_v36, inf }
0x220b   :  { %2690 = vmin.xlane.f32.xlu1 %v2689_v41  ;;  %v2694_v52 = vshll.u32 %v2693_v44, 16 }
0x2298   :  { %v2691_v15 = vpop.xlane.xlu1 %2690 }
0x2299   :  { %v2692_v39 = vcvt.f32.s32 %v2691_v15 }
0x229b   :  { %v2695_v56 = vadd.s32 %v2694_v52, %v2692_v39 }
0x229d   :  { %vm2696_vm15 = vcmp.eq.s32.totalorder %v9085_v23, %v2695_v56  ;;  %2772 = vst [vmem:[#allocation13 + $0x3] sm:$0x1] %v2695_v56 }
0x229e   :  { %v6557_v60 = vsel %vm2696_vm15, 1.0, %v8711_v1 }
0x229f   :  { %7346 = vmatmul.mubr.msk.f32.vlgmr.msra.gmra.mrb[24].mxu1 %vm805_vm5, %v6557_v60 }
0x22a0   :  { %8051 = vmatpush3.bf16.msra.mxu1 %v9381_v58  ;;  %7378 = vmatprep.mubr.msk.f32.mxu1 %vm8710_vm0, %v8711_v1 }
0x22a1   :  { %8052 = vmatprep.subr.bf16.mxu1 %v8709_v0 }
0x22a4   :  { %8054 = vmatpush3.bf16.msra.mxu1 %v9387_v61 }
0x22a5   :  { %8061 = vmatprep.subr.bf16.mxu1 %v8709_v0 }
0x2372   :  { %v2768_v63 = vpop.f32.mrb[24].mxu1 }
0x2373   :  { %v7347_v5 = vpop.f32.mrb[25].mxu1  ;;  %7357 = vmatmul.mubr.msk.f32.vlgmr.msra.gmra.mrb[32].mxu0 %vm154_vm1, %v2768_v63 }
0x2374   :  { %8045 = vmatpush3.bf16.msra.mxu0 %v9346_v2  ;;  %7367 = vmatprep.mubr.msk.f32.mxu0 %vm8710_vm0, %v8711_v1 }
0x2375   :  { %8046 = vmatprep.subr.bf16.mxu0 %v8709_v0 }
0x2378   :  { %8048 = vmatpush3.bf16.msra.mxu0 %v9356_v48 }
0x2379   :  { %8055 = vmatprep.subr.bf16.mxu0 %v8709_v0 }
0x237b   :  { %7368 = vmatmul.mubr.msk.f32.vlgmr.msra.gmra.mrb[34].mxu0 %vm154_vm1, %v9412_v57  ;;  %v2778_v57 = vld [vmem:[%s10198_s5] sm:$0x1] }
0x237c   :  { %8057 = vmatpush3.bf16.msra.mxu0 %v9445_v24  ;;  %7389 = vmatprep.mubr.msk.f32.mxu0 %vm8710_vm0, %v8711_v1 }
0x237d   :  { %8058 = vmatprep.subr.bf16.mxu0 %v8709_v0 }
0x2380   :  { %8060 = vmatpush3.bf16.msra.mxu0 %v9448_v18 }
0x2381   :  { %8067 = vmatprep.subr.bf16.mxu0 %v8709_v0 }
0x2446   :  { %v2848_v7 = vpop.f32.mrb[32].mxu0 }
0x2447   :  { %v7358_v9 = vpop.f32.mrb[33].mxu0  ;;  %v2849_v37 = vadd.f32 %v2848_v7, %v2778_v57 }
0x244e   :  { %v2923_v13 = vpop.f32.mrb[34].mxu0 }
0x244f   :  { %v2924_v21 = vadd.f32 %v2923_v13, %v2856_v12  ;;  %v7369_v11 = vpop.f32.mrb[35].mxu0 }
0x2451   :  { %2935 = vrot.lane.b32.xlu0 %v2924_v21, %s8712_s26  ;;  %v2927_v20 = vadd.f32 %v2924_v21, %v2849_v37 }
0x2453   :  { %v6561_v22 = vmul.f32 -1.442695, %v2927_v20 }
0x2455   :  { %8385 = vpow2.f32 %v6561_v22 }
0x245f   :  { %v8386_v16 = vpop.eup %8385 }
0x2460   :  { %v2931_v40 = vadd.f32 1.0, %v8386_v16 }
0x2462   :  { %8387 = vrcp.f32 %v2931_v40 }
0x246c   :  { %v8388_v8 = vpop.eup %8387 }
0x246d   :  { %v2945_v42 = vsub.f32 1.0, %v8388_v8  ;;  %v2951_v38 = vmul.f32 %v8388_v8, %v9394_v10 }
0x24c3   :  { %v2936_v26 = vpop.permute.xlu0 %2935 }
0x24c4   :  { %v2938_v28 = vmul.f32 %v8388_v8, %v2936_v26 }
0x24c6   :  { %2940 = vrot.lane.b32.xlu1 %v2938_v28, %s8712_s26 }
0x2538   :  { %v2941_v29 = vpop.permute.xlu1 %2940 }
0x2539   :  { %v2943_v62 = vadd.f32 %v2941_v29, %v2849_v37 }
0x253b   :  { %8389 = vtanh.f32 %v2943_v62 }
0x2545   :  { %v8390_v4 = vpop.eup %8389 }
0x2546   :  { %2947 = vrot.lane.b32.xlu1 %v8390_v4, %s8713_s25 }
0x25b8   :  { %v2948_v32 = vpop.permute.xlu1 %2947 }
0x25b9   :  { %v2950_v3 = vmul.f32 %v2948_v32, %v2945_v42 }
0x25bb   :  { %v9522_v36 = vadd.f32 %v2951_v38, %v2950_v3 }
0x25bd   :  { %2958 = vrot.lane.b32.xlu0 %v9522_v36, %s8713_s25 }
0x262f   :  { %v9526_v41 = vpop.permute.xlu0 %2958 }
0x2630   :  { %7379 = vmatmul.mubr.msk.f32.vlgmr.msra.gmra.mrb[26].mxu1 %vm154_vm1, %v9526_v41 }
0x2631   :  { %8063 = vmatpush3.bf16.msra.mxu1 %v9404_v54  ;;  %7400 = vmatprep.mubr.msk.f32.mxu1 %vm8710_vm0, %v8711_v1 }
0x2632   :  { %8064 = vmatprep.subr.bf16.mxu1 %v8709_v0 }
0x2635   :  { %8066 = vmatpush3.bf16.msra.mxu1 %v9417_v59 }
0x2636   :  { %8073 = vmatprep.subr.bf16.mxu1 %v8709_v0 }
0x2638   :  { %7401 = vmatmul.mubr.msk.f32.vlgmr.msra.gmra.mrb[28].mxu1 %vm154_vm1, %v9526_v41 }
0x2639   :  { %8075 = vmatpush3.bf16.msra.mxu1 %v9102_v33  ;;  %7430 = vmatprep.mubr.msk.f32.mxu1 %vm8710_vm0, %v8711_v1 }
0x263a   :  { %8076 = vmatprep.subr.bf16.mxu1 %v8709_v0 }
0x263d   :  { %8078 = vmatpush3.bf16.msra.mxu1 %v9108_v35 }
0x263e   :  { %8079 = vmatprep.subr.bf16.mxu1 %v8709_v0 }
0x2641   :  { %8081 = vmatpush3.bf16.msra.mxu1 %v9119_v43 }
0x2642   :  { %8082 = vmatprep.subr.bf16.mxu1 %v8709_v0 }
0x2645   :  { %8084 = vmatpush3.bf16.msra.mxu1 %v9129_v46 }
0x2646   :  { %8097 = vmatprep.subr.bf16.mxu1 %v8709_v0 }
0x2703   :  { %v3028_v10 = vpop.f32.mrb[26].mxu1 }
0x2704   :  { %v3035_v44 = vrot.slane %v3028_v10, %v8985_v47  ;;  %v7380_v15 = vpop.f32.mrb[27].mxu1 }
0x2706   :  { %v3036_v52 = vadd.f32 %v3035_v44, %v9035_v6 }
0x2708   :  { %8391 = vtanh.f32 %v3036_v52 }
0x270b   :  { %v3214_v39 = vpop.f32.mrb[28].mxu1 }
0x270c   :  { %v7402_v56 = vpop.f32.mrb[29].mxu1 }
0x2712   :  { %v8392_v60 = vpop.eup %8391 }
0x2713   :  { %v3038_v63 = vmul.f32 %v9441_v17, %v8392_v60  ;;  %v3218_v60 = vld [vmem:[%s10206_s13] sm:$0x1] }
0x2715   :  { %v3039_v5 = vsel %vm154_vm1, %v3038_v63, 0.0 }
0x2716   :  { %3040 = vadd.xlane.f32.xlu1 %v3039_v5 }
0x27a3   :  { %v3041_v7 = vpop.xlane.xlu1 %3040 }
0x27a4   :  { %v3042_v9 = vrot.slane %v3041_v7, 4 }
0x27a6   :  { %v3043_v12 = vmax.f32 %v3041_v7, %v3042_v9 }
0x27a8   :  { %v3044_v13 = vrot.slane %v3043_v12, 2 }
0x27aa   :  { %v3045_v21 = vmax.f32 %v3043_v12, %v3044_v13 }
0x27ac   :  { %v3046_v11 = vrot.slane %v3045_v21, 1 }
0x27ae   :  { %v3047_v57 = vmax.f32 %v3045_v21, %v3046_v11 }
0x27b0   :  { %v3048_v37 = vsub.f32 %v3041_v7, %v3047_v57 }
0x27b2   :  { %v3049_v20 = vmul.f32 1.442695, %v3048_v37 }
0x27b4   :  { %8393 = vpow2.f32 %v3049_v20 }
0x27be   :  { %v8394_v22 = vpop.eup %8393 }
0x27bf   :  { %v3051_v16 = vrot.slane %v8394_v22, 4 }
0x27c1   :  { %v3052_v40 = vadd.f32 %v8394_v22, %v3051_v16 }
0x27c3   :  { %v3053_v8 = vrot.slane %v3052_v40, 2 }
0x27c5   :  { %v3054_v26 = vadd.f32 %v3053_v8, %v3052_v40 }
0x27c7   :  { %v3055_v28 = vrot.slane %v3054_v26, 1 }
0x27c9   :  { %v3056_v29 = vadd.f32 %v3055_v28, %v3054_v26 }
0x27cb   :  { %8395 = vrcp.f32 %v3056_v29 }
0x27d5   :  { %v8396_v62 = vpop.eup %8395 }
0x27d6   :  { %v3058_v4 = vmul.f32 %v8396_v62, %v8394_v22 }
0x27d8   :  { %v3059_v42 = vmul.f32 %v9453_v49, %v3058_v4 }
0x27da   :  { %v3060_v32 = vsel %vm154_vm1, %v3059_v42, 0.0 }
0x27db   :  { %v3061_v38 = vrot.slane %v3060_v32, 4 }
0x27dd   :  { %v3062_v3 = vadd.f32 %v3061_v38, %v3060_v32 }
0x27df   :  { %v3063_v10 = vrot.slane %v3062_v3, 2 }
0x27e1   :  { %v3064_v44 = vadd.f32 %v3063_v10, %v3062_v3 }
0x27e3   :  { %v3065_v15 = vrot.slane %v3064_v44, 1 }
0x27e5   :  { %v3066_v52 = vadd.f32 %v3065_v15, %v3064_v44 }
0x27e7   :  { %7390 = vmatmul.mubr.msk.f32.vlgmr.msra.gmra.mrb[36].mxu0 %vm154_vm1, %v3066_v52 }
0x27e8   :  { %8069 = vmatpush3.bf16.msra.mxu0 %v9460_v50  ;;  %7411 = vmatprep.mubr.msk.f32.mxu0 %vm8710_vm0, %v8711_v1 }
0x27e9   :  { %8070 = vmatprep.subr.bf16.mxu0 %v8709_v0 }
0x27ec   :  { %8072 = vmatpush3.bf16.msra.mxu0 %v9463_v14 }
0x27ed   :  { %8085 = vmatprep.subr.bf16.mxu0 %v8709_v0 }
0x28ba   :  { %v3144_v56 = vpop.f32.mrb[36].mxu0 }
0x28bb   :  { %v3215_v63 = vadd.f32 %v3214_v39, %v3144_v56  ;;  %v7391_v5 = vpop.f32.mrb[37].mxu0  ;;  %v3225_v39 = vld [vmem:[%s10208_s15] sm:$0x1] }
0x28bd   :  { %v3219_v7 = vadd.f32 %v3218_v60, %v3215_v63 }
0x28bf   :  { %8397 = vtanh.f32 %v3219_v7 }
0x28c9   :  { %v8398_v9 = vpop.eup %8397 }
0x28ca   :  { %7412 = vmatmul.mubr.msk.f32.vlgmr.msra.gmra.mrb[38].mxu0 %vm154_vm1, %v8398_v9 }
0x28cb   :  { %8087 = vmatpush3.bf16.msra.mxu0 %v9324_v53  ;;  %7441 = vmatprep.mubr.msk.f32.mxu0 %vm8710_vm0, %v8711_v1 }
0x28cc   :  { %8088 = vmatprep.subr.bf16.mxu0 %v8709_v0 }
0x28cf   :  { %8090 = vmatpush3.bf16.msra.mxu0 %v9330_v55 }
0x28d0   :  { %8091 = vmatprep.subr.bf16.mxu0 %v8709_v0 }
0x299d   :  { %v3295_v12 = vpop.f32.mrb[38].mxu0 }
0x299e   :  { %v9574_v13 = vadd.f32 %v3295_v12, %v3225_v39  ;;  %v7413_v21 = vpop.f32.mrb[39].mxu0 }
0x29a0   :  { %v3299_v53 = vsel %vm773_vm2, %v9574_v13, -inf }
0x29a1   :  { %3300 = vmax.xlane.f32.xlu0 %v3299_v53 }
0x2a2e   :  { %v9578_v11 = vpop.xlane.xlu0 %3300 }
0x2a2f   :  { %vm3310_vm3 = vcmp.eq.f32.partialorder %v9574_v13, %v9578_v11 }
0x2a30   :  { %v3311_v55 = vsel %vm3310_vm3, %v9085_v23, 64 }
0x2a31   :  { %v3312_v57 = vsel %vm773_vm2, %v3311_v55, 2147483647 }
0x2a32   :  { %v3314_v37 = vshra.s32 %v3312_v57, 16  ;;  %v3313_v22 = vand.u32 65535, %v3312_v57 }
0x2a34   :  { %v3316_v20 = vcvt.s32.f32 %v3314_v37  ;;  %v3315_v40 = vcvt.s32.f32 %v3313_v22 }
0x2a36   :  { %3317 = vmin.xlane.f32.xlu0 %v3316_v20 }
0x2ac3   :  { %v3318_v16 = vpop.xlane.xlu0 %3317 }
0x2ac4   :  { %vm3319_vm4 = vcmp.eq.f32.partialorder %v3316_v20, %v3318_v16  ;;  %v3324_v26 = vcvt.f32.s32 %v3318_v16 }
0x2ac5   :  { %v3320_v8 = vsel %vm3319_vm4, %v3315_v40, inf }
0x2ac6   :  { %3321 = vmin.xlane.f32.xlu1 %v3320_v8  ;;  %v3325_v29 = vshll.u32 %v3324_v26, 16 }
0x2b53   :  { %v3322_v28 = vpop.xlane.xlu1 %3321 }
0x2b54   :  { %v3323_v62 = vcvt.f32.s32 %v3322_v28 }
0x2b56   :  { %v3326_v4 = vadd.s32 %v3325_v29, %v3323_v62 }
0x2b58   :  { %vm3327_vm6 = vcmp.eq.s32.totalorder %v9085_v23, %v3326_v4  ;;  %3403 = vst [vmem:[#allocation13 + $0x4] sm:$0x1] %v3326_v4 }
0x2b59   :  { %v6566_v42 = vsel %vm3327_vm6, 1.0, %v8711_v1 }
0x2b5a   :  { %7431 = vmatmul.mubr.msk.f32.vlgmr.msra.gmra.mrb[30].mxu1 %vm805_vm5, %v6566_v42 }
0x2b5b   :  { %8099 = vmatpush3.bf16.msra.mxu1 %v9381_v58  ;;  %7463 = vmatprep.mubr.msk.f32.mxu1 %vm8710_vm0, %v8711_v1 }
0x2b5c   :  { %8100 = vmatprep.subr.bf16.mxu1 %v8709_v0 }
0x2b5f   :  { %8102 = vmatpush3.bf16.msra.mxu1 %v9387_v61  ;;  %v3487_v61 = vld [vmem:[#allocation5] sm:$0x1] }
0x2b60   :  { %8109 = vmatprep.subr.bf16.mxu1 %v8709_v0 }
0x2c2d   :  { %v3399_v32 = vpop.f32.mrb[30].mxu1 }
0x2c2e   :  { %v7432_v38 = vpop.f32.mrb[31].mxu1  ;;  %7442 = vmatmul.mubr.msk.f32.vlgmr.msra.gmra.mrb[40].mxu0 %vm154_vm1, %v3399_v32 }
0x2c2f   :  { %8093 = vmatpush3.bf16.msra.mxu0 %v9346_v2  ;;  %7452 = vmatprep.mubr.msk.f32.mxu0 %vm8710_vm0, %v8711_v1 }
0x2c30   :  { %8094 = vmatprep.subr.bf16.mxu0 %v8709_v0 }
0x2c33   :  { %8096 = vmatpush3.bf16.msra.mxu0 %v9356_v48 }
0x2c34   :  { %8103 = vmatprep.subr.bf16.mxu0 %v8709_v0 }
0x2c36   :  { %7453 = vmatmul.mubr.msk.f32.vlgmr.msra.gmra.mrb[42].mxu0 %vm154_vm1, %v9526_v41 }
0x2c37   :  { %8105 = vmatpush3.bf16.msra.mxu0 %v9445_v24  ;;  %7474 = vmatprep.mubr.msk.f32.mxu0 %vm8710_vm0, %v8711_v1  ;;  %v3409_v24 = vld [vmem:[%s10198_s5] sm:$0x1] }
0x2c38   :  { %8106 = vmatprep.subr.bf16.mxu0 %v8709_v0 }
0x2c3b   :  { %8108 = vmatpush3.bf16.msra.mxu0 %v9448_v18 }
0x2c3c   :  { %8115 = vmatprep.subr.bf16.mxu0 %v8709_v0 }
0x2d01   :  { %v3479_v2 = vpop.f32.mrb[40].mxu0 }
0x2d02   :  { %v7443_v58 = vpop.f32.mrb[41].mxu0  ;;  %v3480_v41 = vadd.f32 %v3479_v2, %v3409_v24 }
0x2d09   :  { %v3554_v48 = vpop.f32.mrb[42].mxu0 }
0x2d0a   :  { %v3555_v3 = vadd.f32 %v3554_v48, %v3487_v61  ;;  %v7454_v10 = vpop.f32.mrb[43].mxu0 }
0x2d0c   :  { %3566 = vrot.lane.b32.xlu0 %v3555_v3, %s8712_s26  ;;  %v3558_v44 = vadd.f32 %v3555_v3, %v3480_v41 }
0x2d0e   :  { %v6570_v15 = vmul.f32 -1.442695, %v3558_v44 }
0x2d10   :  { %8399 = vpow2.f32 %v6570_v15 }
0x2d1a   :  { %v8400_v52 = vpop.eup %8399 }
0x2d1b   :  { %v3562_v18 = vadd.f32 1.0, %v8400_v52 }
0x2d1d   :  { %8401 = vrcp.f32 %v3562_v18 }
0x2d27   :  { %v8402_v56 = vpop.eup %8401 }
0x2d28   :  { %v3576_v39 = vsub.f32 1.0, %v8402_v56  ;;  %v3582_v21 = vmul.f32 %v8402_v56, %v9522_v36 }
0x2d7e   :  { %v3567_v60 = vpop.permute.xlu0 %3566 }
0x2d7f   :  { %v3569_v63 = vmul.f32 %v8402_v56, %v3567_v60 }
0x2d81   :  { %3571 = vrot.lane.b32.xlu1 %v3569_v63, %s8712_s26 }
0x2df3   :  { %v3572_v5 = vpop.permute.xlu1 %3571 }
0x2df4   :  { %v3574_v7 = vadd.f32 %v3572_v5, %v3480_v41 }
0x2df6   :  { %8403 = vtanh.f32 %v3574_v7 }
0x2e00   :  { %v8404_v9 = vpop.eup %8403 }
0x2e01   :  { %3578 = vrot.lane.b32.xlu1 %v8404_v9, %s8713_s25 }
0x2e73   :  { %v3579_v12 = vpop.permute.xlu1 %3578 }
0x2e74   :  { %v3581_v53 = vmul.f32 %v3579_v12, %v3576_v39  ;;  %v3849_v12 = vld [vmem:[%s10206_s13] sm:$0x1] }
0x2e76   :  { %v9615_v55 = vadd.f32 %v3582_v21, %v3581_v53 }
0x2e78   :  { %3589 = vrot.lane.b32.xlu0 %v9615_v55, %s8713_s25 }
0x2eea   :  { %v9619_v57 = vpop.permute.xlu0 %3589 }
0x2eeb   :  { %7464 = vmatmul.mubr.msk.f32.vlgmr.msra.gmra.mrb[32].mxu1 %vm154_vm1, %v9619_v57 }
0x2eec   :  { %8111 = vmatpush3.bf16.msra.mxu1 %v9404_v54  ;;  %7485 = vmatprep.mubr.msk.f32.mxu1 %vm8710_vm0, %v8711_v1 }
0x2eed   :  { %8112 = vmatprep.subr.bf16.mxu1 %v8709_v0 }
0x2ef0   :  { %8114 = vmatpush3.bf16.msra.mxu1 %v9417_v59 }
0x2ef1   :  { %8121 = vmatprep.subr.bf16.mxu1 %v8709_v0 }
0x2ef3   :  { %7486 = vmatmul.mubr.msk.f32.vlgmr.msra.gmra.mrb[34].mxu1 %vm154_vm1, %v9619_v57 }
0x2ef4   :  { %8123 = vmatpush3.bf16.msra.mxu1 %v9102_v33  ;;  %7515 = vmatprep.mubr.msk.f32.mxu1 %vm8710_vm0, %v8711_v1 }
0x2ef5   :  { %8124 = vmatprep.subr.bf16.mxu1 %v8709_v0 }
0x2ef8   :  { %8126 = vmatpush3.bf16.msra.mxu1 %v9108_v35 }
0x2ef9   :  { %8127 = vmatprep.subr.bf16.mxu1 %v8709_v0 }
0x2efc   :  { %8129 = vmatpush3.bf16.msra.mxu1 %v9119_v43 }
0x2efd   :  { %8130 = vmatprep.subr.bf16.mxu1 %v8709_v0 }
0x2f00   :  { %8132 = vmatpush3.bf16.msra.mxu1 %v9129_v46 }
0x2f01   :  { %8145 = vmatprep.subr.bf16.mxu1 %v8709_v0 }
0x2fbe   :  { %v3659_v54 = vpop.f32.mrb[32].mxu1 }
0x2fbf   :  { %v3666_v59 = vrot.slane %v3659_v54, %v8985_v47  ;;  %v7465_v36 = vpop.f32.mrb[33].mxu1 }
0x2fc1   :  { %v3667_v37 = vadd.f32 %v3666_v59, %v9035_v6 }
0x2fc3   :  { %8405 = vtanh.f32 %v3667_v37 }
0x2fc6   :  { %v3845_v20 = vpop.f32.mrb[34].mxu1 }
0x2fc7   :  { %v7487_v22 = vpop.f32.mrb[35].mxu1 }
0x2fcd   :  { %v8406_v16 = vpop.eup %8405 }
0x2fce   :  { %v3669_v40 = vmul.f32 %v9441_v17, %v8406_v16 }
0x2fd0   :  { %v3670_v8 = vsel %vm154_vm1, %v3669_v40, 0.0 }
0x2fd1   :  { %3671 = vadd.xlane.f32.xlu1 %v3670_v8 }
0x305e   :  { %v3672_v26 = vpop.xlane.xlu1 %3671 }
0x305f   :  { %v3673_v28 = vrot.slane %v3672_v26, 4 }
0x3061   :  { %v3674_v29 = vmax.f32 %v3672_v26, %v3673_v28 }
0x3063   :  { %v3675_v62 = vrot.slane %v3674_v29, 2 }
0x3065   :  { %v3676_v4 = vmax.f32 %v3674_v29, %v3675_v62 }
0x3067   :  { %v3677_v42 = vrot.slane %v3676_v4, 1 }
0x3069   :  { %v3678_v32 = vmax.f32 %v3676_v4, %v3677_v42  ;;  %v4036_v42 = vld [vmem:[%s10196_s3] sm:$0xff] }
0x306b   :  { %v3679_v38 = vsub.f32 %v3672_v26, %v3678_v32  ;;  %v4037_v32 = vld [vmem:[%s10196_s3 + $0x8] sm:$0xff] }
0x306d   :  { %v3680_v2 = vmul.f32 1.442695, %v3679_v38  ;;  %v4038_v38 = vld [vmem:[%s10196_s3 + $0x10] sm:$0xff] }
0x306f   :  { %8407 = vpow2.f32 %v3680_v2  ;;  %v9682_v2 = vpack.c.bf16 %v4037_v32, %v4036_v42  ;;  %v4218_v32 = vld [vmem:[%s10200_s7 + $0x18] sm:$0xff] }
0x3079   :  { %v8408_v58 = vpop.eup %8407 }
0x307a   :  { %v3682_v61 = vrot.slane %v8408_v58, 4 }
0x307c   :  { %v3683_v48 = vadd.f32 %v8408_v58, %v3682_v61 }
0x307e   :  { %v3684_v3 = vrot.slane %v3683_v48, 2 }
0x3080   :  { %v3685_v10 = vadd.f32 %v3684_v3, %v3683_v48 }
0x3082   :  { %v3686_v24 = vrot.slane %v3685_v10, 1 }
0x3084   :  { %v3687_v41 = vadd.f32 %v3686_v24, %v3685_v10 }
0x3086   :  { %8409 = vrcp.f32 %v3687_v41 }
0x3090   :  { %v8410_v44 = vpop.eup %8409 }
0x3091   :  { %v3689_v15 = vmul.f32 %v8410_v44, %v8408_v58  ;;  %v4039_v58 = vld [vmem:[%s10196_s3 + $0x18] sm:$0xff] }
0x3092   :  { %v9688_v61 = vpack.c.bf16 %v4039_v58, %v4038_v38 }
0x3093   :  { %v3690_v52 = vmul.f32 %v9453_v49, %v3689_v15  ;;  %v4114_v15 = vld [vmem:[%s10197_s4] sm:$0xff] }
0x3095   :  { %v3691_v18 = vsel %vm154_vm1, %v3690_v52, 0.0  ;;  %v4115_v52 = vld [vmem:[%s10197_s4 + $0x8] sm:$0xff] }
0x3096   :  { %v3692_v56 = vrot.slane %v3691_v18, 4 }
0x3098   :  { %v3693_v60 = vadd.f32 %v3692_v56, %v3691_v18  ;;  %v9704_v18 = vpack.c.bf16 %v4115_v52, %v4114_v15  ;;  %v4116_v56 = vld [vmem:[%s10197_s4 + $0x10] sm:$0xff]  ;;  %v4330_v15 = vld [vmem:[%s10204_s11 + $0x8] sm:$0xff] }
0x309a   :  { %v3694_v63 = vrot.slane %v3693_v60, 2 }
0x309c   :  { %v3695_v5 = vadd.f32 %v3694_v63, %v3693_v60  ;;  %v4117_v60 = vld [vmem:[%s10197_s4 + $0x18] sm:$0xff] }
0x309e   :  { %v3696_v7 = vrot.slane %v3695_v5, 1 }
0x30a0   :  { %v3697_v9 = vadd.f32 %v3696_v7, %v3695_v5  ;;  %v9714_v7 = vpack.c.bf16 %v4117_v60, %v4116_v56  ;;  %v4332_v56 = vld [vmem:[%s10204_s11 + $0x18] sm:$0xff] }
0x30a2   :  { %7475 = vmatmul.mubr.msk.f32.vlgmr.msra.gmra.mrb[44].mxu0 %vm154_vm1, %v3697_v9 }
0x30a3   :  { %8117 = vmatpush3.bf16.msra.mxu0 %v9460_v50  ;;  %7496 = vmatprep.mubr.msk.f32.mxu0 %vm8710_vm0, %v8711_v1  ;;  %v3856_v50 = vld [vmem:[%s10208_s15] sm:$0x1] }
0x30a4   :  { %8118 = vmatprep.subr.bf16.mxu0 %v8709_v0 }
0x30a7   :  { %8120 = vmatpush3.bf16.msra.mxu0 %v9463_v14 }
0x30a8   :  { %8133 = vmatprep.subr.bf16.mxu0 %v8709_v0 }
0x3175   :  { %v3775_v39 = vpop.f32.mrb[44].mxu0 }
0x3176   :  { %v3846_v21 = vadd.f32 %v3845_v20, %v3775_v39  ;;  %v7476_v53 = vpop.f32.mrb[45].mxu0 }
0x3178   :  { %v3850_v54 = vadd.f32 %v3849_v12, %v3846_v21  ;;  %v4118_v12 = vld [vmem:[#allocation5] sm:$0x1] }
0x317a   :  { %8411 = vtanh.f32 %v3850_v54 }
0x3184   :  { %v8412_v59 = vpop.eup %8411 }
0x3185   :  { %7497 = vmatmul.mubr.msk.f32.vlgmr.msra.gmra.mrb[46].mxu0 %vm154_vm1, %v8412_v59  ;;  %v4040_v59 = vld [vmem:[%s10198_s5] sm:$0x1] }
0x3186   :  { %7526 = vmatprep.mubr.msk.f32.mxu0 %vm8710_vm0, %v8711_v1  ;;  %8135 = vmatpush3.bf16.msra.mxu0 %v9682_v2 }
0x3187   :  { %8136 = vmatprep.subr.bf16.mxu0 %v8709_v0 }
0x318a   :  { %8138 = vmatpush3.bf16.msra.mxu0 %v9688_v61 }
0x318b   :  { %8139 = vmatprep.subr.bf16.mxu0 %v8709_v0 }
0x3258   :  { %v3926_v14 = vpop.f32.mrb[46].mxu0 }
0x3259   :  { %v9663_v36 = vadd.f32 %v3926_v14, %v3856_v50  ;;  %v7498_v37 = vpop.f32.mrb[47].mxu0 }
0x325b   :  { %v3930_v20 = vsel %vm773_vm2, %v9663_v36, -inf }
0x325c   :  { %3931 = vmax.xlane.f32.xlu0 %v3930_v20 }
0x32e9   :  { %v9667_v22 = vpop.xlane.xlu0 %3931 }
0x32ea   :  { %vm3941_vm7 = vcmp.eq.f32.partialorder %v9663_v36, %v9667_v22 }
0x32eb   :  { %v3942_v16 = vsel %vm3941_vm7, %v9085_v23, 64 }
0x32ec   :  { %v3943_v40 = vsel %vm773_vm2, %v3942_v16, 2147483647 }
0x32ed   :  { %v3945_v8 = vshra.s32 %v3943_v40, 16  ;;  %v3944_v28 = vand.u32 65535, %v3943_v40 }
0x32ef   :  { %v3947_v26 = vcvt.s32.f32 %v3945_v8  ;;  %v3946_v62 = vcvt.s32.f32 %v3944_v28 }
0x32f1   :  { %3948 = vmin.xlane.f32.xlu0 %v3947_v26 }
0x337e   :  { %v3949_v29 = vpop.xlane.xlu0 %3948 }
0x337f   :  { %vm3950_vm8 = vcmp.eq.f32.partialorder %v3947_v26, %v3949_v29  ;;  %v3955_v48 = vcvt.f32.s32 %v3949_v29  ;;  %v4215_v29 = vld [vmem:[%s10200_s7] sm:$0xff] }
0x3380   :  { %v3951_v4 = vsel %vm3950_vm8, %v3946_v62, inf  ;;  %v4216_v62 = vld [vmem:[%s10200_s7 + $0x8] sm:$0xff] }
0x3381   :  { %3952 = vmin.xlane.f32.xlu1 %v3951_v4  ;;  %v3956_v10 = vshll.u32 %v3955_v48, 16  ;;  %v4217_v4 = vld [vmem:[%s10200_s7 + $0x10] sm:$0xff]  ;;  %v9739_v42 = vpack.c.bf16 %v4216_v62, %v4215_v29 }
0x3382   :  { %v9745_v38 = vpack.c.bf16 %v4218_v32, %v4217_v4 }
0x340e   :  { %v3953_v3 = vpop.xlane.xlu1 %3952 }
0x340f   :  { %v3954_v24 = vcvt.f32.s32 %v3953_v3 }
0x3411   :  { %v3957_v41 = vadd.s32 %v3956_v10, %v3954_v24 }
0x3413   :  { %vm3958_vm9 = vcmp.eq.s32.totalorder %v9085_v23, %v3957_v41  ;;  %4034 = vst [vmem:[#allocation13 + $0x5] sm:$0x1] %v3957_v41 }
0x3414   :  { %v6575_v44 = vsel %vm3958_vm9, 1.0, %v8711_v1 }
0x3415   :  { %7516 = vmatmul.mubr.msk.f32.vlgmr.msra.gmra.mrb[36].mxu1 %vm805_vm5, %v6575_v44  ;;  %v4329_v44 = vld [vmem:[%s10204_s11] sm:$0xff] }
0x3416   :  { %7548 = vmatprep.mubr.msk.f32.mxu1 %vm8710_vm0, %v8711_v1  ;;  %8147 = vmatpush3.bf16.msra.mxu1 %v9739_v42  ;;  %v9762_v52 = vpack.c.bf16 %v4330_v15, %v4329_v44 }
0x3417   :  { %8148 = vmatprep.subr.bf16.mxu1 %v8709_v0 }
0x341a   :  { %8150 = vmatpush3.bf16.msra.mxu1 %v9745_v38 }
0x341b   :  { %8157 = vmatprep.subr.bf16.mxu1 %v8709_v0 }
0x34e8   :  { %v4030_v63 = vpop.f32.mrb[36].mxu1 }
0x34e9   :  { %v7517_v5 = vpop.f32.mrb[37].mxu1  ;;  %7527 = vmatmul.mubr.msk.f32.vlgmr.msra.gmra.mrb[48].mxu0 %vm154_vm1, %v4030_v63 }
0x34ea   :  { %8141 = vmatpush3.bf16.msra.mxu0 %v9704_v18  ;;  %7537 = vmatprep.mubr.msk.f32.mxu0 %vm8710_vm0, %v8711_v1 }
0x34eb   :  { %8142 = vmatprep.subr.bf16.mxu0 %v8709_v0 }
0x34ee   :  { %8144 = vmatpush3.bf16.msra.mxu0 %v9714_v7 }
0x34ef   :  { %8151 = vmatprep.subr.bf16.mxu0 %v8709_v0 }
0x34f1   :  { %7538 = vmatmul.mubr.msk.f32.vlgmr.msra.gmra.mrb[50].mxu0 %vm154_vm1, %v9619_v57 }
0x34f2   :  { %7559 = vmatprep.mubr.msk.f32.mxu0 %vm8710_vm0, %v8711_v1 }
0x35bc   :  { %v4110_v9 = vpop.f32.mrb[48].mxu0 }
0x35bd   :  { %v7528_v39 = vpop.f32.mrb[49].mxu0  ;;  %v4111_v50 = vadd.f32 %v4110_v9, %v4040_v59 }
0x35c4   :  { %v4185_v21 = vpop.f32.mrb[50].mxu0 }
0x35c5   :  { %v4186_v53 = vadd.f32 %v4185_v21, %v4118_v12  ;;  %v7539_v54 = vpop.f32.mrb[51].mxu0 }
0x35c7   :  { %4197 = vrot.lane.b32.xlu0 %v4186_v53, %s8712_s26  ;;  %v4189_v14 = vadd.f32 %v4186_v53, %v4111_v50 }
0x35c9   :  { %v6579_v37 = vmul.f32 -1.442695, %v4189_v14  ;;  %v4333_v14 = vld [vmem:[#allocation10] sm:$0xff] }
0x35cb   :  { %8413 = vpow2.f32 %v6579_v37  ;;  %v4334_v37 = vld [vmem:[#allocation10 + $0x8] sm:$0xff] }
0x35d5   :  { %v8414_v57 = vpop.eup %8413 }
0x35d6   :  { %v4193_v20 = vadd.f32 1.0, %v8414_v57  ;;  %v4335_v57 = vld [vmem:[#allocation10 + $0x10] sm:$0xff] }
0x35d8   :  { %8415 = vrcp.f32 %v4193_v20  ;;  %v9798_v20 = vpack.c.bf16 %v4334_v37, %v4333_v14  ;;  %v4483_v37 = vld [vmem:[#allocation11] sm:$0xff] }
0x35da   :  { %8153 = vmatpush3.bf16.msra.mxu0 %v9798_v20 }
0x35db   :  { %8154 = vmatprep.subr.bf16.mxu0 %v8709_v0 }
0x35e2   :  { %v8416_v16 = vpop.eup %8415 }
0x35e3   :  { %v4207_v48 = vsub.f32 1.0, %v8416_v16  ;;  %v4213_v10 = vmul.f32 %v8416_v16, %v9615_v55  ;;  %v4331_v55 = vld [vmem:[%s10204_s11 + $0x10] sm:$0xff] }
0x35e4   :  { %v9775_v63 = vpack.c.bf16 %v4332_v56, %v4331_v55 }
0x3639   :  { %v4198_v40 = vpop.permute.xlu0 %4197 }
0x363a   :  { %v4200_v8 = vmul.f32 %v8416_v16, %v4198_v40  ;;  %v4336_v16 = vld [vmem:[#allocation10 + $0x18] sm:$0xff] }
0x363b   :  { %v9801_v40 = vpack.c.bf16 %v4336_v16, %v4335_v57  ;;  %v4484_v57 = vld [vmem:[#allocation11 + $0x8] sm:$0xff]  ;;  %v4485_v16 = vld [vmem:[#allocation11 + $0x10] sm:$0xff] }
0x363c   :  { %4202 = vrot.lane.b32.xlu1 %v4200_v8, %s8712_s26 }
0x363d   :  { %8156 = vmatpush3.bf16.msra.mxu0 %v9801_v40 }
0x363e   :  { %8163 = vmatprep.subr.bf16.mxu0 %v8709_v0 }
0x36ae   :  { %v4203_v26 = vpop.permute.xlu1 %4202 }
0x36af   :  { %v4205_v28 = vadd.f32 %v4203_v26, %v4111_v50 }
0x36b1   :  { %8417 = vtanh.f32 %v4205_v28 }
0x36bb   :  { %v8418_v58 = vpop.eup %8417 }
0x36bc   :  { %4209 = vrot.lane.b32.xlu1 %v8418_v58, %s8713_s25 }
0x372e   :  { %v4210_v3 = vpop.permute.xlu1 %4209 }
0x372f   :  { %v4212_v24 = vmul.f32 %v4210_v3, %v4207_v48 }
0x3731   :  { %v9752_v41 = vadd.f32 %v4213_v10, %v4212_v24 }
0x3733   :  { %4220 = vrot.lane.b32.xlu0 %v9752_v41, %s8713_s25 }
0x37a5   :  { %v9770_v60 = vpop.permute.xlu0 %4220 }
0x37a6   :  { %7549 = vmatmul.mubr.msk.f32.vlgmr.msra.gmra.mrb[38].mxu1 %vm154_vm1, %v9770_v60 }
0x37a7   :  { %8159 = vmatpush3.bf16.msra.mxu1 %v9762_v52  ;;  %7570 = vmatprep.mubr.msk.f32.mxu1 %vm8710_vm0, %v8711_v1 }
0x37a8   :  { %8160 = vmatprep.subr.bf16.mxu1 %v8709_v0 }
0x37ab   :  { %8162 = vmatpush3.bf16.msra.mxu1 %v9775_v63 }
0x37ac   :  { %8169 = vmatprep.subr.bf16.mxu1 %v8709_v0 }
0x37ae   :  { %7571 = vmatmul.mubr.msk.f32.vlgmr.msra.gmra.mrb[40].mxu1 %vm154_vm1, %v9770_v60 }
0x37af   :  { %8171 = vmatpush3.bf16.msra.mxu1 %v9102_v33  ;;  %7600 = vmatprep.mubr.msk.f32.mxu1 %vm8710_vm0, %v8711_v1 }
0x37b0   :  { %8172 = vmatprep.subr.bf16.mxu1 %v8709_v0 }
0x37b3   :  { %8174 = vmatpush3.bf16.msra.mxu1 %v9108_v35 }
0x37b4   :  { %8175 = vmatprep.subr.bf16.mxu1 %v8709_v0 }
0x37b7   :  { %8177 = vmatpush3.bf16.msra.mxu1 %v9119_v43 }
0x37b8   :  { %8178 = vmatprep.subr.bf16.mxu1 %v8709_v0 }
0x37bb   :  { %8180 = vmatpush3.bf16.msra.mxu1 %v9129_v46 }
0x37bc   :  { %8193 = vmatprep.subr.bf16.mxu1 %v8709_v0 }
0x3879   :  { %v4290_v5 = vpop.f32.mrb[38].mxu1 }
0x387a   :  { %v4297_v9 = vrot.slane %v4290_v5, %v8985_v47  ;;  %v7550_v39 = vpop.f32.mrb[39].mxu1 }
0x387c   :  { %v4298_v12 = vadd.f32 %v4297_v9, %v9035_v6 }
0x387e   :  { %8419 = vtanh.f32 %v4298_v12 }
0x3881   :  { %v4476_v21 = vpop.f32.mrb[40].mxu1 }
0x3882   :  { %v7572_v53 = vpop.f32.mrb[41].mxu1 }
0x3888   :  { %v8420_v54 = vpop.eup %8419 }
0x3889   :  { %v4300_v59 = vmul.f32 %v9441_v17, %v8420_v54 }
0x388b   :  { %v4301_v50 = vsel %vm154_vm1, %v4300_v59, 0.0 }
0x388c   :  { %4302 = vadd.xlane.f32.xlu1 %v4301_v50 }
0x3919   :  { %v4303_v17 = vpop.xlane.xlu1 %4302 }
0x391a   :  { %v4304_v8 = vrot.slane %v4303_v17, 4 }
0x391c   :  { %v4305_v26 = vmax.f32 %v4303_v17, %v4304_v8  ;;  %v4486_v8 = vld [vmem:[#allocation11 + $0x18] sm:$0xff] }
0x391e   :  { %v4306_v28 = vrot.slane %v4305_v26, 2 }
0x3920   :  { %v4307_v29 = vmax.f32 %v4305_v26, %v4306_v28  ;;  %v4480_v28 = vld [vmem:[%s10206_s13] sm:$0x1] }
0x3922   :  { %v4308_v62 = vrot.slane %v4307_v29, 1 }
0x3924   :  { %v4309_v4 = vmax.f32 %v4307_v29, %v4308_v62 }
0x3926   :  { %v4310_v32 = vsub.f32 %v4303_v17, %v4309_v4  ;;  %v9811_v17 = vpack.c.bf16 %v4484_v57, %v4483_v37 }
0x3928   :  { %v4311_v58 = vmul.f32 1.442695, %v4310_v32 }
0x392a   :  { %8421 = vpow2.f32 %v4311_v58 }
0x3934   :  { %v8422_v48 = vpop.eup %8421 }
0x3935   :  { %v4313_v3 = vrot.slane %v8422_v48, 4 }
0x3937   :  { %v4314_v10 = vadd.f32 %v8422_v48, %v4313_v3 }
0x3939   :  { %v4315_v24 = vrot.slane %v4314_v10, 2 }
0x393b   :  { %v4316_v44 = vadd.f32 %v4315_v24, %v4314_v10 }
0x393d   :  { %v4317_v15 = vrot.slane %v4316_v44, 1 }
0x393f   :  { %v4318_v55 = vadd.f32 %v4317_v15, %v4316_v44 }
0x3941   :  { %8423 = vrcp.f32 %v4318_v55 }
0x394b   :  { %v8424_v56 = vpop.eup %8423 }
0x394c   :  { %v4320_v5 = vmul.f32 %v8424_v56, %v8422_v48 }
0x394e   :  { %v4321_v9 = vmul.f32 %v9453_v49, %v4320_v5  ;;  %v9814_v49 = vpack.c.bf16 %v4486_v8, %v4485_v16 }
0x3950   :  { %v4322_v39 = vsel %vm154_vm1, %v4321_v9, 0.0 }
0x3951   :  { %v4323_v12 = vrot.slane %v4322_v39, 4 }
0x3953   :  { %v4324_v53 = vadd.f32 %v4323_v12, %v4322_v39 }
0x3955   :  { %v4325_v54 = vrot.slane %v4324_v53, 2 }
0x3957   :  { %v4326_v59 = vadd.f32 %v4325_v54, %v4324_v53 }
0x3959   :  { %v4327_v50 = vrot.slane %v4326_v59, 1 }
0x395b   :  { %v4328_v14 = vadd.f32 %v4327_v50, %v4326_v59 }
0x395d   :  { %7560 = vmatmul.mubr.msk.f32.vlgmr.msra.gmra.mrb[52].mxu0 %vm154_vm1, %v4328_v14 }
0x395e   :  { %7581 = vmatprep.mubr.msk.f32.mxu0 %vm8710_vm0, %v8711_v1  ;;  %8165 = vmatpush3.bf16.msra.mxu0 %v9811_v17 }
0x395f   :  { %8166 = vmatprep.subr.bf16.mxu0 %v8709_v0 }
0x3962   :  { %8168 = vmatpush3.bf16.msra.mxu0 %v9814_v49 }
0x3963   :  { %8181 = vmatprep.subr.bf16.mxu0 %v8709_v0 }
0x3a30   :  { %v4406_v26 = vpop.f32.mrb[52].mxu0 }
0x3a31   :  { %v4477_v29 = vadd.f32 %v4476_v21, %v4406_v26  ;;  %v7561_v62 = vpop.f32.mrb[53].mxu0  ;;  %v4487_v21 = vld [vmem:[%s10208_s15] sm:$0x1] }
0x3a33   :  { %v4481_v4 = vadd.f32 %v4480_v28, %v4477_v29  ;;  %v4749_v28 = vld [vmem:[#allocation5] sm:$0x1] }
0x3a35   :  { %8425 = vtanh.f32 %v4481_v4 }
0x3a3f   :  { %v8426_v32 = vpop.eup %8425 }
0x3a40   :  { %7582 = vmatmul.mubr.msk.f32.vlgmr.msra.gmra.mrb[54].mxu0 %vm154_vm1, %v8426_v32 }
0x3a41   :  { %8183 = vmatpush3.bf16.msra.mxu0 %v9682_v2  ;;  %7611 = vmatprep.mubr.msk.f32.mxu0 %vm8710_vm0, %v8711_v1 }
0x3a42   :  { %8184 = vmatprep.subr.bf16.mxu0 %v8709_v0 }
0x3a45   :  { %8186 = vmatpush3.bf16.msra.mxu0 %v9688_v61 }
0x3a46   :  { %8187 = vmatprep.subr.bf16.mxu0 %v8709_v0 }
0x3b13   :  { %v4557_v58 = vpop.f32.mrb[54].mxu0 }
0x3b14   :  { %v9832_v48 = vadd.f32 %v4557_v58, %v4487_v21  ;;  %v7583_v3 = vpop.f32.mrb[55].mxu0 }
0x3b16   :  { %v4561_v10 = vsel %vm773_vm2, %v9832_v48, -inf }
0x3b17   :  { %4562 = vmax.xlane.f32.xlu0 %v4561_v10 }
0x3ba4   :  { %v9836_v24 = vpop.xlane.xlu0 %4562 }
0x3ba5   :  { %vm4572_vm10 = vcmp.eq.f32.partialorder %v9832_v48, %v9836_v24 }
0x3ba6   :  { %v4573_v44 = vsel %vm4572_vm10, %v9085_v23, 64 }
0x3ba7   :  { %v4574_v15 = vsel %vm773_vm2, %v4573_v44, 2147483647 }
0x3ba8   :  { %v4576_v55 = vshra.s32 %v4574_v15, 16  ;;  %v4575_v5 = vand.u32 65535, %v4574_v15 }
0x3baa   :  { %v4578_v56 = vcvt.s32.f32 %v4576_v55  ;;  %v4577_v39 = vcvt.s32.f32 %v4575_v5 }
0x3bac   :  { %4579 = vmin.xlane.f32.xlu0 %v4578_v56 }
0x3c39   :  { %v4580_v9 = vpop.xlane.xlu0 %4579 }
0x3c3a   :  { %vm4581_vm11 = vcmp.eq.f32.partialorder %v4578_v56, %v4580_v9  ;;  %v4586_v53 = vcvt.f32.s32 %v4580_v9 }
0x3c3b   :  { %v4582_v12 = vsel %vm4581_vm11, %v4577_v39, inf }
0x3c3c   :  { %4583 = vmin.xlane.f32.xlu1 %v4582_v12  ;;  %v4587_v59 = vshll.u32 %v4586_v53, 16 }
0x3cc9   :  { %v4584_v54 = vpop.xlane.xlu1 %4583 }
0x3cca   :  { %v4585_v50 = vcvt.f32.s32 %v4584_v54 }
0x3ccc   :  { %v4588_v14 = vadd.s32 %v4587_v59, %v4585_v50 }
0x3cce   :  { %vm4589_vm12 = vcmp.eq.s32.totalorder %v9085_v23, %v4588_v14  ;;  %4665 = vst [vmem:[#allocation13 + $0x6] sm:$0x1] %v4588_v14 }
0x3ccf   :  { %v6584_v37 = vsel %vm4589_vm12, 1.0, %v8711_v1 }
0x3cd0   :  { %7601 = vmatmul.mubr.msk.f32.vlgmr.msra.gmra.mrb[42].mxu1 %vm805_vm5, %v6584_v37 }
0x3cd1   :  { %8195 = vmatpush3.bf16.msra.mxu1 %v9739_v42  ;;  %7633 = vmatprep.mubr.msk.f32.mxu1 %vm8710_vm0, %v8711_v1 }
0x3cd2   :  { %8196 = vmatprep.subr.bf16.mxu1 %v8709_v0 }
0x3cd5   :  { %8198 = vmatpush3.bf16.msra.mxu1 %v9745_v38 }
0x3cd6   :  { %8205 = vmatprep.subr.bf16.mxu1 %v8709_v0 }
0x3da3   :  { %v4661_v57 = vpop.f32.mrb[42].mxu1 }
0x3da4   :  { %v7602_v16 = vpop.f32.mrb[43].mxu1  ;;  %7612 = vmatmul.mubr.msk.f32.vlgmr.msra.gmra.mrb[56].mxu0 %vm154_vm1, %v4661_v57 }
0x3da5   :  { %8189 = vmatpush3.bf16.msra.mxu0 %v9704_v18  ;;  %7622 = vmatprep.mubr.msk.f32.mxu0 %vm8710_vm0, %v8711_v1 }
0x3da6   :  { %8190 = vmatprep.subr.bf16.mxu0 %v8709_v0 }
0x3da9   :  { %8192 = vmatpush3.bf16.msra.mxu0 %v9714_v7 }
0x3daa   :  { %8199 = vmatprep.subr.bf16.mxu0 %v8709_v0 }
0x3dac   :  { %7623 = vmatmul.mubr.msk.f32.vlgmr.msra.gmra.mrb[58].mxu0 %vm154_vm1, %v9770_v60  ;;  %v4671_v60 = vld [vmem:[%s10198_s5] sm:$0x1] }
0x3dad   :  { %8201 = vmatpush3.bf16.msra.mxu0 %v9798_v20  ;;  %7644 = vmatprep.mubr.msk.f32.mxu0 %vm8710_vm0, %v8711_v1 }
0x3dae   :  { %8202 = vmatprep.subr.bf16.mxu0 %v8709_v0 }
0x3db1   :  { %8204 = vmatpush3.bf16.msra.mxu0 %v9801_v40 }
0x3db2   :  { %8211 = vmatprep.subr.bf16.mxu0 %v8709_v0 }
0x3e77   :  { %v4741_v8 = vpop.f32.mrb[56].mxu0 }
0x3e78   :  { %v7613_v26 = vpop.f32.mrb[57].mxu0  ;;  %v4742_v32 = vadd.f32 %v4741_v8, %v4671_v60 }
0x3e7f   :  { %v4816_v29 = vpop.f32.mrb[58].mxu0 }
0x3e80   :  { %v4817_v62 = vadd.f32 %v4816_v29, %v4749_v28  ;;  %v7624_v4 = vpop.f32.mrb[59].mxu0  ;;  %v9904_v28 = vld [vmem:[%s10203_s10] ss:$0 sm:$0xff] }
0x3e82   :  { %4828 = vrot.lane.b32.xlu0 %v4817_v62, %s8712_s26  ;;  %v4820_v21 = vadd.f32 %v4817_v62, %v4742_v32 }
0x3e84   :  { %v6588_v58 = vmul.f32 -1.442695, %v4820_v21 }
0x3e86   :  { %8427 = vpow2.f32 %v6588_v58 }
0x3e90   :  { %v8428_v3 = vpop.eup %8427 }
0x3e91   :  { %v4824_v10 = vadd.f32 1.0, %v8428_v3 }
0x3e93   :  { %8429 = vrcp.f32 %v4824_v10 }
0x3e9d   :  { %v8430_v44 = vpop.eup %8429 }
0x3e9e   :  { %v4838_v39 = vsub.f32 1.0, %v8430_v44  ;;  %v4844_v53 = vmul.f32 %v8430_v44, %v9752_v41 }
0x3ef4   :  { %v4829_v15 = vpop.permute.xlu0 %4828 }
0x3ef5   :  { %v4831_v55 = vmul.f32 %v8430_v44, %v4829_v15 }
0x3ef7   :  { %4833 = vrot.lane.b32.xlu1 %v4831_v55, %s8712_s26 }
0x3f69   :  { %v4834_v56 = vpop.permute.xlu1 %4833 }
0x3f6a   :  { %v4836_v5 = vadd.f32 %v4834_v56, %v4742_v32 }
0x3f6c   :  { %8431 = vtanh.f32 %v4836_v5 }
0x3f76   :  { %v8432_v9 = vpop.eup %8431 }
0x3f77   :  { %4840 = vrot.lane.b32.xlu1 %v8432_v9, %s8713_s25 }
0x3fe9   :  { %v4841_v12 = vpop.permute.xlu1 %4840 }
0x3fea   :  { %v4843_v54 = vmul.f32 %v4841_v12, %v4838_v39 }
0x3fec   :  { %v9873_v59 = vadd.f32 %v4844_v53, %v4843_v54 }
0x3fee   :  { %4851 = vrot.lane.b32.xlu0 %v9873_v59, %s8713_s25 }
0x4060   :  { %v9877_v50 = vpop.permute.xlu0 %4851 }
0x4061   :  { %7634 = vmatmul.mubr.msk.f32.vlgmr.msra.gmra.mrb[44].mxu1 %vm154_vm1, %v9877_v50 }
0x4062   :  { %8207 = vmatpush3.bf16.msra.mxu1 %v9762_v52  ;;  %7655 = vmatprep.mubr.msk.f32.mxu1 %vm8710_vm0, %v8711_v1 }
0x4063   :  { %8208 = vmatprep.subr.bf16.mxu1 %v8709_v0 }
0x4066   :  { %8210 = vmatpush3.bf16.msra.mxu1 %v9775_v63 }
0x4067   :  { %8217 = vmatprep.subr.bf16.mxu1 %v8709_v0 }
0x4069   :  { %7656 = vmatmul.mubr.msk.f32.vlgmr.msra.gmra.mrb[46].mxu1 %vm154_vm1, %v9877_v50 }
0x406a   :  { %8219 = vmatpush3.bf16.msra.mxu1 %v9102_v33  ;;  %7685 = vmatprep.mubr.msk.f32.mxu1 %vm8710_vm0, %v8711_v1 }
0x406b   :  { %8220 = vmatprep.subr.bf16.mxu1 %v8709_v0 }
0x406e   :  { %8222 = vmatpush3.bf16.msra.mxu1 %v9108_v35 }
0x406f   :  { %8223 = vmatprep.subr.bf16.mxu1 %v8709_v0 }
0x4072   :  { %8225 = vmatpush3.bf16.msra.mxu1 %v9119_v43 }
0x4073   :  { %8226 = vmatprep.subr.bf16.mxu1 %v8709_v0 }
0x4076   :  { %8228 = vmatpush3.bf16.msra.mxu1 %v9129_v46 }
0x4077   :  { %8241 = vmatprep.subr.bf16.mxu1 %v8709_v0 }
0x4134   :  { %v4921_v41 = vpop.f32.mrb[44].mxu1 }
0x4135   :  { %v4928_v14 = vrot.slane %v4921_v41, %v8985_v47  ;;  %v7635_v37 = vpop.f32.mrb[45].mxu1 }
0x4137   :  { %v4929_v57 = vadd.f32 %v4928_v14, %v9035_v6  ;;  %v9908_v14 = vld [vmem:[#allocation2] sm:$0xff] }
0x4139   :  { %8433 = vtanh.f32 %v4929_v57 }
0x413c   :  { %v5107_v16 = vpop.f32.mrb[46].mxu1 }
0x413d   :  { %v7657_v8 = vpop.f32.mrb[47].mxu1 }
0x4143   :  { %v8434_v26 = vpop.eup %8433 }
0x4144   :  { %v4931_v29 = vmul.f32 %v9904_v28, %v8434_v26 }
0x4146   :  { %v4932_v62 = vsel %vm154_vm1, %v4931_v29, 0.0 }
0x4147   :  { %4933 = vadd.xlane.f32.xlu1 %v4932_v62 }
0x41d4   :  { %v4934_v4 = vpop.xlane.xlu1 %4933 }
0x41d5   :  { %v4935_v60 = vrot.slane %v4934_v4, 4 }
0x41d7   :  { %v4936_v32 = vmax.f32 %v4934_v4, %v4935_v60 }
0x41d9   :  { %v4937_v21 = vrot.slane %v4936_v32, 2 }
0x41db   :  { %v4938_v58 = vmax.f32 %v4936_v32, %v4937_v21  ;;  %v5111_v21 = vld [vmem:[%s10206_s13] sm:$0x1] }
0x41dd   :  { %v4939_v3 = vrot.slane %v4938_v58, 1 }
0x41df   :  { %v4940_v10 = vmax.f32 %v4938_v58, %v4939_v3 }
0x41e1   :  { %v4941_v44 = vsub.f32 %v4934_v4, %v4940_v10 }
0x41e3   :  { %v4942_v15 = vmul.f32 1.442695, %v4941_v44 }
0x41e5   :  { %8435 = vpow2.f32 %v4942_v15 }
0x41ef   :  { %v8436_v55 = vpop.eup %8435 }
0x41f0   :  { %v4944_v56 = vrot.slane %v8436_v55, 4 }
0x41f2   :  { %v4945_v5 = vadd.f32 %v8436_v55, %v4944_v56 }
0x41f4   :  { %v4946_v9 = vrot.slane %v4945_v5, 2 }
0x41f6   :  { %v4947_v39 = vadd.f32 %v4946_v9, %v4945_v5 }
0x41f8   :  { %v4948_v12 = vrot.slane %v4947_v39, 1 }
0x41fa   :  { %v4949_v53 = vadd.f32 %v4948_v12, %v4947_v39 }
0x41fc   :  { %8437 = vrcp.f32 %v4949_v53 }
0x4206   :  { %v8438_v54 = vpop.eup %8437 }
0x4207   :  { %v4951_v41 = vmul.f32 %v8438_v54, %v8436_v55 }
0x4209   :  { %v4952_v37 = vmul.f32 %v9908_v14, %v4951_v41 }
0x420b   :  { %v4953_v57 = vsel %vm154_vm1, %v4952_v37, 0.0 }
0x420c   :  { %v4954_v8 = vrot.slane %v4953_v57, 4 }
0x420e   :  { %v4955_v26 = vadd.f32 %v4954_v8, %v4953_v57 }
0x4210   :  { %v4956_v29 = vrot.slane %v4955_v26, 2 }
0x4212   :  { %v4957_v62 = vadd.f32 %v4956_v29, %v4955_v26 }
0x4214   :  { %v4958_v4 = vrot.slane %v4957_v62, 1 }
0x4216   :  { %v4959_v60 = vadd.f32 %v4958_v4, %v4957_v62 }
0x4218   :  { %7645 = vmatmul.mubr.msk.f32.vlgmr.msra.gmra.mrb[60].mxu0 %vm154_vm1, %v4959_v60 }
0x4219   :  { %8213 = vmatpush3.bf16.msra.mxu0 %v9811_v17  ;;  %7666 = vmatprep.mubr.msk.f32.mxu0 %vm8710_vm0, %v8711_v1 }
0x421a   :  { %8214 = vmatprep.subr.bf16.mxu0 %v8709_v0 }
0x421d   :  { %8216 = vmatpush3.bf16.msra.mxu0 %v9814_v49 }
0x421e   :  { %8229 = vmatprep.subr.bf16.mxu0 %v8709_v0 }
0x42eb   :  { %v5037_v32 = vpop.f32.mrb[60].mxu0 }
0x42ec   :  { %v5108_v58 = vadd.f32 %v5107_v16, %v5037_v32  ;;  %v7646_v3 = vpop.f32.mrb[61].mxu0  ;;  %v5118_v16 = vld [vmem:[%s10208_s15] sm:$0x1] }
0x42ee   :  { %v5112_v10 = vadd.f32 %v5111_v21, %v5108_v58 }
0x42f0   :  { %8439 = vtanh.f32 %v5112_v10 }
0x42fa   :  { %v8440_v44 = vpop.eup %8439 }
0x42fb   :  { %7667 = vmatmul.mubr.msk.f32.vlgmr.msra.gmra.mrb[62].mxu0 %vm154_vm1, %v8440_v44 }
0x42fc   :  { %8231 = vmatpush3.bf16.msra.mxu0 %v9682_v2  ;;  %7696 = vmatprep.mubr.msk.f32.mxu0 %vm8710_vm0, %v8711_v1 }
0x42fd   :  { %8232 = vmatprep.subr.bf16.mxu0 %v8709_v0 }
0x4300   :  { %8234 = vmatpush3.bf16.msra.mxu0 %v9688_v61 }
0x4301   :  { %8235 = vmatprep.subr.bf16.mxu0 %v8709_v0 }
0x43ce   :  { %v5188_v15 = vpop.f32.mrb[62].mxu0 }
0x43cf   :  { %v9932_v55 = vadd.f32 %v5188_v15, %v5118_v16  ;;  %v7668_v56 = vpop.f32.mrb[63].mxu0 }
0x43d1   :  { %v5192_v2 = vsel %vm773_vm2, %v9932_v55, -inf }
0x43d2   :  { %5193 = vmax.xlane.f32.xlu0 %v5192_v2 }
0x445f   :  { %v9936_v5 = vpop.xlane.xlu0 %5193 }
0x4460   :  { %vm5203_vm13 = vcmp.eq.f32.partialorder %v9932_v55, %v9936_v5 }
0x4461   :  { %v5204_v61 = vsel %vm5203_vm13, %v9085_v23, 64 }
0x4462   :  { %v5205_v9 = vsel %vm773_vm2, %v5204_v61, 2147483647 }
0x4463   :  { %v5207_v39 = vshra.s32 %v5205_v9, 16  ;;  %v5206_v53 = vand.u32 65535, %v5205_v9 }
0x4465   :  { %v5209_v12 = vcvt.s32.f32 %v5207_v39  ;;  %v5208_v41 = vcvt.s32.f32 %v5206_v53 }
0x4467   :  { %5210 = vmin.xlane.f32.xlu0 %v5209_v12 }
0x44f4   :  { %v5211_v54 = vpop.xlane.xlu0 %5210 }
0x44f5   :  { %vm5212_vm14 = vcmp.eq.f32.partialorder %v5209_v12, %v5211_v54  ;;  %v5217_v57 = vcvt.f32.s32 %v5211_v54 }
0x44f6   :  { %v5213_v37 = vsel %vm5212_vm14, %v5208_v41, inf }
0x44f7   :  { %5214 = vmin.xlane.f32.xlu1 %v5213_v37  ;;  %v5218_v26 = vshll.u32 %v5217_v57, 16 }
0x4584   :  { %v5215_v8 = vpop.xlane.xlu1 %5214 }
0x4585   :  { %v5216_v29 = vcvt.f32.s32 %v5215_v8 }
0x4587   :  { %v5219_v62 = vadd.s32 %v5218_v26, %v5216_v29 }
0x4589   :  { %vm5220_vm15 = vcmp.eq.s32.totalorder %v9085_v23, %v5219_v62  ;;  %5296 = vst [vmem:[#allocation13 + $0x7] sm:$0x1] %v5219_v62 }
0x458a   :  { %v6593_v4 = vsel %vm5220_vm15, 1.0, %v8711_v1 }
0x458b   :  { %7686 = vmatmul.mubr.msk.f32.vlgmr.msra.gmra.mrb[48].mxu1 %vm805_vm5, %v6593_v4 }
0x458c   :  { %8243 = vmatpush3.bf16.msra.mxu1 %v9739_v42  ;;  %7718 = vmatprep.mubr.msk.f32.mxu1 %vm8710_vm0, %v8711_v1 }
0x458d   :  { %8244 = vmatprep.subr.bf16.mxu1 %v8709_v0 }
0x4590   :  { %8246 = vmatpush3.bf16.msra.mxu1 %v9745_v38  ;;  %v5380_v38 = vld [vmem:[#allocation5] sm:$0x1] }
0x4591   :  { %8253 = vmatprep.subr.bf16.mxu1 %v8709_v0 }
0x465e   :  { %v5292_v60 = vpop.f32.mrb[48].mxu1 }
0x465f   :  { %v7687_v32 = vpop.f32.mrb[49].mxu1  ;;  %7697 = vmatmul.mubr.msk.f32.vlgmr.msra.gmra.mrb[64].mxu0 %vm154_vm1, %v5292_v60 }
0x4660   :  { %8237 = vmatpush3.bf16.msra.mxu0 %v9704_v18  ;;  %7707 = vmatprep.mubr.msk.f32.mxu0 %vm8710_vm0, %v8711_v1 }
0x4661   :  { %8238 = vmatprep.subr.bf16.mxu0 %v8709_v0 }
0x4664   :  { %8240 = vmatpush3.bf16.msra.mxu0 %v9714_v7 }
0x4665   :  { %8247 = vmatprep.subr.bf16.mxu0 %v8709_v0 }
0x4667   :  { %7708 = vmatmul.mubr.msk.f32.vlgmr.msra.gmra.mrb[66].mxu0 %vm154_vm1, %v9877_v50 }
0x4668   :  { %8249 = vmatpush3.bf16.msra.mxu0 %v9798_v20  ;;  %7729 = vmatprep.mubr.msk.f32.mxu0 %vm8710_vm0, %v8711_v1  ;;  %v5302_v20 = vld [vmem:[%s10198_s5] sm:$0x1] }
0x4669   :  { %8250 = vmatprep.subr.bf16.mxu0 %v8709_v0 }
0x466c   :  { %8252 = vmatpush3.bf16.msra.mxu0 %v9801_v40 }
0x466d   :  { %8259 = vmatprep.subr.bf16.mxu0 %v8709_v0 }
0x4732   :  { %v5372_v18 = vpop.f32.mrb[64].mxu0 }
0x4733   :  { %v7698_v42 = vpop.f32.mrb[65].mxu0  ;;  %v5373_v50 = vadd.f32 %v5372_v18, %v5302_v20 }
0x473a   :  { %v5447_v7 = vpop.f32.mrb[66].mxu0 }
0x473b   :  { %v5448_v21 = vadd.f32 %v5447_v7, %v5380_v38  ;;  %v7709_v58 = vpop.f32.mrb[67].mxu0 }
0x473d   :  { %5459 = vrot.lane.b32.xlu0 %v5448_v21, %s8712_s26  ;;  %v5451_v3 = vadd.f32 %v5448_v21, %v5373_v50 }
0x473f   :  { %v6597_v10 = vmul.f32 -1.442695, %v5451_v3 }
0x4741   :  { %8441 = vpow2.f32 %v6597_v10 }
0x474b   :  { %v8442_v44 = vpop.eup %8441 }
0x474c   :  { %v5455_v40 = vadd.f32 1.0, %v8442_v44 }
0x474e   :  { %8443 = vrcp.f32 %v5455_v40 }
0x4758   :  { %v8444_v16 = vpop.eup %8443 }
0x4759   :  { %v5469_v39 = vsub.f32 1.0, %v8444_v16  ;;  %v5475_v53 = vmul.f32 %v8444_v16, %v9873_v59 }
0x47af   :  { %v5460_v15 = vpop.permute.xlu0 %5459 }
0x47b0   :  { %v5462_v56 = vmul.f32 %v8444_v16, %v5460_v15 }
0x47b2   :  { %5464 = vrot.lane.b32.xlu1 %v5462_v56, %s8712_s26 }
0x4824   :  { %v5465_v2 = vpop.permute.xlu1 %5464 }
0x4825   :  { %v5467_v61 = vadd.f32 %v5465_v2, %v5373_v50 }
0x4827   :  { %8445 = vtanh.f32 %v5467_v61 }
0x4831   :  { %v8446_v9 = vpop.eup %8445 }
0x4832   :  { %5471 = vrot.lane.b32.xlu1 %v8446_v9, %s8713_s25 }
0x48a4   :  { %v5472_v12 = vpop.permute.xlu1 %5471 }
0x48a5   :  { %v5474_v54 = vmul.f32 %v5472_v12, %v5469_v39 }
0x48a7   :  { %v9973_v41 = vadd.f32 %v5475_v53, %v5474_v54  ;;  %v5742_v54 = vld [vmem:[%s10206_s13] sm:$0x1] }
0x48a9   :  { %5482 = vrot.lane.b32.xlu0 %v9973_v41, %s8713_s25 }
0x491b   :  { %v9977_v37 = vpop.permute.xlu0 %5482 }
0x491c   :  { %7719 = vmatmul.mubr.msk.f32.vlgmr.msra.gmra.mrb[50].mxu1 %vm154_vm1, %v9977_v37 }
0x491d   :  { %8255 = vmatpush3.bf16.msra.mxu1 %v9762_v52  ;;  %7740 = vmatprep.mubr.msk.f32.mxu1 %vm8710_vm0, %v8711_v1 }
0x491e   :  { %8256 = vmatprep.subr.bf16.mxu1 %v8709_v0 }
0x4921   :  { %8258 = vmatpush3.bf16.msra.mxu1 %v9775_v63 }
0x4922   :  { %8265 = vmatprep.subr.bf16.mxu1 %v8709_v0 }
0x4924   :  { %7741 = vmatmul.mubr.msk.f32.vlgmr.msra.gmra.mrb[52].mxu1 %vm154_vm1, %v9977_v37 }
0x4925   :  { %8267 = vmatpush3.bf16.msra.mxu1 %v9102_v33  ;;  %7770 = vmatprep.mubr.msk.f32.mxu1 %vm8710_vm0, %v8711_v1 }
0x4926   :  { %8268 = vmatprep.subr.bf16.mxu1 %v8709_v0 }
0x4929   :  { %8270 = vmatpush3.bf16.msra.mxu1 %v9108_v35 }
0x492a   :  { %8271 = vmatprep.subr.bf16.mxu1 %v8709_v0 }
0x492d   :  { %8273 = vmatpush3.bf16.msra.mxu1 %v9119_v43 }
0x492e   :  { %8274 = vmatprep.subr.bf16.mxu1 %v8709_v0 }
0x4931   :  { %8276 = vmatpush3.bf16.msra.mxu1 %v9129_v46 }
0x4932   :  { %8289 = vmatprep.subr.bf16.mxu1 %v8709_v0 }
0x49ef   :  { %v5552_v52 = vpop.f32.mrb[50].mxu1 }
0x49f0   :  { %v5559_v33 = vrot.slane %v5552_v52, %v8985_v47  ;;  %v7720_v63 = vpop.f32.mrb[51].mxu1 }
0x49f2   :  { %v5560_v59 = vadd.f32 %v5559_v33, %v9035_v6 }
0x49f4   :  { %8447 = vtanh.f32 %v5560_v59 }
0x49f7   :  { %v5738_v57 = vpop.f32.mrb[52].mxu1 }
0x49f8   :  { %v7742_v8 = vpop.f32.mrb[53].mxu1 }
0x49fe   :  { %v8448_v35 = vpop.eup %8447 }
0x49ff   :  { %v5562_v26 = vmul.f32 %v9904_v28, %v8448_v35 }
0x4a01   :  { %v5563_v43 = vsel %vm154_vm1, %v5562_v26, 0.0 }
0x4a02   :  { %5564 = vadd.xlane.f32.xlu1 %v5563_v43 }
0x4a8f   :  { %v5565_v29 = vpop.xlane.xlu1 %5564 }
0x4a90   :  { %v5566_v62 = vrot.slane %v5565_v29, 4 }
0x4a92   :  { %v5567_v46 = vmax.f32 %v5565_v29, %v5566_v62 }
0x4a94   :  { %v5568_v4 = vrot.slane %v5567_v46, 2 }
0x4a96   :  { %v5569_v60 = vmax.f32 %v5567_v46, %v5568_v4 }
0x4a98   :  { %v5570_v32 = vrot.slane %v5569_v60, 1 }
0x4a9a   :  { %v5571_v18 = vmax.f32 %v5569_v60, %v5570_v32 }
0x4a9c   :  { %v5572_v42 = vsub.f32 %v5565_v29, %v5571_v18 }
0x4a9e   :  { %v5573_v38 = vmul.f32 1.442695, %v5572_v42  ;;  %v5929_v42 = vld [vmem:[%s10196_s3] sm:$0xff] }
0x4aa0   :  { %8449 = vpow2.f32 %v5573_v38  ;;  %v5930_v38 = vld [vmem:[%s10196_s3 + $0x8] sm:$0xff] }
0x4aaa   :  { %v8450_v7 = vpop.eup %8449 }
0x4aab   :  { %v5575_v21 = vrot.slane %v8450_v7, 4 }
0x4aad   :  { %v5576_v58 = vadd.f32 %v8450_v7, %v5575_v21  ;;  %v8278_v21 = vpack.c.bf16 %v5930_v38, %v5929_v42  ;;  %v6109_v42 = vld [vmem:[%s10200_s7 + $0x8] sm:$0xff]  ;;  %v6110_v38 = vld [vmem:[%s10200_s7 + $0x10] sm:$0xff] }
0x4aaf   :  { %v5577_v20 = vrot.slane %v5576_v58, 2 }
0x4ab1   :  { %v5578_v50 = vadd.f32 %v5577_v20, %v5576_v58  ;;  %v5932_v58 = vld [vmem:[%s10196_s3 + $0x18] sm:$0xff] }
0x4ab3   :  { %v5579_v3 = vrot.slane %v5578_v50, 1 }
0x4ab5   :  { %v5580_v10 = vadd.f32 %v5579_v3, %v5578_v50 }
0x4ab7   :  { %8451 = vrcp.f32 %v5580_v10 }
0x4ac1   :  { %v8452_v44 = vpop.eup %8451 }
0x4ac2   :  { %v5582_v40 = vmul.f32 %v8452_v44, %v8450_v7  ;;  %v5931_v7 = vld [vmem:[%s10196_s3 + $0x10] sm:$0xff] }
0x4ac3   :  { %v8281_v20 = vpack.c.bf16 %v5932_v58, %v5931_v7 }
0x4ac4   :  { %v5583_v16 = vmul.f32 %v9908_v14, %v5582_v40 }
0x4ac6   :  { %v5584_v15 = vsel %vm154_vm1, %v5583_v16, 0.0 }
0x4ac7   :  { %v5585_v56 = vrot.slane %v5584_v15, 4 }
0x4ac9   :  { %v5586_v2 = vadd.f32 %v5585_v56, %v5584_v15  ;;  %v6007_v15 = vld [vmem:[%s10197_s4] sm:$0xff]  ;;  %v6008_v56 = vld [vmem:[%s10197_s4 + $0x8] sm:$0xff] }
0x4acb   :  { %v5587_v61 = vrot.slane %v5586_v2, 2 }
0x4acd   :  { %v5588_v9 = vadd.f32 %v5587_v61, %v5586_v2  ;;  %v8284_v2 = vpack.c.bf16 %v6008_v56, %v6007_v15  ;;  %v6009_v61 = vld [vmem:[%s10197_s4 + $0x10] sm:$0xff]  ;;  %v6223_v15 = vld [vmem:[%s10204_s11 + $0x8] sm:$0xff] }
0x4acf   :  { %v5589_v39 = vrot.slane %v5588_v9, 1 }
0x4ad1   :  { %v5590_v12 = vadd.f32 %v5589_v39, %v5588_v9  ;;  %v6010_v9 = vld [vmem:[%s10197_s4 + $0x18] sm:$0xff] }
0x4ad3   :  { %7730 = vmatmul.mubr.msk.f32.vlgmr.msra.gmra.mrb[68].mxu0 %vm154_vm1, %v5590_v12 }
0x4ad4   :  { %8261 = vmatpush3.bf16.msra.mxu0 %v9811_v17  ;;  %7751 = vmatprep.mubr.msk.f32.mxu0 %vm8710_vm0, %v8711_v1  ;;  %v5749_v17 = vld [vmem:[%s10208_s15] sm:$0x1] }
0x4ad5   :  { %8262 = vmatprep.subr.bf16.mxu0 %v8709_v0 }
0x4ad8   :  { %8264 = vmatpush3.bf16.msra.mxu0 %v9814_v49 }
0x4ad9   :  { %8277 = vmatprep.subr.bf16.mxu0 %v8709_v0 }
0x4ba6   :  { %v5668_v53 = vpop.f32.mrb[68].mxu0 }
0x4ba7   :  { %v5739_v52 = vadd.f32 %v5738_v57, %v5668_v53  ;;  %v7731_v33 = vpop.f32.mrb[69].mxu0  ;;  %v8287_v53 = vpack.c.bf16 %v6010_v9, %v6009_v61 }
0x4ba8   :  { %v6011_v33 = vld [vmem:[#allocation5] sm:$0x1] }
0x4ba9   :  { %v5743_v63 = vadd.f32 %v5742_v54, %v5739_v52 }
0x4bab   :  { %8453 = vtanh.f32 %v5743_v63 }
0x4bb5   :  { %v8454_v59 = vpop.eup %8453 }
0x4bb6   :  { %7752 = vmatmul.mubr.msk.f32.vlgmr.msra.gmra.mrb[70].mxu0 %vm154_vm1, %v8454_v59 }
0x4bb7   :  { %7781 = vmatprep.mubr.msk.f32.mxu0 %vm8710_vm0, %v8711_v1  ;;  %8279 = vmatpush3.bf16.msra.mxu0 %v8278_v21  ;;  %v6111_v21 = vld [vmem:[%s10200_s7 + $0x18] sm:$0xff] }
0x4bb8   :  { %8280 = vmatprep.subr.bf16.mxu0 %v8709_v0  ;;  %v8293_v58 = vpack.c.bf16 %v6111_v21, %v6110_v38 }
0x4bbb   :  { %8282 = vmatpush3.bf16.msra.mxu0 %v8281_v20 }
0x4bbc   :  { %8283 = vmatprep.subr.bf16.mxu0 %v8709_v0 }
0x4c89   :  { %v5819_v49 = vpop.f32.mrb[70].mxu0 }
0x4c8a   :  { %v10021_v8 = vadd.f32 %v5819_v49, %v5749_v17  ;;  %v7753_v35 = vpop.f32.mrb[71].mxu0  ;;  %v5933_v49 = vld [vmem:[%s10198_s5] sm:$0x1] }
0x4c8c   :  { %v5823_v57 = vsel %vm773_vm2, %v10021_v8, -inf }
0x4c8d   :  { %5824 = vmax.xlane.f32.xlu0 %v5823_v57 }
0x4d1a   :  { %v10025_v26 = vpop.xlane.xlu0 %5824 }
0x4d1b   :  { %vm5834_vm3 = vcmp.eq.f32.partialorder %v10021_v8, %v10025_v26 }
0x4d1c   :  { %v5835_v43 = vsel %vm5834_vm3, %v9085_v23, 64 }
0x4d1d   :  { %v5836_v29 = vsel %vm773_vm2, %v5835_v43, 2147483647 }
0x4d1e   :  { %v5838_v62 = vshra.s32 %v5836_v29, 16  ;;  %v5837_v4 = vand.u32 65535, %v5836_v29 }
0x4d20   :  { %v5840_v46 = vcvt.s32.f32 %v5838_v62  ;;  %v5839_v32 = vcvt.s32.f32 %v5837_v4 }
0x4d22   :  { %5841 = vmin.xlane.f32.xlu0 %v5840_v46 }
0x4daf   :  { %v5842_v60 = vpop.xlane.xlu0 %5841 }
0x4db0   :  { %vm5843_vm4 = vcmp.eq.f32.partialorder %v5840_v46, %v5842_v60  ;;  %v5848_v50 = vcvt.f32.s32 %v5842_v60 }
0x4db1   :  { %v5844_v18 = vsel %vm5843_vm4, %v5839_v32, inf }
0x4db2   :  { %5845 = vmin.xlane.f32.xlu1 %v5844_v18  ;;  %v5849_v10 = vshll.u32 %v5848_v50, 16  ;;  %v6108_v18 = vld [vmem:[%s10200_s7] sm:$0xff] }
0x4db3   :  { %v8290_v7 = vpack.c.bf16 %v6109_v42, %v6108_v18  ;;  %v6229_v18 = vld [vmem:[#allocation10 + $0x18] sm:$0xff] }
0x4e3f   :  { %v5846_v3 = vpop.xlane.xlu1 %5845 }
0x4e40   :  { %v5847_v44 = vcvt.f32.s32 %v5846_v3 }
0x4e42   :  { %v5850_v40 = vadd.s32 %v5849_v10, %v5847_v44 }
0x4e44   :  { %vm5851_vm6 = vcmp.eq.s32.totalorder %v9085_v23, %v5850_v40  ;;  %5927 = vst [vmem:[#allocation13 + $0x8] sm:$0x1] %v5850_v40 }
0x4e45   :  { %v6602_v16 = vsel %vm5851_vm6, 1.0, %v8711_v1 }
0x4e46   :  { %7771 = vmatmul.mubr.msk.f32.vlgmr.msra.gmra.mrb[54].mxu1 %vm805_vm5, %v6602_v16  ;;  %v6222_v16 = vld [vmem:[%s10204_s11] sm:$0xff] }
0x4e47   :  { %7803 = vmatprep.mubr.msk.f32.mxu1 %vm8710_vm0, %v8711_v1  ;;  %8291 = vmatpush3.bf16.msra.mxu1 %v8290_v7  ;;  %v8302_v56 = vpack.c.bf16 %v6223_v15, %v6222_v16 }
0x4e48   :  { %8292 = vmatprep.subr.bf16.mxu1 %v8709_v0 }
0x4e4b   :  { %8294 = vmatpush3.bf16.msra.mxu1 %v8293_v58 }
0x4e4c   :  { %8301 = vmatprep.subr.bf16.mxu1 %v8709_v0 }
0x4f19   :  { %v5923_v39 = vpop.f32.mrb[54].mxu1 }
0x4f1a   :  { %v7772_v12 = vpop.f32.mrb[55].mxu1  ;;  %7782 = vmatmul.mubr.msk.f32.vlgmr.msra.gmra.mrb[72].mxu0 %vm154_vm1, %v5923_v39 }
0x4f1b   :  { %8285 = vmatpush3.bf16.msra.mxu0 %v8284_v2  ;;  %7792 = vmatprep.mubr.msk.f32.mxu0 %vm8710_vm0, %v8711_v1  ;;  %v6224_v2 = vld [vmem:[%s10204_s11 + $0x10] sm:$0xff]  ;;  %v777_v12 = vsub.f32 %v9080_v19, %v9087_v25 }
0x4f1c   :  { %8286 = vmatprep.subr.bf16.mxu0 %v8709_v0 }
0x4f1f   :  { %8288 = vmatpush3.bf16.msra.mxu0 %v8287_v53 }
0x4f20   :  { %8295 = vmatprep.subr.bf16.mxu0 %v8709_v0 }
0x4f22   :  { %7793 = vmatmul.mubr.msk.f32.vlgmr.msra.gmra.mrb[74].mxu0 %vm154_vm1, %v9977_v37 }
0x4f23   :  { %7814 = vmatprep.mubr.msk.f32.mxu0 %vm8710_vm0, %v8711_v1 }
0x4fed   :  { %v6003_v54 = vpop.f32.mrb[72].mxu0 }
0x4fee   :  { %v7783_v52 = vpop.f32.mrb[73].mxu0  ;;  %v6004_v35 = vadd.f32 %v6003_v54, %v5933_v49  ;;  %v3302_v49 = vsub.f32 %v9574_v13, %v9578_v11 }
0x4ff0   :  { %v3303_v19 = vmul.f32 1.442695, %v3302_v49 }
0x4ff5   :  { %v6078_v63 = vpop.f32.mrb[74].mxu0 }
0x4ff6   :  { %v6079_v59 = vadd.f32 %v6078_v63, %v6011_v33  ;;  %v7794_v17 = vpop.f32.mrb[75].mxu0  ;;  %v778_v33 = vmul.f32 1.442695, %v777_v12  ;;  %v2040_v63 = vsub.f32 %v9305_v31, %v9309_v34  ;;  %v5826_v31 = vsub.f32 %v10021_v8, %v10025_v26 }
0x4ff8   :  { %6090 = vrot.lane.b32.xlu0 %v6079_v59, %s8712_s26  ;;  %v6082_v57 = vadd.f32 %v6079_v59, %v6004_v35  ;;  %v2041_v17 = vmul.f32 1.442695, %v2040_v63  ;;  %v5827_v13 = vmul.f32 1.442695, %v5826_v31 }
0x4ffa   :  { %v6606_v43 = vmul.f32 -1.442695, %v6082_v57 }
0x4ffc   :  { %8455 = vpow2.f32 %v6606_v43 }
0x5006   :  { %v8456_v37 = vpop.eup %8455 }
0x5007   :  { %v6086_v29 = vadd.f32 1.0, %v8456_v37 }
0x5009   :  { %8457 = vrcp.f32 %v6086_v29 }
0x5013   :  { %v8458_v62 = vpop.eup %8457 }
0x5014   :  { %v6100_v50 = vsub.f32 1.0, %v8458_v62  ;;  %v6106_v10 = vmul.f32 %v8458_v62, %v9973_v41  ;;  %v6225_v41 = vld [vmem:[%s10204_s11 + $0x18] sm:$0xff] }
0x5015   :  { %v8305_v9 = vpack.c.bf16 %v6225_v41, %v6224_v2 }
0x506a   :  { %v6091_v46 = vpop.permute.xlu0 %6090 }
0x506b   :  { %v6093_v4 = vmul.f32 %v8458_v62, %v6091_v46  ;;  %v6226_v46 = vld [vmem:[#allocation10] sm:$0xff] }
0x506d   :  { %6095 = vrot.lane.b32.xlu1 %v6093_v4, %s8712_s26  ;;  %v6227_v4 = vld [vmem:[#allocation10 + $0x8] sm:$0xff] }
0x50df   :  { %v6096_v60 = vpop.permute.xlu1 %6095 }
0x50e0   :  { %v6098_v32 = vadd.f32 %v6096_v60, %v6004_v35  ;;  %v6228_v60 = vld [vmem:[#allocation10 + $0x10] sm:$0xff] }
0x50e1   :  { %v8299_v42 = vpack.c.bf16 %v6229_v18, %v6228_v60 }
0x50e2   :  { %8459 = vtanh.f32 %v6098_v32  ;;  %v8296_v32 = vpack.c.bf16 %v6227_v4, %v6226_v46  ;;  %v6380_v4 = vld [vmem:[%s10208_s15] sm:$0x1] }
0x50e4   :  { %8297 = vmatpush3.bf16.msra.mxu0 %v8296_v32 }
0x50e5   :  { %8298 = vmatprep.subr.bf16.mxu0 %v8709_v0 }
0x50e8   :  { %8300 = vmatpush3.bf16.msra.mxu0 %v8299_v42  ;;  %v1409_v42 = vsub.f32 %v9216_v45, %v9220_v51 }
0x50e9   :  { %8307 = vmatprep.subr.bf16.mxu0 %v8709_v0 }
0x50ec   :  { %v8460_v20 = vpop.eup %8459 }
0x50ed   :  { %6102 = vrot.lane.b32.xlu1 %v8460_v20, %s8713_s25 }
0x515f   :  { %v6103_v3 = vpop.permute.xlu1 %6102 }
0x5160   :  { %v6105_v44 = vmul.f32 %v6103_v3, %v6100_v50 }
0x5162   :  { %v6107_v40 = vadd.f32 %v6106_v10, %v6105_v44 }
0x5164   :  { %6113 = vrot.lane.b32.xlu0 %v6107_v40, %s8713_s25 }
0x51d6   :  { %v6114_v61 = vpop.permute.xlu0 %6113 }
0x51d7   :  { %7804 = vmatmul.mubr.msk.f32.vlgmr.msra.gmra.mrb[56].mxu1 %vm154_vm1, %v6114_v61 }
0x51d8   :  { %8303 = vmatpush3.bf16.msra.mxu1 %v8302_v56  ;;  %7825 = vmatprep.mubr.msk.f32.mxu1 %vm8710_vm0, %v8711_v1 }
0x51d9   :  { %8304 = vmatprep.subr.bf16.mxu1 %v8709_v0 }
0x51dc   :  { %8306 = vmatpush3.bf16.msra.mxu1 %v8305_v9 }
0x51df   :  { %7826 = vmatmul.mubr.msk.f32.vlgmr.msra.gmra.mrb[58].mxu1 %vm154_vm1, %v6114_v61 }
0x52aa   :  { %v6183_v39 = vpop.f32.mrb[56].mxu1 }
0x52ab   :  { %v6190_v53 = vrot.slane %v6183_v39, %v8985_v47  ;;  %v7805_v54 = vpop.f32.mrb[57].mxu1  ;;  %v4564_v47 = vsub.f32 %v9832_v48, %v9836_v24 }
0x52ad   :  { %v6191_v52 = vadd.f32 %v6190_v53, %v9035_v6  ;;  %v4565_v57 = vmul.f32 1.442695, %v4564_v47 }
0x52af   :  { %8461 = vtanh.f32 %v6191_v52 }
0x52b0   :  { %8463 = vpow2.f32 %v778_v33 }
0x52b1   :  { %8465 = vpow2.f32 %v2041_v17 }
0x52b2   :  { %v10116_v59 = vpop.f32.mrb[58].mxu1  ;;  %8467 = vpow2.f32 %v3303_v19 }
0x52b3   :  { %v7827_v35 = vpop.f32.mrb[59].mxu1  ;;  %8469 = vpow2.f32 %v4565_v57 }
0x52b4   :  { %8471 = vpow2.f32 %v5827_v13 }
0x52b9   :  { %v8462_v25 = vpop.eup %8461 }
0x52ba   :  { %v6193_v6 = vmul.f32 %v9904_v28, %v8462_v25  ;;  %v8464_v43 = vpop.eup %8463 }
0x52bb   :  { %v780_v11 = vsel %vm773_vm2, %v8464_v43, 0.0  ;;  %v8466_v37 = vpop.eup %8465 }
0x52bc   :  { %v6194_v34 = vsel %vm154_vm1, %v6193_v6, 0.0  ;;  %v2043_v48 = vsel %vm773_vm2, %v8466_v37, 0.0  ;;  %v8468_v24 = vpop.eup %8467  ;;  %v6377_v37 = vld [vmem:[#allocation11 + $0x8] sm:$0xff] }
0x52bd   :  { %6195 = vadd.xlane.f32.xlu1 %v6194_v34  ;;  %v3305_v28 = vsel %vm773_vm2, %v8468_v24, 0.0  ;;  %v8470_v29 = vpop.eup %8469 }
0x52be   :  { %v4567_v8 = vsel %vm773_vm2, %v8470_v29, 0.0  ;;  %v8472_v26 = vpop.eup %8471 }
0x52bf   :  { %v5829_v62 = vsel %vm773_vm2, %v8472_v26, 0.0 }
0x52c1   :  { %781 = vadd.xlane.f32.xlu1 %v780_v11  ;;  %v6376_v11 = vld [vmem:[#allocation11] sm:$0xff] }
0x52c2   :  { %v8308_v24 = vpack.c.bf16 %v6377_v37, %v6376_v11 }
0x52c5   :  { %2044 = vadd.xlane.f32.xlu1 %v2043_v48  ;;  %v6378_v48 = vld [vmem:[#allocation11 + $0x10] sm:$0xff] }
0x52c9   :  { %3306 = vadd.xlane.f32.xlu1 %v3305_v28  ;;  %v6379_v28 = vld [vmem:[#allocation11 + $0x18] sm:$0xff] }
0x52cd   :  { %4568 = vadd.xlane.f32.xlu1 %v4567_v8  ;;  %v6373_v8 = vld [vmem:[%s10206_s13] sm:$0x1]  ;;  %s8715_s13 = smov [#allocation14]  }
0x52ce   :  { %s6501_s15 = sshll.u32 %s8715_s13, 4  ;;  %s6502_s15 = int_to_ptr.vmem [resolvable:$true] %s6501_s15 }
0x52cf   :  { %s8645_s24 = scalar_lea.vmem %s6502_s15, 256  ;;  %p8650_p7 = scmp.lt.s32.totalorder %s6502_s15, %s6502_s15 }
0x52d0   :  { %p8646_p6 = scmp.ne.s32.totalorder %s6502_s15, %s8645_s24  ;;  %p8651_p8 = scmp.lt.s32.totalorder %s8645_s24, %s8645_s24 }
0x52d1   :  { %5830 = vadd.xlane.f32.xlu1 %v5829_v62 }
0x52d2   :  { %p8652_p9 = por %p8651_p8, %p8650_p7 }
0x52d4   :  { %p8653_p10 = pnand %p8652_p9, %p8646_p6 }
0x534a   :  { %v6196_v38 = vpop.xlane.xlu1 %6195 }
0x534b   :  { %v6197_v7 = vrot.slane %v6196_v38, 4 }
0x534d   :  { %v6198_v21 = vmax.f32 %v6196_v38, %v6197_v7 }
0x534e   :  { %v782_v58 = vpop.xlane.xlu1 %781 }
0x534f   :  { %v6199_v20 = vrot.slane %v6198_v21, 2  ;;  %8473 = vrcp.f32 %v782_v58 }
0x5351   :  { %v6200_v50 = vmax.f32 %v6198_v21, %v6199_v20  ;;  %v3933_v21 = vsub.f32 %v9663_v36, %v9667_v22 }
0x5352   :  { %v2045_v3 = vpop.xlane.xlu1 %2044 }
0x5353   :  { %v6201_v10 = vrot.slane %v6200_v50, 1  ;;  %8475 = vrcp.f32 %v2045_v3  ;;  %v3934_v20 = vmul.f32 1.442695, %v3933_v21 }
0x5355   :  { %v6202_v44 = vmax.f32 %v6200_v50, %v6201_v10  ;;  %v5195_v50 = vsub.f32 %v9932_v55, %v9936_v5 }
0x5356   :  { %v3307_v40 = vpop.xlane.xlu1 %3306 }
0x5357   :  { %v6203_v16 = vsub.f32 %v6196_v38, %v6202_v44  ;;  %8477 = vrcp.f32 %v3307_v40  ;;  %v2671_v38 = vsub.f32 %v9481_v27, %v9485_v30  ;;  %v5196_v10 = vmul.f32 1.442695, %v5195_v50 }
0x5359   :  { %v8474_v15 = vpop.eup %8473  ;;  %v6204_v56 = vmul.f32 1.442695, %v6203_v16  ;;  %v2672_v7 = vmul.f32 1.442695, %v2671_v38 }
0x535a   :  { %880 = vst [vmem:[#allocation14] sm:$0x1] %v8474_v15  ;;  %v4569_v2 = vpop.xlane.xlu1 %4568 }
0x535b   :  { %8479 = vpow2.f32 %v6204_v56 }
0x535c   :  { %8481 = vrcp.f32 %v4569_v2 }
0x535d   :  { %v8476_v41 = vpop.eup %8475 }
0x535e   :  { %2142 = vst [vmem:[#allocation14 + $0x2] sm:$0x1] %v8476_v41  ;;  %v5831_v61 = vpop.xlane.xlu1 %5830 }
0x535f   :  { %8483 = vrcp.f32 %v5831_v61 }
0x5361   :  { %v8478_v9 = vpop.eup %8477 }
0x5362   :  { %3404 = vst [vmem:[#allocation14 + $0x4] sm:$0x1] %v8478_v9 }
0x5365   :  { %v8480_v39 = vpop.eup %8479 }
0x5366   :  { %v8482_v12 = vpop.eup %8481  ;;  %v6206_v53 = vrot.slane %v8480_v39, 4 }
0x5367   :  { %4666 = vst [vmem:[#allocation14 + $0x6] sm:$0x1] %v8482_v12 }
0x5368   :  { %v6207_v54 = vadd.f32 %v8480_v39, %v6206_v53 }
0x5369   :  { %v8484_v52 = vpop.eup %8483 }
0x536a   :  { %v6208_v33 = vrot.slane %v6207_v54, 2  ;;  %5928 = vst [vmem:[#allocation14 + $0x8] sm:$0x1] %v8484_v52 }
0x536c   :  { %v6209_v63 = vadd.f32 %v6208_v33, %v6207_v54 }
0x536e   :  { %v6210_v17 = vrot.slane %v6209_v63, 1 }
0x5370   :  { %v6211_v49 = vadd.f32 %v6210_v17, %v6209_v63 }
0x5372   :  { %8485 = vrcp.f32 %v6211_v49 }
0x537c   :  { %v8486_v35 = vpop.eup %8485 }
0x537d   :  { %v6213_v19 = vmul.f32 %v8486_v35, %v8480_v39 }
0x537f   :  { %v6214_v47 = vmul.f32 %v9908_v14, %v6213_v19  ;;  %v8311_v14 = vpack.c.bf16 %v6379_v28, %v6378_v48 }
0x5381   :  { %v6215_v25 = vsel %vm154_vm1, %v6214_v47, 0.0 }
0x5382   :  { %v6216_v6 = vrot.slane %v6215_v25, 4 }
0x5384   :  { %v6217_v57 = vadd.f32 %v6216_v6, %v6215_v25 }
0x5386   :  { %v6218_v31 = vrot.slane %v6217_v57, 2 }
0x5388   :  { %v6219_v34 = vadd.f32 %v6218_v31, %v6217_v57 }
0x538a   :  { %v6220_v43 = vrot.slane %v6219_v34, 1 }
0x538c   :  { %v6221_v13 = vadd.f32 %v6220_v43, %v6219_v34 }
0x538e   :  { %7815 = vmatmul.mubr.msk.f32.vlgmr.msra.gmra.mrb[76].mxu0 %vm154_vm1, %v6221_v13 }
0x538f   :  { %7836 = vmatprep.mubr.msk.f32.mxu0 %vm8710_vm0, %v8711_v1  ;;  %8309 = vmatpush3.bf16.msra.mxu0 %v8308_v24 }
0x5390   :  { %8310 = vmatprep.subr.bf16.mxu0 %v8709_v0 }
0x5393   :  { %8312 = vmatpush3.bf16.msra.mxu0 %v8311_v14 }
0x5461   :  { %v6299_v29 = vpop.f32.mrb[76].mxu0 }
0x5462   :  { %v6370_v26 = vadd.f32 %v10116_v59, %v6299_v29  ;;  %v7816_v62 = vpop.f32.mrb[77].mxu0  ;;  %v1410_v59 = vmul.f32 1.442695, %v1409_v42 }
0x5464   :  { %v6374_v46 = vadd.f32 %v6373_v8, %v6370_v26 }
0x5466   :  { %8487 = vtanh.f32 %v6374_v46 }
0x5467   :  { %8489 = vpow2.f32 %v1410_v59 }
0x5468   :  { %8491 = vpow2.f32 %v2672_v7 }
0x5469   :  { %8493 = vpow2.f32 %v3934_v20 }
0x546a   :  { %8495 = vpow2.f32 %v5196_v10 }
0x5470   :  { %v8488_v1 = vpop.eup %8487 }
0x5471   :  { %7837 = vmatmul.mubr.msk.f32.vlgmr.msra.gmra.mrb[78].mxu0 %vm154_vm1, %v8488_v1  ;;  %v8490_v44 = vpop.eup %8489 }
0x5472   :  { %v1412_v22 = vsel %vm773_vm2, %v8490_v44, 0.0  ;;  %v8492_v40 = vpop.eup %8491 }
0x5473   :  { %v2674_v55 = vsel %vm773_vm2, %v8492_v40, 0.0  ;;  %v8494_v5 = vpop.eup %8493 }
0x5474   :  { %v8496_v16 = vpop.eup %8495 }
0x5475   :  { %v5198_v15 = vsel %vm773_vm2, %v8496_v16, 0.0 }
0x5544   :  { %v6450_v60 = vpop.f32.mrb[78].mxu0 }
0x5545   :  { %v6451_v0 = vadd.f32 %v6450_v60, %v6380_v4  ;;  %v7838_v32 = vpop.f32.mrb[79].mxu0 }
0x5547   :  { %v6454_v18 = vsel %vm773_vm2, %v6451_v0, -inf }
0x5548   :  { %6455 = vmax.xlane.f32.xlu0 %v6454_v18 }
0x55d5   :  { %v6456_v58 = vpop.xlane.xlu0 %6455 }
0x55d6   :  { %vm6465_vm0 = vcmp.eq.f32.partialorder %v6451_v0, %v6456_v58  ;;  %v6457_v27 = vsub.f32 %v6451_v0, %v6456_v58 }
0x55d7   :  { %v6466_v3 = vsel %vm6465_vm0, %v9085_v23, 64  ;;  %v3936_v23 = vsel %vm773_vm2, %v8494_v5, 0.0 }
0x55d8   :  { %v6467_v45 = vsel %vm773_vm2, %v6466_v3, 2147483647  ;;  %v6458_v36 = vmul.f32 1.442695, %v6457_v27 }
0x55d9   :  { %v6469_v51 = vshra.s32 %v6467_v45, 16  ;;  %v6468_v41 = vand.u32 65535, %v6467_v45 }
0x55da   :  { %8497 = vpow2.f32 %v6458_v36 }
0x55db   :  { %v6471_v30 = vcvt.s32.f32 %v6469_v51  ;;  %v6470_v9 = vcvt.s32.f32 %v6468_v41 }
0x55dd   :  { %6472 = vmin.xlane.f32.xlu0 %v6471_v30 }
0x55e1   :  { %1413 = vadd.xlane.f32.xlu0 %v1412_v22 }
0x55e4   :  { %v8498_v56 = vpop.eup %8497 }
0x55e5   :  { %2675 = vadd.xlane.f32.xlu0 %v2674_v55  ;;  %v6460_v2 = vsel %vm773_vm2, %v8498_v56, 0.0 }
0x55e9   :  { %3937 = vadd.xlane.f32.xlu0 %v3936_v23 }
0x55ed   :  { %5199 = vadd.xlane.f32.xlu0 %v5198_v15 }
0x55f1   :  { %6461 = vadd.xlane.f32.xlu0 %v6460_v2 }
0x566a   :  { %v6473_v61 = vpop.xlane.xlu0 %6472 }
0x566b   :  { %vm6474_vm1 = vcmp.eq.f32.partialorder %v6471_v30, %v6473_v61 }
0x566c   :  { %v6475_v39 = vsel %vm6474_vm1, %v6470_v9, inf }
0x566d   :  { %6476 = vmin.xlane.f32.xlu1 %v6475_v39 }
0x566e   :  { %v1414_v12 = vpop.xlane.xlu0 %1413 }
0x566f   :  { %8499 = vrcp.f32 %v1414_v12 }
0x5672   :  { %v2676_v53 = vpop.xlane.xlu0 %2675 }
0x5673   :  { %8501 = vrcp.f32 %v2676_v53 }
0x5676   :  { %v3938_v54 = vpop.xlane.xlu0 %3937 }
0x5677   :  { %8503 = vrcp.f32 %v3938_v54 }
0x5679   :  { %v8500_v52 = vpop.eup %8499 }
0x567a   :  { %1511 = vst [vmem:[#allocation14 + $0x1] sm:$0x1] %v8500_v52  ;;  %v5200_v33 = vpop.xlane.xlu0 %5199 }
0x567b   :  { %8505 = vrcp.f32 %v5200_v33 }
0x567d   :  { %v8502_v63 = vpop.eup %8501 }
0x567e   :  { %2773 = vst [vmem:[#allocation14 + $0x3] sm:$0x1] %v8502_v63  ;;  %v6462_v17 = vpop.xlane.xlu0 %6461 }
0x567f   :  { %8507 = vrcp.f32 %v6462_v17 }
0x5681   :  { %v8504_v49 = vpop.eup %8503 }
0x5682   :  { %4035 = vst [vmem:[#allocation14 + $0x5] sm:$0x1] %v8504_v49 }
0x5685   :  { %v8506_v35 = vpop.eup %8505 }
0x5686   :  { %5297 = vst [vmem:[#allocation14 + $0x7] sm:$0x1] %v8506_v35 }
0x5689   :  { %v8508_v19 = vpop.eup %8507 }
0x568a   :  { %6483 = vst [vmem:[#allocation14 + $0x9] sm:$0x1] %v8508_v19 }
0x568b   :  { %8656 = shalt.err (!%p8653_p10)
}
0x568c   :  { %s8657_s4 = scalar_lea.hbm %s10210_s17, 256 }
0x568d   :  { %p8658_p11 = scmp.ne.s32.totalorder %s10210_s17, %s8657_s4  ;;  %p8661_p12 = scmp.lt.u32.totalorder %s8657_s4, %s10210_s17 }
0x568f   :  { %p8663_p13 = pnand %p8661_p12, %p8658_p11 }
0x5691   :  { %8666 = shalt.err (!%p8663_p13)
}
0x5692   :  { %6507 = dma.vmem_to_hbm [thread:$0]  %s6502_s15, 256, %s10210_s17, [#allocation15], %s8705_s21, %s8705_s21, %s8706_s28   ;;  %v6479_v47 = vcvt.f32.s32 %v6473_v61 }
0x5693   :  { %s8716_s19 = smov [#allocation13]  }
0x5694   :  { %s6489_s27 = sshll.u32 %s8716_s19, 4  ;;  %v6480_v6 = vshll.u32 %v6479_v47, 16  ;;  %s6490_s27 = int_to_ptr.vmem [resolvable:$true] %s6489_s27 }
0x5695   :  { %s8667_s14 = scalar_lea.vmem %s6490_s27, 256  ;;  %p8672_p1 = scmp.lt.s32.totalorder %s6490_s27, %s6490_s27 }
0x5696   :  { %p8668_p0 = scmp.ne.s32.totalorder %s6490_s27, %s8667_s14  ;;  %p8673_p2 = scmp.lt.s32.totalorder %s8667_s14, %s8667_s14 }
0x5698   :  { %p8674_p3 = por %p8673_p2, %p8672_p1 }
0x569a   :  { %p8675_p4 = pnand %p8674_p3, %p8668_p0 }
0x56fa   :  { %v6477_v25 = vpop.xlane.xlu1 %6476 }
0x56fb   :  { %v6478_v57 = vcvt.f32.s32 %v6477_v25 }
0x56fd   :  { %v6481_v31 = vadd.s32 %v6480_v6, %v6478_v57 }
0x56ff   :  { %6482 = vst [vmem:[#allocation13 + $0x9] sm:$0x1] %v6481_v31 }
0x5700   :  { %8678 = shalt.err (!%p8675_p4)
}
0x5701   :  { %s8679_s17 = scalar_lea.hbm %s10209_s16, 256 }
0x5702   :  { %p8680_p5 = scmp.ne.s32.totalorder %s10209_s16, %s8679_s17  ;;  %p8683_p6 = scmp.lt.u32.totalorder %s8679_s17, %s10209_s16 }
0x5704   :  { %p8685_p7 = pnand %p8683_p6, %p8680_p5 }
0x5706   :  { %8688 = shalt.err (!%p8685_p7)
}
0x5707   :  { %6495 = dma.vmem_to_hbm [thread:$0]  %s6490_s27, 256, %s10209_s16, [#allocation4], %s8705_s21, %s8705_s21, %s8706_s28  }
0x5708   :  { %8697 = dma.done.wait [#allocation4], 256  }
0x5709   :  { %8698 = vsyncadd [#allocation4], 4294967040 }
0x570a   :  { %8699 = dma.done.wait [#allocation15], 256  }
0x570b   :  { %8700 = vsyncadd [#allocation15], 4294967040 }
0x570c   :  { %6514 = vsyncpa [#allocation3], 1 }
0x570d   :  { %6515 = vsyncpa [#allocation6], 1 }
0x570e   :  { %6516 = vsyncpa [#allocation9], 1 }
0x570f   :  { %6517 = vsyncpa [#allocation12], 1 }
0x5710   :  { %6518 = vsyncpa [#allocation4], 1 }
0x5711   :  { %6519 = vsyncpa [#allocation15], 1 }

</bundles_post_ra>
